<compile_context>
chip_gen: v7x
topology: tpu7x:2x2x1
jax: 0.10.0
libtpu: 0.0.40
codegen_flags: <defaults>
</compile_context>

<pallas_src>
import jax
import jax.numpy as jnp
from jax import lax
from jax.experimental import pallas as pl
from jax.experimental.pallas import tpu as pltpu


# --------------------------------------------------------------------------
# Fused kernel factory
# --------------------------------------------------------------------------
def _make_tagger_kernel(num_layers, T, BB, H):
    """Fused tagger kernel for one batch tile of BB rows.

    Ref order (inputs, outputs, scratch):
      x_ref                      (T*BB, E)    bf16  time-major flat embeddings
      for each layer l:
        wih_ref                  (Din, 8H)    bf16  [fwd | bwd] input->gates
        whh_ref                  (H,   8H)    bf16  [fwd | bwd] hidden->gates
        b_ref                    (1,   8H)    f32   [fwd | bwd] b_ih + b_hh
      wtag_ref                   (2H,  Kp)    bf16  hidden2tag weight (lane padded)
      btag_ref                   (1,   Kp)    f32   hidden2tag bias (-1e9 in pad lanes)
      out_ref                    (T*BB, Kp)   f32   log-softmax tag scores
      xproj_ref                  (T*BB, 8H)   f32   VMEM scratch (input projection)
      seq_ref                    (T*BB, 2H)   bf16  VMEM scratch (fwd|bwd layer outputs)
    """
    TWO_BB = 2 * BB

    def kernel(*refs):
        x_ref = refs[0]
        layer_refs = refs[1:1 + 3 * num_layers]
        wtag_ref = refs[1 + 3 * num_layers]
        btag_ref = refs[2 + 3 * num_layers]
        out_ref = refs[3 + 3 * num_layers]
        xproj_ref = refs[4 + 3 * num_layers]
        seq_ref = refs[5 + 3 * num_layers]

        # Lane mask over the stacked (2*BB, 4H) gate block: the "g" gate lives
        # in lanes [2H, 3H).  Hoisted once; reused by every step of every layer.
        lane = lax.broadcasted_iota(jnp.int32, (TWO_BB, 4 * H), 1)
        is_g = jnp.logical_and(lane >= 2 * H, lane < 3 * H)
        scale = jnp.where(is_g, jnp.float32(1.0), jnp.float32(0.5))
        offset = jnp.float32(1.0) - scale           # 0 on g lanes, 0.5 elsewhere

        # TODO(synk): nn.LSTM inter-layer dropout (p=0.2) omitted — eval-mode semantics.
        for l in range(num_layers):
            wih = layer_refs[3 * l][...]             # (Din, 8H) bf16
            whh = layer_refs[3 * l + 1][...]         # (H,   8H) bf16
            b = layer_refs[3 * l + 2][...]           # (1,   8H) f32

            # ---- hoisted input projection for ALL timesteps -> VMEM scratch ----
            xin = x_ref[...] if l == 0 else seq_ref[...]          # bf16
            xproj_ref[...] = jnp.dot(xin, wih,
                                     preferred_element_type=jnp.float32) + b

            # ---- recurrence: fwd & bwd fused into one stacked state ----
            def step(t, carry):
                h_st, c_st = carry                   # (2BB, H) f32; rows [0,BB)=fwd
                tb = T - 1 - t
                if isinstance(t, int):
                    row_f, row_b = t * BB, tb * BB
                else:
                    row_f = pl.multiple_of(t * BB, BB)
                    row_b = pl.multiple_of(tb * BB, BB)

                # one MXU push per step: stacked h against the full W_hh
                rec = jnp.dot(h_st.astype(jnp.bfloat16), whh,
                              preferred_element_type=jnp.float32)   # (2BB, 8H)
                pre = jnp.concatenate(
                    [xproj_ref[pl.ds(row_f, BB), 0:4 * H],
                     xproj_ref[pl.ds(row_b, BB), 4 * H:8 * H]], axis=0)
                g = pre + jnp.concatenate(
                    [rec[0:BB, 0:4 * H], rec[BB:TWO_BB, 4 * H:8 * H]], axis=0)

                # single-tanh gate pass: sigmoid(x) = 0.5*(tanh(x/2)+1)
                th = jnp.tanh(g * scale)
                a = th * scale + offset              # i,f,o=sigmoid ; g=tanh

                c_new = a[:, H:2 * H] * c_st + a[:, 0:H] * a[:, 2 * H:3 * H]
                h_new = a[:, 3 * H:4 * H] * jnp.tanh(c_new)

                hv = h_new.astype(seq_ref.dtype)
                seq_ref[pl.ds(row_f, BB), 0:H] = hv[0:BB]           # fwd @ pos t
                seq_ref[pl.ds(row_b, BB), H:2 * H] = hv[BB:TWO_BB]  # bwd @ pos T-1-t
                return h_new, c_new

            h0 = jnp.zeros((TWO_BB, H), jnp.float32)
            c0 = jnp.zeros((TWO_BB, H), jnp.float32)
            if T <= 16:                              # tiny T: full static unroll
                carry = (h0, c0)
                for t in range(T):
                    carry = step(t, carry)
            else:                                    # large T: bounded live ranges
                lax.fori_loop(0, T, step, (h0, c0))

        # ---- tag head: one dot over the merged bf16 seq buffer + log_softmax ----
        logits = jnp.dot(seq_ref[...], wtag_ref[...],
                         preferred_element_type=jnp.float32) + btag_ref[...]
        m = jnp.max(logits, axis=-1, keepdims=True)
        s = logits - m
        lse = jnp.log(jnp.sum(jnp.exp(s), axis=-1, keepdims=True))
        out_ref[...] = (s - lse).astype(out_ref.dtype)   # lane-dense (T*BB, Kp) store

    return kernel


# --------------------------------------------------------------------------
# Forward wrapper
# --------------------------------------------------------------------------
@jax.jit
def lstm_tagger_forward(params, sentence):
    """Forward pass matching LSTMTagger.forward (inference semantics).

    sentence: (B, T) int32 token ids in [0, vocab_size]; id == vocab_size is padding.
    returns:  (B, T, tagset_size) float32 log-probabilities.
    """
    num_layers = sum(1 for k in params if k.endswith("_whh"))
    H = params["l0_whh"].shape[0]
    K = params["btag"].shape[1]
    E = params["embedding"].shape[1]
    vocab_size = params["embedding"].shape[0] - 1

    B, T = sentence.shape
    Bp = ((B + 7) // 8) * 8                          # pad batch to sublane multiple
    for cand in (64, 32, 16, 8):                     # batch-tile rows per grid step
        if Bp % cand == 0:
            BB = cand
            break
    Nb = Bp // BB
    Kp = ((K + 127) // 128) * 128                    # lane-dense output width

    sent = sentence.astype(jnp.int32)
    if Bp != B:
        pad_rows = jnp.full((Bp - B, T), vocab_size, dtype=jnp.int32)  # padding_idx
        sent = jnp.concatenate([sent, pad_rows], axis=0)

    # Embedding gather in XLA glue; per-tile, time-major flat row = t*BB + b_local.
    emb = params["embedding"].astype(jnp.bfloat16)
    tok = sent.reshape(Nb, BB, T)
    tok = jnp.transpose(tok, (0, 2, 1)).reshape(Nb, T * BB)
    x = jnp.take(emb, tok.reshape(-1), axis=0).reshape(Nb, T * BB, E)   # bf16

    # Tag-head weights padded to lane-dense Kp; pad bias = -1e9 so padded lanes
    # never affect the log_softmax over the real K lanes.
    wtag = params["wtag"]
    btag = params["btag"]
    if Kp != K:
        wtag = jnp.pad(wtag, ((0, 0), (0, Kp - K)))
        btag = jnp.pad(btag, ((0, 0), (0, Kp - K)), constant_values=-1e9)

    args = [x]
    in_specs = [pl.BlockSpec((None, T * BB, E), lambda i: (i, 0, 0))]
    for l in range(num_layers):
        for name in ("wih", "whh", "b"):
            a = params[f"l{l}_{name}"]
            args.append(a)
            in_specs.append(pl.BlockSpec(a.shape, lambda i: (0, 0)))
    for a in (wtag, btag):
        args.append(a)
        in_specs.append(pl.BlockSpec(a.shape, lambda i: (0, 0)))

    kernel = _make_tagger_kernel(num_layers=num_layers, T=T, BB=BB, H=H)
    out = pl.pallas_call(
        kernel,
        out_shape=jax.ShapeDtypeStruct((Nb, T * BB, Kp), jnp.float32),
        grid=(Nb,),
        in_specs=in_specs,
        out_specs=pl.BlockSpec((None, T * BB, Kp), lambda i: (i, 0, 0)),
        scratch_shapes=[pltpu.VMEM((T * BB, 8 * H), jnp.float32),   # xproj
                        pltpu.VMEM((T * BB, 2 * H), jnp.bfloat16)], # fwd|bwd outputs
        compiler_params=pltpu.CompilerParams(
            dimension_semantics=("parallel",)),       # 2nd TC on v7x for big batch
    )(*args)                                          # (Nb, T*BB, Kp)

    out = out.reshape(Nb, T, BB, Kp)
    out = jnp.transpose(out, (0, 2, 1, 3)).reshape(Bp, T, Kp)
    return out[:B, :, :K]                             # (B, T, K) log-probs


# --------------------------------------------------------------------------
# Deterministic parameter construction (shapes follow LSTMTagger.__init__),
# stored pre-fused: per layer [fwd|bwd]-concatenated, transposed, bf16 weights.
# --------------------------------------------------------------------------
def init_params(key, vocab_size, embedding_dim, hidden_dim, tagset_size,
                num_layers=2):
    H = hidden_dim
    params = {}
    n_keys = 1 + num_layers * 2 * 4 + 2
    keys = iter(jax.random.split(key, n_keys))

    emb = 0.1 * jax.random.normal(next(keys), (vocab_size + 1, embedding_dim),
                                  jnp.float32)
    emb = emb.at[vocab_size].set(0.0)                 # padding_idx row
    params["embedding"] = emb

    for l in range(num_layers):
        d_in = embedding_dim if l == 0 else 2 * H
        wih_parts, whh_parts, b_parts = [], [], []
        for _dname in ("fwd", "bwd"):
            w_ih = 0.1 * jax.random.normal(next(keys), (4 * H, d_in), jnp.float32)
            w_hh = 0.1 * jax.random.normal(next(keys), (4 * H, H), jnp.float32)
            b_ih = 0.1 * jax.random.normal(next(keys), (4 * H,), jnp.float32)
            b_hh = 0.1 * jax.random.normal(next(keys), (4 * H,), jnp.float32)
            wih_parts.append(w_ih.T)                  # (d_in, 4H)
            whh_parts.append(w_hh.T)                  # (H, 4H)
            b_parts.append(b_ih + b_hh)               # (4H,)
        params[f"l{l}_wih"] = jnp.concatenate(wih_parts, axis=1).astype(jnp.bfloat16)
        params[f"l{l}_whh"] = jnp.concatenate(whh_parts, axis=1).astype(jnp.bfloat16)
        params[f"l{l}_b"] = jnp.concatenate(b_parts).reshape(1, 8 * H).astype(jnp.float32)

    w_tag = 0.1 * jax.random.normal(next(keys), (tagset_size, 2 * H), jnp.float32)
    b_tag = 0.1 * jax.random.normal(next(keys), (tagset_size,), jnp.float32)
    params["wtag"] = w_tag.T.astype(jnp.bfloat16)     # (2H, K)
    params["btag"] = b_tag.reshape(1, tagset_size).astype(jnp.float32)
    return params


# --------------------------------------------------------------------------
if __name__ == "__main__":
    EMBED_DIM = 16
    HIDDEN_DIM = 32
    VOCAB_SIZE = 20
    TAGSET_SIZE = 8
    NUM_LAYERS = 2
    BATCH = 2
    SEQ = 8

    root = jax.random.PRNGKey(0)
    k_params, k_sent = jax.random.split(root)

    params = init_params(k_params, VOCAB_SIZE, EMBED_DIM, HIDDEN_DIM,
                         TAGSET_SIZE, NUM_LAYERS)
    # token ids in [0, vocab_size]; id == vocab_size is the padding index
    sentence = jax.random.randint(k_sent, (BATCH, SEQ), 0, VOCAB_SIZE + 1,
                                  dtype=jnp.int32)

    tag_scores = lstm_tagger_forward(params, sentence)
    jax.block_until_ready(tag_scores)

    assert tag_scores.shape == (BATCH, SEQ, TAGSET_SIZE)
    assert tag_scores.dtype == jnp.float32
    assert bool(jnp.all(jnp.isfinite(tag_scores)))
    # each row of log-probs must sum to ~1 after exp
    row_sums = jnp.exp(tag_scores).sum(axis=-1)
    assert bool(jnp.allclose(row_sums, 1.0, atol=1e-3))

    print("KERNEL_OK")
</pallas_src>

<mosaic_0001>
module attributes {stable_mosaic.version = 11 : i64} {
  func.func @kernel(%arg0: i32, %arg1: memref<1x64x16xbf16, #tpu.memory_space<vmem>>, %arg2: memref<16x256xbf16, #tpu.memory_space<vmem>>, %arg3: memref<32x256xbf16, #tpu.memory_space<vmem>>, %arg4: memref<1x256xf32, #tpu.memory_space<vmem>>, %arg5: memref<64x256xbf16, #tpu.memory_space<vmem>>, %arg6: memref<32x256xbf16, #tpu.memory_space<vmem>>, %arg7: memref<1x256xf32, #tpu.memory_space<vmem>>, %arg8: memref<64x128xbf16, #tpu.memory_space<vmem>>, %arg9: memref<1x128xf32, #tpu.memory_space<vmem>>, %arg10: memref<1x64x128xf32, #tpu.memory_space<vmem>>, %arg11: memref<64x256xf32, #tpu.memory_space<vmem>>, %arg12: memref<64x64xbf16, #tpu.memory_space<vmem>>) attributes {dimension_semantics = [#tpu.dimension_semantics<parallel>], iteration_bounds = array<i64: 1>, scalar_prefetch = 0 : i64, scratch_operands = 2 : i64, tpu.core_type = #tpu.core_type<tc>, window_params = [{transform_indices = @transform_0, window_bounds = array<i64: 1, 64, 16>}, {pipeline_mode = #tpu.pipeline_mode<synchronous>, transform_indices = @transform_1, window_bounds = array<i64: 16, 256>}, {pipeline_mode = #tpu.pipeline_mode<synchronous>, transform_indices = @transform_2, window_bounds = array<i64: 32, 256>}, {pipeline_mode = #tpu.pipeline_mode<synchronous>, transform_indices = @transform_3, window_bounds = array<i64: 1, 256>}, {pipeline_mode = #tpu.pipeline_mode<synchronous>, transform_indices = @transform_4, window_bounds = array<i64: 64, 256>}, {pipeline_mode = #tpu.pipeline_mode<synchronous>, transform_indices = @transform_5, window_bounds = array<i64: 32, 256>}, {pipeline_mode = #tpu.pipeline_mode<synchronous>, transform_indices = @transform_6, window_bounds = array<i64: 1, 256>}, {pipeline_mode = #tpu.pipeline_mode<synchronous>, transform_indices = @transform_7, window_bounds = array<i64: 64, 128>}, {pipeline_mode = #tpu.pipeline_mode<synchronous>, transform_indices = @transform_8, window_bounds = array<i64: 1, 128>}, {transform_indices = @transform_9, window_bounds = array<i64: 1, 64, 128>}]} {
    %0 = tpu.iota {dimensions = array<i32: 1>} : vector<16x128xi32>
    %c64_i32 = arith.constant 64 : i32
    %1 = vector.broadcast %c64_i32 : i32 to vector<16x128xi32>
    %2 = arith.cmpi sge, %0, %1 : vector<16x128xi32>
    %c96_i32 = arith.constant 96 : i32
    %3 = vector.broadcast %c96_i32 : i32 to vector<16x128xi32>
    %4 = arith.cmpi slt, %0, %3 : vector<16x128xi32>
    %5 = arith.andi %2, %4 : vector<16x128xi1>
    %cst = arith.constant 1.000000e+00 : f32
    %cst_0 = arith.constant 5.000000e-01 : f32
    %6 = vector.broadcast %cst : f32 to vector<16x128xf32>
    %7 = vector.broadcast %cst_0 : f32 to vector<16x128xf32>
    %8 = arith.select %5, %6, %7 : vector<16x128xi1>, vector<16x128xf32>
    %cst_1 = arith.constant 1.000000e+00 : f32
    %9 = vector.broadcast %cst_1 : f32 to vector<16x128xf32>
    %10 = arith.subf %9, %8 : vector<16x128xf32>
    %c0 = arith.constant 0 : index
    %c0_2 = arith.constant 0 : index
    %11 = vector.load %arg2[%c0, %c0_2] : memref<16x256xbf16, #tpu.memory_space<vmem>>, vector<16x256xbf16>
    %c0_3 = arith.constant 0 : index
    %c0_4 = arith.constant 0 : index
    %12 = vector.load %arg3[%c0_3, %c0_4] : memref<32x256xbf16, #tpu.memory_space<vmem>>, vector<32x256xbf16>
    %c0_5 = arith.constant 0 : index
    %c0_6 = arith.constant 0 : index
    %13 = vector.load %arg4[%c0_5, %c0_6] : memref<1x256xf32, #tpu.memory_space<vmem>>, vector<1x256xf32>
    %c0_7 = arith.constant 0 : index
    %c0_8 = arith.constant 0 : index
    %c0_9 = arith.constant 0 : index
    %14 = vector.load %arg1[%c0_7, %c0_8, %c0_9] : memref<1x64x16xbf16, #tpu.memory_space<vmem>>, vector<1x64x16xbf16>
    %15 = vector.shape_cast %14 : vector<1x64x16xbf16> to vector<64x16xbf16>
    %cst_10 = arith.constant dense<0.000000e+00> : vector<64x256xf32>
    %16 = tpu.matmul %15, %11, %cst_10 {dimension_numbers = #tpu.dot_dimension_numbers<[1], [0], [0], [1], [0, 0, 1, 1], [], []>} : vector<64x16xbf16>, vector<16x256xbf16>, vector<64x256xf32> -> vector<64x256xf32>
    %17 = vector.broadcast %13 : vector<1x256xf32> to vector<64x256xf32>
    %18 = arith.addf %16, %17 : vector<64x256xf32>
    %c0_11 = arith.constant 0 : index
    %c0_12 = arith.constant 0 : index
    %19 = vector.load %arg11[%c0_11, %c0_12] : memref<64x256xf32, #tpu.memory_space<vmem>>, vector<64x256xf32>
    tpu.vector_store %arg11[%c0_11, %c0_12], %18 {strides = array<i32>} : memref<64x256xf32, #tpu.memory_space<vmem>>, vector<64x256xf32>,
    %cst_13 = arith.constant 0.000000e+00 : f32
    %20 = vector.broadcast %cst_13 : f32 to vector<16x32xf32>
    %cst_14 = arith.constant 0.000000e+00 : f32
    %21 = vector.broadcast %cst_14 : f32 to vector<16x32xf32>
    %22 = arith.truncf %20 : vector<16x32xf32> to vector<16x32xbf16>
    %cst_15 = arith.constant dense<0.000000e+00> : vector<16x256xf32>
    %23 = tpu.matmul %22, %12, %cst_15 {dimension_numbers = #tpu.dot_dimension_numbers<[1], [0], [0], [1], [0, 0, 1, 1], [], []>} : vector<16x32xbf16>, vector<32x256xbf16>, vector<16x256xf32> -> vector<16x256xf32>
    %c0_16 = arith.constant 0 : index
    %c0_17 = arith.constant 0 : index
    %24 = vector.load %arg11[%c0_16, %c0_17] : memref<64x256xf32, #tpu.memory_space<vmem>>, vector<8x128xf32>
    %c56 = arith.constant 56 : index
    %c128 = arith.constant 128 : index
    %25 = vector.load %arg11[%c56, %c128] : memref<64x256xf32, #tpu.memory_space<vmem>>, vector<8x128xf32>
    %26 = tpu.concatenate %24, %25 in 0 : vector<8x128xf32>, vector<8x128xf32> -> vector<16x128xf32>
    %27 = vector.extract_strided_slice %23 {offsets = [0, 0], sizes = [8, 128], strides = [1, 1]} : vector<16x256xf32> to vector<8x128xf32>
    %28 = vector.extract_strided_slice %23 {offsets = [8, 128], sizes = [8, 128], strides = [1, 1]} : vector<16x256xf32> to vector<8x128xf32>
    %29 = tpu.concatenate %27, %28 in 0 : vector<8x128xf32>, vector<8x128xf32> -> vector<16x128xf32>
    %30 = arith.addf %26, %29 : vector<16x128xf32>
    %31 = arith.mulf %30, %8 : vector<16x128xf32>
    %32 = math.tanh %31 : vector<16x128xf32>
    %33 = arith.mulf %32, %8 : vector<16x128xf32>
    %34 = arith.addf %33, %10 : vector<16x128xf32>
    %35 = vector.extract_strided_slice %34 {offsets = [0, 32], sizes = [16, 32], strides = [1, 1]} : vector<16x128xf32> to vector<16x32xf32>
    %36 = arith.mulf %35, %21 : vector<16x32xf32>
    %37 = vector.extract_strided_slice %34 {offsets = [0, 0], sizes = [16, 32], strides = [1, 1]} : vector<16x128xf32> to vector<16x32xf32>
    %38 = vector.extract_strided_slice %34 {offsets = [0, 64], sizes = [16, 32], strides = [1, 1]} : vector<16x128xf32> to vector<16x32xf32>
    %39 = arith.mulf %37, %38 : vector<16x32xf32>
    %40 = arith.addf %36, %39 : vector<16x32xf32>
    %41 = vector.extract_strided_slice %34 {offsets = [0, 96], sizes = [16, 32], strides = [1, 1]} : vector<16x128xf32> to vector<16x32xf32>
    %42 = math.tanh %40 : vector<16x32xf32>
    %43 = arith.mulf %41, %42 : vector<16x32xf32>
    %44 = arith.truncf %43 : vector<16x32xf32> to vector<16x32xbf16>
    %45 = vector.extract_strided_slice %44 {offsets = [0, 0], sizes = [8, 32], strides = [1, 1]} : vector<16x32xbf16> to vector<8x32xbf16>
    %c0_18 = arith.constant 0 : index
    %c0_19 = arith.constant 0 : index
    %46 = vector.load %arg12[%c0_18, %c0_19] : memref<64x64xbf16, #tpu.memory_space<vmem>>, vector<8x32xbf16>
    tpu.vector_store %arg12[%c0_18, %c0_19], %45 {strides = array<i32>} : memref<64x64xbf16, #tpu.memory_space<vmem>>, vector<8x32xbf16>,
    %47 = vector.extract_strided_slice %44 {offsets = [8, 0], sizes = [8, 32], strides = [1, 1]} : vector<16x32xbf16> to vector<8x32xbf16>
    %c56_20 = arith.constant 56 : index
    %c32 = arith.constant 32 : index
    %48 = vector.load %arg12[%c56_20, %c32] : memref<64x64xbf16, #tpu.memory_space<vmem>>, vector<8x32xbf16>
    tpu.vector_store %arg12[%c56_20, %c32], %47 {strides = array<i32>} : memref<64x64xbf16, #tpu.memory_space<vmem>>, vector<8x32xbf16>,
    %49 = arith.truncf %43 : vector<16x32xf32> to vector<16x32xbf16>
    %cst_21 = arith.constant dense<0.000000e+00> : vector<16x256xf32>
    %50 = tpu.matmul %49, %12, %cst_21 {dimension_numbers = #tpu.dot_dimension_numbers<[1], [0], [0], [1], [0, 0, 1, 1], [], []>} : vector<16x32xbf16>, vector<32x256xbf16>, vector<16x256xf32> -> vector<16x256xf32>
    %c8 = arith.constant 8 : index
    %c0_22 = arith.constant 0 : index
    %51 = vector.load %arg11[%c8, %c0_22] : memref<64x256xf32, #tpu.memory_space<vmem>>, vector<8x128xf32>
    %c48 = arith.constant 48 : index
    %c128_23 = arith.constant 128 : index
    %52 = vector.load %arg11[%c48, %c128_23] : memref<64x256xf32, #tpu.memory_space<vmem>>, vector<8x128xf32>
    %53 = tpu.concatenate %51, %52 in 0 : vector<8x128xf32>, vector<8x128xf32> -> vector<16x128xf32>
    %54 = vector.extract_strided_slice %50 {offsets = [0, 0], sizes = [8, 128], strides = [1, 1]} : vector<16x256xf32> to vector<8x128xf32>
    %55 = vector.extract_strided_slice %50 {offsets = [8, 128], sizes = [8, 128], strides = [1, 1]} : vector<16x256xf32> to vector<8x128xf32>
    %56 = tpu.concatenate %54, %55 in 0 : vector<8x128xf32>, vector<8x128xf32> -> vector<16x128xf32>
    %57 = arith.addf %53, %56 : vector<16x128xf32>
    %58 = arith.mulf %57, %8 : vector<16x128xf32>
    %59 = math.tanh %58 : vector<16x128xf32>
    %60 = arith.mulf %59, %8 : vector<16x128xf32>
    %61 = arith.addf %60, %10 : vector<16x128xf32>
    %62 = vector.extract_strided_slice %61 {offsets = [0, 32], sizes = [16, 32], strides = [1, 1]} : vector<16x128xf32> to vector<16x32xf32>
    %63 = arith.mulf %62, %40 : vector<16x32xf32>
    %64 = vector.extract_strided_slice %61 {offsets = [0, 0], sizes = [16, 32], strides = [1, 1]} : vector<16x128xf32> to vector<16x32xf32>
    %65 = vector.extract_strided_slice %61 {offsets = [0, 64], sizes = [16, 32], strides = [1, 1]} : vector<16x128xf32> to vector<16x32xf32>
    %66 = arith.mulf %64, %65 : vector<16x32xf32>
    %67 = arith.addf %63, %66 : vector<16x32xf32>
    %68 = vector.extract_strided_slice %61 {offsets = [0, 96], sizes = [16, 32], strides = [1, 1]} : vector<16x128xf32> to vector<16x32xf32>
    %69 = math.tanh %67 : vector<16x32xf32>
    %70 = arith.mulf %68, %69 : vector<16x32xf32>
    %71 = arith.truncf %70 : vector<16x32xf32> to vector<16x32xbf16>
    %72 = vector.extract_strided_slice %71 {offsets = [0, 0], sizes = [8, 32], strides = [1, 1]} : vector<16x32xbf16> to vector<8x32xbf16>
    %c8_24 = arith.constant 8 : index
    %c0_25 = arith.constant 0 : index
    %73 = vector.load %arg12[%c8_24, %c0_25] : memref<64x64xbf16, #tpu.memory_space<vmem>>, vector<8x32xbf16>
    tpu.vector_store %arg12[%c8_24, %c0_25], %72 {strides = array<i32>} : memref<64x64xbf16, #tpu.memory_space<vmem>>, vector<8x32xbf16>,
    %74 = vector.extract_strided_slice %71 {offsets = [8, 0], sizes = [8, 32], strides = [1, 1]} : vector<16x32xbf16> to vector<8x32xbf16>
    %c48_26 = arith.constant 48 : index
    %c32_27 = arith.constant 32 : index
    %75 = vector.load %arg12[%c48_26, %c32_27] : memref<64x64xbf16, #tpu.memory_space<vmem>>, vector<8x32xbf16>
    tpu.vector_store %arg12[%c48_26, %c32_27], %74 {strides = array<i32>} : memref<64x64xbf16, #tpu.memory_space<vmem>>, vector<8x32xbf16>,
    %76 = arith.truncf %70 : vector<16x32xf32> to vector<16x32xbf16>
    %cst_28 = arith.constant dense<0.000000e+00> : vector<16x256xf32>
    %77 = tpu.matmul %76, %12, %cst_28 {dimension_numbers = #tpu.dot_dimension_numbers<[1], [0], [0], [1], [0, 0, 1, 1], [], []>} : vector<16x32xbf16>, vector<32x256xbf16>, vector<16x256xf32> -> vector<16x256xf32>
    %c16 = arith.constant 16 : index
    %c0_29 = arith.constant 0 : index
    %78 = vector.load %arg11[%c16, %c0_29] : memref<64x256xf32, #tpu.memory_space<vmem>>, vector<8x128xf32>
    %c40 = arith.constant 40 : index
    %c128_30 = arith.constant 128 : index
    %79 = vector.load %arg11[%c40, %c128_30] : memref<64x256xf32, #tpu.memory_space<vmem>>, vector<8x128xf32>
    %80 = tpu.concatenate %78, %79 in 0 : vector<8x128xf32>, vector<8x128xf32> -> vector<16x128xf32>
    %81 = vector.extract_strided_slice %77 {offsets = [0, 0], sizes = [8, 128], strides = [1, 1]} : vector<16x256xf32> to vector<8x128xf32>
    %82 = vector.extract_strided_slice %77 {offsets = [8, 128], sizes = [8, 128], strides = [1, 1]} : vector<16x256xf32> to vector<8x128xf32>
    %83 = tpu.concatenate %81, %82 in 0 : vector<8x128xf32>, vector<8x128xf32> -> vector<16x128xf32>
    %84 = arith.addf %80, %83 : vector<16x128xf32>
    %85 = arith.mulf %84, %8 : vector<16x128xf32>
    %86 = math.tanh %85 : vector<16x128xf32>
    %87 = arith.mulf %86, %8 : vector<16x128xf32>
    %88 = arith.addf %87, %10 : vector<16x128xf32>
    %89 = vector.extract_strided_slice %88 {offsets = [0, 32], sizes = [16, 32], strides = [1, 1]} : vector<16x128xf32> to vector<16x32xf32>
    %90 = arith.mulf %89, %67 : vector<16x32xf32>
    %91 = vector.extract_strided_slice %88 {offsets = [0, 0], sizes = [16, 32], strides = [1, 1]} : vector<16x128xf32> to vector<16x32xf32>
    %92 = vector.extract_strided_slice %88 {offsets = [0, 64], sizes = [16, 32], strides = [1, 1]} : vector<16x128xf32> to vector<16x32xf32>
    %93 = arith.mulf %91, %92 : vector<16x32xf32>
    %94 = arith.addf %90, %93 : vector<16x32xf32>
    %95 = vector.extract_strided_slice %88 {offsets = [0, 96], sizes = [16, 32], strides = [1, 1]} : vector<16x128xf32> to vector<16x32xf32>
    %96 = math.tanh %94 : vector<16x32xf32>
    %97 = arith.mulf %95, %96 : vector<16x32xf32>
    %98 = arith.truncf %97 : vector<16x32xf32> to vector<16x32xbf16>
    %99 = vector.extract_strided_slice %98 {offsets = [0, 0], sizes = [8, 32], strides = [1, 1]} : vector<16x32xbf16> to vector<8x32xbf16>
    %c16_31 = arith.constant 16 : index
    %c0_32 = arith.constant 0 : index
    %100 = vector.load %arg12[%c16_31, %c0_32] : memref<64x64xbf16, #tpu.memory_space<vmem>>, vector<8x32xbf16>
    tpu.vector_store %arg12[%c16_31, %c0_32], %99 {strides = array<i32>} : memref<64x64xbf16, #tpu.memory_space<vmem>>, vector<8x32xbf16>,
    %101 = vector.extract_strided_slice %98 {offsets = [8, 0], sizes = [8, 32], strides = [1, 1]} : vector<16x32xbf16> to vector<8x32xbf16>
    %c40_33 = arith.constant 40 : index
    %c32_34 = arith.constant 32 : index
    %102 = vector.load %arg12[%c40_33, %c32_34] : memref<64x64xbf16, #tpu.memory_space<vmem>>, vector<8x32xbf16>
    tpu.vector_store %arg12[%c40_33, %c32_34], %101 {strides = array<i32>} : memref<64x64xbf16, #tpu.memory_space<vmem>>, vector<8x32xbf16>,
    %103 = arith.truncf %97 : vector<16x32xf32> to vector<16x32xbf16>
    %cst_35 = arith.constant dense<0.000000e+00> : vector<16x256xf32>
    %104 = tpu.matmul %103, %12, %cst_35 {dimension_numbers = #tpu.dot_dimension_numbers<[1], [0], [0], [1], [0, 0, 1, 1], [], []>} : vector<16x32xbf16>, vector<32x256xbf16>, vector<16x256xf32> -> vector<16x256xf32>
    %c24 = arith.constant 24 : index
    %c0_36 = arith.constant 0 : index
    %105 = vector.load %arg11[%c24, %c0_36] : memref<64x256xf32, #tpu.memory_space<vmem>>, vector<8x128xf32>
    %c32_37 = arith.constant 32 : index
    %c128_38 = arith.constant 128 : index
    %106 = vector.load %arg11[%c32_37, %c128_38] : memref<64x256xf32, #tpu.memory_space<vmem>>, vector<8x128xf32>
    %107 = tpu.concatenate %105, %106 in 0 : vector<8x128xf32>, vector<8x128xf32> -> vector<16x128xf32>
    %108 = vector.extract_strided_slice %104 {offsets = [0, 0], sizes = [8, 128], strides = [1, 1]} : vector<16x256xf32> to vector<8x128xf32>
    %109 = vector.extract_strided_slice %104 {offsets = [8, 128], sizes = [8, 128], strides = [1, 1]} : vector<16x256xf32> to vector<8x128xf32>
    %110 = tpu.concatenate %108, %109 in 0 : vector<8x128xf32>, vector<8x128xf32> -> vector<16x128xf32>
    %111 = arith.addf %107, %110 : vector<16x128xf32>
    %112 = arith.mulf %111, %8 : vector<16x128xf32>
    %113 = math.tanh %112 : vector<16x128xf32>
    %114 = arith.mulf %113, %8 : vector<16x128xf32>
    %115 = arith.addf %114, %10 : vector<16x128xf32>
    %116 = vector.extract_strided_slice %115 {offsets = [0, 32], sizes = [16, 32], strides = [1, 1]} : vector<16x128xf32> to vector<16x32xf32>
    %117 = arith.mulf %116, %94 : vector<16x32xf32>
    %118 = vector.extract_strided_slice %115 {offsets = [0, 0], sizes = [16, 32], strides = [1, 1]} : vector<16x128xf32> to vector<16x32xf32>
    %119 = vector.extract_strided_slice %115 {offsets = [0, 64], sizes = [16, 32], strides = [1, 1]} : vector<16x128xf32> to vector<16x32xf32>
    %120 = arith.mulf %118, %119 : vector<16x32xf32>
    %121 = arith.addf %117, %120 : vector<16x32xf32>
    %122 = vector.extract_strided_slice %115 {offsets = [0, 96], sizes = [16, 32], strides = [1, 1]} : vector<16x128xf32> to vector<16x32xf32>
    %123 = math.tanh %121 : vector<16x32xf32>
    %124 = arith.mulf %122, %123 : vector<16x32xf32>
    %125 = arith.truncf %124 : vector<16x32xf32> to vector<16x32xbf16>
    %126 = vector.extract_strided_slice %125 {offsets = [0, 0], sizes = [8, 32], strides = [1, 1]} : vector<16x32xbf16> to vector<8x32xbf16>
    %c24_39 = arith.constant 24 : index
    %c0_40 = arith.constant 0 : index
    %127 = vector.load %arg12[%c24_39, %c0_40] : memref<64x64xbf16, #tpu.memory_space<vmem>>, vector<8x32xbf16>
    tpu.vector_store %arg12[%c24_39, %c0_40], %126 {strides = array<i32>} : memref<64x64xbf16, #tpu.memory_space<vmem>>, vector<8x32xbf16>,
    %128 = vector.extract_strided_slice %125 {offsets = [8, 0], sizes = [8, 32], strides = [1, 1]} : vector<16x32xbf16> to vector<8x32xbf16>
    %c32_41 = arith.constant 32 : index
    %c32_42 = arith.constant 32 : index
    %129 = vector.load %arg12[%c32_41, %c32_42] : memref<64x64xbf16, #tpu.memory_space<vmem>>, vector<8x32xbf16>
    tpu.vector_store %arg12[%c32_41, %c32_42], %128 {strides = array<i32>} : memref<64x64xbf16, #tpu.memory_space<vmem>>, vector<8x32xbf16>,
    %130 = arith.truncf %124 : vector<16x32xf32> to vector<16x32xbf16>
    %cst_43 = arith.constant dense<0.000000e+00> : vector<16x256xf32>
    %131 = tpu.matmul %130, %12, %cst_43 {dimension_numbers = #tpu.dot_dimension_numbers<[1], [0], [0], [1], [0, 0, 1, 1], [], []>} : vector<16x32xbf16>, vector<32x256xbf16>, vector<16x256xf32> -> vector<16x256xf32>
    %c32_44 = arith.constant 32 : index
    %c0_45 = arith.constant 0 : index
    %132 = vector.load %arg11[%c32_44, %c0_45] : memref<64x256xf32, #tpu.memory_space<vmem>>, vector<8x128xf32>
    %c24_46 = arith.constant 24 : index
    %c128_47 = arith.constant 128 : index
    %133 = vector.load %arg11[%c24_46, %c128_47] : memref<64x256xf32, #tpu.memory_space<vmem>>, vector<8x128xf32>
    %134 = tpu.concatenate %132, %133 in 0 : vector<8x128xf32>, vector<8x128xf32> -> vector<16x128xf32>
    %135 = vector.extract_strided_slice %131 {offsets = [0, 0], sizes = [8, 128], strides = [1, 1]} : vector<16x256xf32> to vector<8x128xf32>
    %136 = vector.extract_strided_slice %131 {offsets = [8, 128], sizes = [8, 128], strides = [1, 1]} : vector<16x256xf32> to vector<8x128xf32>
    %137 = tpu.concatenate %135, %136 in 0 : vector<8x128xf32>, vector<8x128xf32> -> vector<16x128xf32>
    %138 = arith.addf %134, %137 : vector<16x128xf32>
    %139 = arith.mulf %138, %8 : vector<16x128xf32>
    %140 = math.tanh %139 : vector<16x128xf32>
    %141 = arith.mulf %140, %8 : vector<16x128xf32>
    %142 = arith.addf %141, %10 : vector<16x128xf32>
    %143 = vector.extract_strided_slice %142 {offsets = [0, 32], sizes = [16, 32], strides = [1, 1]} : vector<16x128xf32> to vector<16x32xf32>
    %144 = arith.mulf %143, %121 : vector<16x32xf32>
    %145 = vector.extract_strided_slice %142 {offsets = [0, 0], sizes = [16, 32], strides = [1, 1]} : vector<16x128xf32> to vector<16x32xf32>
    %146 = vector.extract_strided_slice %142 {offsets = [0, 64], sizes = [16, 32], strides = [1, 1]} : vector<16x128xf32> to vector<16x32xf32>
    %147 = arith.mulf %145, %146 : vector<16x32xf32>
    %148 = arith.addf %144, %147 : vector<16x32xf32>
    %149 = vector.extract_strided_slice %142 {offsets = [0, 96], sizes = [16, 32], strides = [1, 1]} : vector<16x128xf32> to vector<16x32xf32>
    %150 = math.tanh %148 : vector<16x32xf32>
    %151 = arith.mulf %149, %150 : vector<16x32xf32>
    %152 = arith.truncf %151 : vector<16x32xf32> to vector<16x32xbf16>
    %153 = vector.extract_strided_slice %152 {offsets = [0, 0], sizes = [8, 32], strides = [1, 1]} : vector<16x32xbf16> to vector<8x32xbf16>
    %c32_48 = arith.constant 32 : index
    %c0_49 = arith.constant 0 : index
    %154 = vector.load %arg12[%c32_48, %c0_49] : memref<64x64xbf16, #tpu.memory_space<vmem>>, vector<8x32xbf16>
    tpu.vector_store %arg12[%c32_48, %c0_49], %153 {strides = array<i32>} : memref<64x64xbf16, #tpu.memory_space<vmem>>, vector<8x32xbf16>,
    %155 = vector.extract_strided_slice %152 {offsets = [8, 0], sizes = [8, 32], strides = [1, 1]} : vector<16x32xbf16> to vector<8x32xbf16>
    %c24_50 = arith.constant 24 : index
    %c32_51 = arith.constant 32 : index
    %156 = vector.load %arg12[%c24_50, %c32_51] : memref<64x64xbf16, #tpu.memory_space<vmem>>, vector<8x32xbf16>
    tpu.vector_store %arg12[%c24_50, %c32_51], %155 {strides = array<i32>} : memref<64x64xbf16, #tpu.memory_space<vmem>>, vector<8x32xbf16>,
    %157 = arith.truncf %151 : vector<16x32xf32> to vector<16x32xbf16>
    %cst_52 = arith.constant dense<0.000000e+00> : vector<16x256xf32>
    %158 = tpu.matmul %157, %12, %cst_52 {dimension_numbers = #tpu.dot_dimension_numbers<[1], [0], [0], [1], [0, 0, 1, 1], [], []>} : vector<16x32xbf16>, vector<32x256xbf16>, vector<16x256xf32> -> vector<16x256xf32>
    %c40_53 = arith.constant 40 : index
    %c0_54 = arith.constant 0 : index
    %159 = vector.load %arg11[%c40_53, %c0_54] : memref<64x256xf32, #tpu.memory_space<vmem>>, vector<8x128xf32>
    %c16_55 = arith.constant 16 : index
    %c128_56 = arith.constant 128 : index
    %160 = vector.load %arg11[%c16_55, %c128_56] : memref<64x256xf32, #tpu.memory_space<vmem>>, vector<8x128xf32>
    %161 = tpu.concatenate %159, %160 in 0 : vector<8x128xf32>, vector<8x128xf32> -> vector<16x128xf32>
    %162 = vector.extract_strided_slice %158 {offsets = [0, 0], sizes = [8, 128], strides = [1, 1]} : vector<16x256xf32> to vector<8x128xf32>
    %163 = vector.extract_strided_slice %158 {offsets = [8, 128], sizes = [8, 128], strides = [1, 1]} : vector<16x256xf32> to vector<8x128xf32>
    %164 = tpu.concatenate %162, %163 in 0 : vector<8x128xf32>, vector<8x128xf32> -> vector<16x128xf32>
    %165 = arith.addf %161, %164 : vector<16x128xf32>
    %166 = arith.mulf %165, %8 : vector<16x128xf32>
    %167 = math.tanh %166 : vector<16x128xf32>
    %168 = arith.mulf %167, %8 : vector<16x128xf32>
    %169 = arith.addf %168, %10 : vector<16x128xf32>
    %170 = vector.extract_strided_slice %169 {offsets = [0, 32], sizes = [16, 32], strides = [1, 1]} : vector<16x128xf32> to vector<16x32xf32>
    %171 = arith.mulf %170, %148 : vector<16x32xf32>
    %172 = vector.extract_strided_slice %169 {offsets = [0, 0], sizes = [16, 32], strides = [1, 1]} : vector<16x128xf32> to vector<16x32xf32>
    %173 = vector.extract_strided_slice %169 {offsets = [0, 64], sizes = [16, 32], strides = [1, 1]} : vector<16x128xf32> to vector<16x32xf32>
    %174 = arith.mulf %172, %173 : vector<16x32xf32>
    %175 = arith.addf %171, %174 : vector<16x32xf32>
    %176 = vector.extract_strided_slice %169 {offsets = [0, 96], sizes = [16, 32], strides = [1, 1]} : vector<16x128xf32> to vector<16x32xf32>
    %177 = math.tanh %175 : vector<16x32xf32>
    %178 = arith.mulf %176, %177 : vector<16x32xf32>
    %179 = arith.truncf %178 : vector<16x32xf32> to vector<16x32xbf16>
    %180 = vector.extract_strided_slice %179 {offsets = [0, 0], sizes = [8, 32], strides = [1, 1]} : vector<16x32xbf16> to vector<8x32xbf16>
    %c40_57 = arith.constant 40 : index
    %c0_58 = arith.constant 0 : index
    %181 = vector.load %arg12[%c40_57, %c0_58] : memref<64x64xbf16, #tpu.memory_space<vmem>>, vector<8x32xbf16>
    tpu.vector_store %arg12[%c40_57, %c0_58], %180 {strides = array<i32>} : memref<64x64xbf16, #tpu.memory_space<vmem>>, vector<8x32xbf16>,
    %182 = vector.extract_strided_slice %179 {offsets = [8, 0], sizes = [8, 32], strides = [1, 1]} : vector<16x32xbf16> to vector<8x32xbf16>
    %c16_59 = arith.constant 16 : index
    %c32_60 = arith.constant 32 : index
    %183 = vector.load %arg12[%c16_59, %c32_60] : memref<64x64xbf16, #tpu.memory_space<vmem>>, vector<8x32xbf16>
    tpu.vector_store %arg12[%c16_59, %c32_60], %182 {strides = array<i32>} : memref<64x64xbf16, #tpu.memory_space<vmem>>, vector<8x32xbf16>,
    %184 = arith.truncf %178 : vector<16x32xf32> to vector<16x32xbf16>
    %cst_61 = arith.constant dense<0.000000e+00> : vector<16x256xf32>
    %185 = tpu.matmul %184, %12, %cst_61 {dimension_numbers = #tpu.dot_dimension_numbers<[1], [0], [0], [1], [0, 0, 1, 1], [], []>} : vector<16x32xbf16>, vector<32x256xbf16>, vector<16x256xf32> -> vector<16x256xf32>
    %c48_62 = arith.constant 48 : index
    %c0_63 = arith.constant 0 : index
    %186 = vector.load %arg11[%c48_62, %c0_63] : memref<64x256xf32, #tpu.memory_space<vmem>>, vector<8x128xf32>
    %c8_64 = arith.constant 8 : index
    %c128_65 = arith.constant 128 : index
    %187 = vector.load %arg11[%c8_64, %c128_65] : memref<64x256xf32, #tpu.memory_space<vmem>>, vector<8x128xf32>
    %188 = tpu.concatenate %186, %187 in 0 : vector<8x128xf32>, vector<8x128xf32> -> vector<16x128xf32>
    %189 = vector.extract_strided_slice %185 {offsets = [0, 0], sizes = [8, 128], strides = [1, 1]} : vector<16x256xf32> to vector<8x128xf32>
    %190 = vector.extract_strided_slice %185 {offsets = [8, 128], sizes = [8, 128], strides = [1, 1]} : vector<16x256xf32> to vector<8x128xf32>
    %191 = tpu.concatenate %189, %190 in 0 : vector<8x128xf32>, vector<8x128xf32> -> vector<16x128xf32>
    %192 = arith.addf %188, %191 : vector<16x128xf32>
    %193 = arith.mulf %192, %8 : vector<16x128xf32>
    %194 = math.tanh %193 : vector<16x128xf32>
    %195 = arith.mulf %194, %8 : vector<16x128xf32>
    %196 = arith.addf %195, %10 : vector<16x128xf32>
    %197 = vector.extract_strided_slice %196 {offsets = [0, 32], sizes = [16, 32], strides = [1, 1]} : vector<16x128xf32> to vector<16x32xf32>
    %198 = arith.mulf %197, %175 : vector<16x32xf32>
    %199 = vector.extract_strided_slice %196 {offsets = [0, 0], sizes = [16, 32], strides = [1, 1]} : vector<16x128xf32> to vector<16x32xf32>
    %200 = vector.extract_strided_slice %196 {offsets = [0, 64], sizes = [16, 32], strides = [1, 1]} : vector<16x128xf32> to vector<16x32xf32>
    %201 = arith.mulf %199, %200 : vector<16x32xf32>
    %202 = arith.addf %198, %201 : vector<16x32xf32>
    %203 = vector.extract_strided_slice %196 {offsets = [0, 96], sizes = [16, 32], strides = [1, 1]} : vector<16x128xf32> to vector<16x32xf32>
    %204 = math.tanh %202 : vector<16x32xf32>
    %205 = arith.mulf %203, %204 : vector<16x32xf32>
    %206 = arith.truncf %205 : vector<16x32xf32> to vector<16x32xbf16>
    %207 = vector.extract_strided_slice %206 {offsets = [0, 0], sizes = [8, 32], strides = [1, 1]} : vector<16x32xbf16> to vector<8x32xbf16>
    %c48_66 = arith.constant 48 : index
    %c0_67 = arith.constant 0 : index
    %208 = vector.load %arg12[%c48_66, %c0_67] : memref<64x64xbf16, #tpu.memory_space<vmem>>, vector<8x32xbf16>
    tpu.vector_store %arg12[%c48_66, %c0_67], %207 {strides = array<i32>} : memref<64x64xbf16, #tpu.memory_space<vmem>>, vector<8x32xbf16>,
    %209 = vector.extract_strided_slice %206 {offsets = [8, 0], sizes = [8, 32], strides = [1, 1]} : vector<16x32xbf16> to vector<8x32xbf16>
    %c8_68 = arith.constant 8 : index
    %c32_69 = arith.constant 32 : index
    %210 = vector.load %arg12[%c8_68, %c32_69] : memref<64x64xbf16, #tpu.memory_space<vmem>>, vector<8x32xbf16>
    tpu.vector_store %arg12[%c8_68, %c32_69], %209 {strides = array<i32>} : memref<64x64xbf16, #tpu.memory_space<vmem>>, vector<8x32xbf16>,
    %211 = arith.truncf %205 : vector<16x32xf32> to vector<16x32xbf16>
    %cst_70 = arith.constant dense<0.000000e+00> : vector<16x256xf32>
    %212 = tpu.matmul %211, %12, %cst_70 {dimension_numbers = #tpu.dot_dimension_numbers<[1], [0], [0], [1], [0, 0, 1, 1], [], []>} : vector<16x32xbf16>, vector<32x256xbf16>, vector<16x256xf32> -> vector<16x256xf32>
    %c56_71 = arith.constant 56 : index
    %c0_72 = arith.constant 0 : index
    %213 = vector.load %arg11[%c56_71, %c0_72] : memref<64x256xf32, #tpu.memory_space<vmem>>, vector<8x128xf32>
    %c0_73 = arith.constant 0 : index
    %c128_74 = arith.constant 128 : index
    %214 = vector.load %arg11[%c0_73, %c128_74] : memref<64x256xf32, #tpu.memory_space<vmem>>, vector<8x128xf32>
    %215 = tpu.concatenate %213, %214 in 0 : vector<8x128xf32>, vector<8x128xf32> -> vector<16x128xf32>
    %216 = vector.extract_strided_slice %212 {offsets = [0, 0], sizes = [8, 128], strides = [1, 1]} : vector<16x256xf32> to vector<8x128xf32>
    %217 = vector.extract_strided_slice %212 {offsets = [8, 128], sizes = [8, 128], strides = [1, 1]} : vector<16x256xf32> to vector<8x128xf32>
    %218 = tpu.concatenate %216, %217 in 0 : vector<8x128xf32>, vector<8x128xf32> -> vector<16x128xf32>
    %219 = arith.addf %215, %218 : vector<16x128xf32>
    %220 = arith.mulf %219, %8 : vector<16x128xf32>
    %221 = math.tanh %220 : vector<16x128xf32>
    %222 = arith.mulf %221, %8 : vector<16x128xf32>
    %223 = arith.addf %222, %10 : vector<16x128xf32>
    %224 = vector.extract_strided_slice %223 {offsets = [0, 32], sizes = [16, 32], strides = [1, 1]} : vector<16x128xf32> to vector<16x32xf32>
    %225 = arith.mulf %224, %202 : vector<16x32xf32>
    %226 = vector.extract_strided_slice %223 {offsets = [0, 0], sizes = [16, 32], strides = [1, 1]} : vector<16x128xf32> to vector<16x32xf32>
    %227 = vector.extract_strided_slice %223 {offsets = [0, 64], sizes = [16, 32], strides = [1, 1]} : vector<16x128xf32> to vector<16x32xf32>
    %228 = arith.mulf %226, %227 : vector<16x32xf32>
    %229 = arith.addf %225, %228 : vector<16x32xf32>
    %230 = vector.extract_strided_slice %223 {offsets = [0, 96], sizes = [16, 32], strides = [1, 1]} : vector<16x128xf32> to vector<16x32xf32>
    %231 = math.tanh %229 : vector<16x32xf32>
    %232 = arith.mulf %230, %231 : vector<16x32xf32>
    %233 = arith.truncf %232 : vector<16x32xf32> to vector<16x32xbf16>
    %234 = vector.extract_strided_slice %233 {offsets = [0, 0], sizes = [8, 32], strides = [1, 1]} : vector<16x32xbf16> to vector<8x32xbf16>
    %c56_75 = arith.constant 56 : index
    %c0_76 = arith.constant 0 : index
    %235 = vector.load %arg12[%c56_75, %c0_76] : memref<64x64xbf16, #tpu.memory_space<vmem>>, vector<8x32xbf16>
    tpu.vector_store %arg12[%c56_75, %c0_76], %234 {strides = array<i32>} : memref<64x64xbf16, #tpu.memory_space<vmem>>, vector<8x32xbf16>,
    %236 = vector.extract_strided_slice %233 {offsets = [8, 0], sizes = [8, 32], strides = [1, 1]} : vector<16x32xbf16> to vector<8x32xbf16>
    %c0_77 = arith.constant 0 : index
    %c32_78 = arith.constant 32 : index
    %237 = vector.load %arg12[%c0_77, %c32_78] : memref<64x64xbf16, #tpu.memory_space<vmem>>, vector<8x32xbf16>
    tpu.vector_store %arg12[%c0_77, %c32_78], %236 {strides = array<i32>} : memref<64x64xbf16, #tpu.memory_space<vmem>>, vector<8x32xbf16>,
    %c0_79 = arith.constant 0 : index
    %c0_80 = arith.constant 0 : index
    %238 = vector.load %arg5[%c0_79, %c0_80] : memref<64x256xbf16, #tpu.memory_space<vmem>>, vector<64x256xbf16>
    %c0_81 = arith.constant 0 : index
    %c0_82 = arith.constant 0 : index
    %239 = vector.load %arg6[%c0_81, %c0_82] : memref<32x256xbf16, #tpu.memory_space<vmem>>, vector<32x256xbf16>
    %c0_83 = arith.constant 0 : index
    %c0_84 = arith.constant 0 : index
    %240 = vector.load %arg7[%c0_83, %c0_84] : memref<1x256xf32, #tpu.memory_space<vmem>>, vector<1x256xf32>
    %c0_85 = arith.constant 0 : index
    %c0_86 = arith.constant 0 : index
    %241 = vector.load %arg12[%c0_85, %c0_86] : memref<64x64xbf16, #tpu.memory_space<vmem>>, vector<64x64xbf16>
    %cst_87 = arith.constant dense<0.000000e+00> : vector<64x256xf32>
    %242 = tpu.matmul %241, %238, %cst_87 {dimension_numbers = #tpu.dot_dimension_numbers<[1], [0], [0], [1], [0, 0, 1, 1], [], []>} : vector<64x64xbf16>, vector<64x256xbf16>, vector<64x256xf32> -> vector<64x256xf32>
    %243 = vector.broadcast %240 : vector<1x256xf32> to vector<64x256xf32>
    %244 = arith.addf %242, %243 : vector<64x256xf32>
    %c0_88 = arith.constant 0 : index
    %c0_89 = arith.constant 0 : index
    %245 = vector.load %arg11[%c0_88, %c0_89] : memref<64x256xf32, #tpu.memory_space<vmem>>, vector<64x256xf32>
    tpu.vector_store %arg11[%c0_88, %c0_89], %244 {strides = array<i32>} : memref<64x256xf32, #tpu.memory_space<vmem>>, vector<64x256xf32>,
    %cst_90 = arith.constant 0.000000e+00 : f32
    %246 = vector.broadcast %cst_90 : f32 to vector<16x32xf32>
    %cst_91 = arith.constant 0.000000e+00 : f32
    %247 = vector.broadcast %cst_91 : f32 to vector<16x32xf32>
    %248 = arith.truncf %246 : vector<16x32xf32> to vector<16x32xbf16>
    %cst_92 = arith.constant dense<0.000000e+00> : vector<16x256xf32>
    %249 = tpu.matmul %248, %239, %cst_92 {dimension_numbers = #tpu.dot_dimension_numbers<[1], [0], [0], [1], [0, 0, 1, 1], [], []>} : vector<16x32xbf16>, vector<32x256xbf16>, vector<16x256xf32> -> vector<16x256xf32>
    %c0_93 = arith.constant 0 : index
    %c0_94 = arith.constant 0 : index
    %250 = vector.load %arg11[%c0_93, %c0_94] : memref<64x256xf32, #tpu.memory_space<vmem>>, vector<8x128xf32>
    %c56_95 = arith.constant 56 : index
    %c128_96 = arith.constant 128 : index
    %251 = vector.load %arg11[%c56_95, %c128_96] : memref<64x256xf32, #tpu.memory_space<vmem>>, vector<8x128xf32>
    %252 = tpu.concatenate %250, %251 in 0 : vector<8x128xf32>, vector<8x128xf32> -> vector<16x128xf32>
    %253 = vector.extract_strided_slice %249 {offsets = [0, 0], sizes = [8, 128], strides = [1, 1]} : vector<16x256xf32> to vector<8x128xf32>
    %254 = vector.extract_strided_slice %249 {offsets = [8, 128], sizes = [8, 128], strides = [1, 1]} : vector<16x256xf32> to vector<8x128xf32>
    %255 = tpu.concatenate %253, %254 in 0 : vector<8x128xf32>, vector<8x128xf32> -> vector<16x128xf32>
    %256 = arith.addf %252, %255 : vector<16x128xf32>
    %257 = arith.mulf %256, %8 : vector<16x128xf32>
    %258 = math.tanh %257 : vector<16x128xf32>
    %259 = arith.mulf %258, %8 : vector<16x128xf32>
    %260 = arith.addf %259, %10 : vector<16x128xf32>
    %261 = vector.extract_strided_slice %260 {offsets = [0, 32], sizes = [16, 32], strides = [1, 1]} : vector<16x128xf32> to vector<16x32xf32>
    %262 = arith.mulf %261, %247 : vector<16x32xf32>
    %263 = vector.extract_strided_slice %260 {offsets = [0, 0], sizes = [16, 32], strides = [1, 1]} : vector<16x128xf32> to vector<16x32xf32>
    %264 = vector.extract_strided_slice %260 {offsets = [0, 64], sizes = [16, 32], strides = [1, 1]} : vector<16x128xf32> to vector<16x32xf32>
    %265 = arith.mulf %263, %264 : vector<16x32xf32>
    %266 = arith.addf %262, %265 : vector<16x32xf32>
    %267 = vector.extract_strided_slice %260 {offsets = [0, 96], sizes = [16, 32], strides = [1, 1]} : vector<16x128xf32> to vector<16x32xf32>
    %268 = math.tanh %266 : vector<16x32xf32>
    %269 = arith.mulf %267, %268 : vector<16x32xf32>
    %270 = arith.truncf %269 : vector<16x32xf32> to vector<16x32xbf16>
    %271 = vector.extract_strided_slice %270 {offsets = [0, 0], sizes = [8, 32], strides = [1, 1]} : vector<16x32xbf16> to vector<8x32xbf16>
    %c0_97 = arith.constant 0 : index
    %c0_98 = arith.constant 0 : index
    %272 = vector.load %arg12[%c0_97, %c0_98] : memref<64x64xbf16, #tpu.memory_space<vmem>>, vector<8x32xbf16>
    tpu.vector_store %arg12[%c0_97, %c0_98], %271 {strides = array<i32>} : memref<64x64xbf16, #tpu.memory_space<vmem>>, vector<8x32xbf16>,
    %273 = vector.extract_strided_slice %270 {offsets = [8, 0], sizes = [8, 32], strides = [1, 1]} : vector<16x32xbf16> to vector<8x32xbf16>
    %c56_99 = arith.constant 56 : index
    %c32_100 = arith.constant 32 : index
    %274 = vector.load %arg12[%c56_99, %c32_100] : memref<64x64xbf16, #tpu.memory_space<vmem>>, vector<8x32xbf16>
    tpu.vector_store %arg12[%c56_99, %c32_100], %273 {strides = array<i32>} : memref<64x64xbf16, #tpu.memory_space<vmem>>, vector<8x32xbf16>,
    %275 = arith.truncf %269 : vector<16x32xf32> to vector<16x32xbf16>
    %cst_101 = arith.constant dense<0.000000e+00> : vector<16x256xf32>
    %276 = tpu.matmul %275, %239, %cst_101 {dimension_numbers = #tpu.dot_dimension_numbers<[1], [0], [0], [1], [0, 0, 1, 1], [], []>} : vector<16x32xbf16>, vector<32x256xbf16>, vector<16x256xf32> -> vector<16x256xf32>
    %c8_102 = arith.constant 8 : index
    %c0_103 = arith.constant 0 : index
    %277 = vector.load %arg11[%c8_102, %c0_103] : memref<64x256xf32, #tpu.memory_space<vmem>>, vector<8x128xf32>
    %c48_104 = arith.constant 48 : index
    %c128_105 = arith.constant 128 : index
    %278 = vector.load %arg11[%c48_104, %c128_105] : memref<64x256xf32, #tpu.memory_space<vmem>>, vector<8x128xf32>
    %279 = tpu.concatenate %277, %278 in 0 : vector<8x128xf32>, vector<8x128xf32> -> vector<16x128xf32>
    %280 = vector.extract_strided_slice %276 {offsets = [0, 0], sizes = [8, 128], strides = [1, 1]} : vector<16x256xf32> to vector<8x128xf32>
    %281 = vector.extract_strided_slice %276 {offsets = [8, 128], sizes = [8, 128], strides = [1, 1]} : vector<16x256xf32> to vector<8x128xf32>
    %282 = tpu.concatenate %280, %281 in 0 : vector<8x128xf32>, vector<8x128xf32> -> vector<16x128xf32>
    %283 = arith.addf %279, %282 : vector<16x128xf32>
    %284 = arith.mulf %283, %8 : vector<16x128xf32>
    %285 = math.tanh %284 : vector<16x128xf32>
    %286 = arith.mulf %285, %8 : vector<16x128xf32>
    %287 = arith.addf %286, %10 : vector<16x128xf32>
    %288 = vector.extract_strided_slice %287 {offsets = [0, 32], sizes = [16, 32], strides = [1, 1]} : vector<16x128xf32> to vector<16x32xf32>
    %289 = arith.mulf %288, %266 : vector<16x32xf32>
    %290 = vector.extract_strided_slice %287 {offsets = [0, 0], sizes = [16, 32], strides = [1, 1]} : vector<16x128xf32> to vector<16x32xf32>
    %291 = vector.extract_strided_slice %287 {offsets = [0, 64], sizes = [16, 32], strides = [1, 1]} : vector<16x128xf32> to vector<16x32xf32>
    %292 = arith.mulf %290, %291 : vector<16x32xf32>
    %293 = arith.addf %289, %292 : vector<16x32xf32>
    %294 = vector.extract_strided_slice %287 {offsets = [0, 96], sizes = [16, 32], strides = [1, 1]} : vector<16x128xf32> to vector<16x32xf32>
    %295 = math.tanh %293 : vector<16x32xf32>
    %296 = arith.mulf %294, %295 : vector<16x32xf32>
    %297 = arith.truncf %296 : vector<16x32xf32> to vector<16x32xbf16>
    %298 = vector.extract_strided_slice %297 {offsets = [0, 0], sizes = [8, 32], strides = [1, 1]} : vector<16x32xbf16> to vector<8x32xbf16>
    %c8_106 = arith.constant 8 : index
    %c0_107 = arith.constant 0 : index
    %299 = vector.load %arg12[%c8_106, %c0_107] : memref<64x64xbf16, #tpu.memory_space<vmem>>, vector<8x32xbf16>
    tpu.vector_store %arg12[%c8_106, %c0_107], %298 {strides = array<i32>} : memref<64x64xbf16, #tpu.memory_space<vmem>>, vector<8x32xbf16>,
    %300 = vector.extract_strided_slice %297 {offsets = [8, 0], sizes = [8, 32], strides = [1, 1]} : vector<16x32xbf16> to vector<8x32xbf16>
    %c48_108 = arith.constant 48 : index
    %c32_109 = arith.constant 32 : index
    %301 = vector.load %arg12[%c48_108, %c32_109] : memref<64x64xbf16, #tpu.memory_space<vmem>>, vector<8x32xbf16>
    tpu.vector_store %arg12[%c48_108, %c32_109], %300 {strides = array<i32>} : memref<64x64xbf16, #tpu.memory_space<vmem>>, vector<8x32xbf16>,
    %302 = arith.truncf %296 : vector<16x32xf32> to vector<16x32xbf16>
    %cst_110 = arith.constant dense<0.000000e+00> : vector<16x256xf32>
    %303 = tpu.matmul %302, %239, %cst_110 {dimension_numbers = #tpu.dot_dimension_numbers<[1], [0], [0], [1], [0, 0, 1, 1], [], []>} : vector<16x32xbf16>, vector<32x256xbf16>, vector<16x256xf32> -> vector<16x256xf32>
    %c16_111 = arith.constant 16 : index
    %c0_112 = arith.constant 0 : index
    %304 = vector.load %arg11[%c16_111, %c0_112] : memref<64x256xf32, #tpu.memory_space<vmem>>, vector<8x128xf32>
    %c40_113 = arith.constant 40 : index
    %c128_114 = arith.constant 128 : index
    %305 = vector.load %arg11[%c40_113, %c128_114] : memref<64x256xf32, #tpu.memory_space<vmem>>, vector<8x128xf32>
    %306 = tpu.concatenate %304, %305 in 0 : vector<8x128xf32>, vector<8x128xf32> -> vector<16x128xf32>
    %307 = vector.extract_strided_slice %303 {offsets = [0, 0], sizes = [8, 128], strides = [1, 1]} : vector<16x256xf32> to vector<8x128xf32>
    %308 = vector.extract_strided_slice %303 {offsets = [8, 128], sizes = [8, 128], strides = [1, 1]} : vector<16x256xf32> to vector<8x128xf32>
    %309 = tpu.concatenate %307, %308 in 0 : vector<8x128xf32>, vector<8x128xf32> -> vector<16x128xf32>
    %310 = arith.addf %306, %309 : vector<16x128xf32>
    %311 = arith.mulf %310, %8 : vector<16x128xf32>
    %312 = math.tanh %311 : vector<16x128xf32>
    %313 = arith.mulf %312, %8 : vector<16x128xf32>
    %314 = arith.addf %313, %10 : vector<16x128xf32>
    %315 = vector.extract_strided_slice %314 {offsets = [0, 32], sizes = [16, 32], strides = [1, 1]} : vector<16x128xf32> to vector<16x32xf32>
    %316 = arith.mulf %315, %293 : vector<16x32xf32>
    %317 = vector.extract_strided_slice %314 {offsets = [0, 0], sizes = [16, 32], strides = [1, 1]} : vector<16x128xf32> to vector<16x32xf32>
    %318 = vector.extract_strided_slice %314 {offsets = [0, 64], sizes = [16, 32], strides = [1, 1]} : vector<16x128xf32> to vector<16x32xf32>
    %319 = arith.mulf %317, %318 : vector<16x32xf32>
    %320 = arith.addf %316, %319 : vector<16x32xf32>
    %321 = vector.extract_strided_slice %314 {offsets = [0, 96], sizes = [16, 32], strides = [1, 1]} : vector<16x128xf32> to vector<16x32xf32>
    %322 = math.tanh %320 : vector<16x32xf32>
    %323 = arith.mulf %321, %322 : vector<16x32xf32>
    %324 = arith.truncf %323 : vector<16x32xf32> to vector<16x32xbf16>
    %325 = vector.extract_strided_slice %324 {offsets = [0, 0], sizes = [8, 32], strides = [1, 1]} : vector<16x32xbf16> to vector<8x32xbf16>
    %c16_115 = arith.constant 16 : index
    %c0_116 = arith.constant 0 : index
    %326 = vector.load %arg12[%c16_115, %c0_116] : memref<64x64xbf16, #tpu.memory_space<vmem>>, vector<8x32xbf16>
    tpu.vector_store %arg12[%c16_115, %c0_116], %325 {strides = array<i32>} : memref<64x64xbf16, #tpu.memory_space<vmem>>, vector<8x32xbf16>,
    %327 = vector.extract_strided_slice %324 {offsets = [8, 0], sizes = [8, 32], strides = [1, 1]} : vector<16x32xbf16> to vector<8x32xbf16>
    %c40_117 = arith.constant 40 : index
    %c32_118 = arith.constant 32 : index
    %328 = vector.load %arg12[%c40_117, %c32_118] : memref<64x64xbf16, #tpu.memory_space<vmem>>, vector<8x32xbf16>
    tpu.vector_store %arg12[%c40_117, %c32_118], %327 {strides = array<i32>} : memref<64x64xbf16, #tpu.memory_space<vmem>>, vector<8x32xbf16>,
    %329 = arith.truncf %323 : vector<16x32xf32> to vector<16x32xbf16>
    %cst_119 = arith.constant dense<0.000000e+00> : vector<16x256xf32>
    %330 = tpu.matmul %329, %239, %cst_119 {dimension_numbers = #tpu.dot_dimension_numbers<[1], [0], [0], [1], [0, 0, 1, 1], [], []>} : vector<16x32xbf16>, vector<32x256xbf16>, vector<16x256xf32> -> vector<16x256xf32>
    %c24_120 = arith.constant 24 : index
    %c0_121 = arith.constant 0 : index
    %331 = vector.load %arg11[%c24_120, %c0_121] : memref<64x256xf32, #tpu.memory_space<vmem>>, vector<8x128xf32>
    %c32_122 = arith.constant 32 : index
    %c128_123 = arith.constant 128 : index
    %332 = vector.load %arg11[%c32_122, %c128_123] : memref<64x256xf32, #tpu.memory_space<vmem>>, vector<8x128xf32>
    %333 = tpu.concatenate %331, %332 in 0 : vector<8x128xf32>, vector<8x128xf32> -> vector<16x128xf32>
    %334 = vector.extract_strided_slice %330 {offsets = [0, 0], sizes = [8, 128], strides = [1, 1]} : vector<16x256xf32> to vector<8x128xf32>
    %335 = vector.extract_strided_slice %330 {offsets = [8, 128], sizes = [8, 128], strides = [1, 1]} : vector<16x256xf32> to vector<8x128xf32>
    %336 = tpu.concatenate %334, %335 in 0 : vector<8x128xf32>, vector<8x128xf32> -> vector<16x128xf32>
    %337 = arith.addf %333, %336 : vector<16x128xf32>
    %338 = arith.mulf %337, %8 : vector<16x128xf32>
    %339 = math.tanh %338 : vector<16x128xf32>
    %340 = arith.mulf %339, %8 : vector<16x128xf32>
    %341 = arith.addf %340, %10 : vector<16x128xf32>
    %342 = vector.extract_strided_slice %341 {offsets = [0, 32], sizes = [16, 32], strides = [1, 1]} : vector<16x128xf32> to vector<16x32xf32>
    %343 = arith.mulf %342, %320 : vector<16x32xf32>
    %344 = vector.extract_strided_slice %341 {offsets = [0, 0], sizes = [16, 32], strides = [1, 1]} : vector<16x128xf32> to vector<16x32xf32>
    %345 = vector.extract_strided_slice %341 {offsets = [0, 64], sizes = [16, 32], strides = [1, 1]} : vector<16x128xf32> to vector<16x32xf32>
    %346 = arith.mulf %344, %345 : vector<16x32xf32>
    %347 = arith.addf %343, %346 : vector<16x32xf32>
    %348 = vector.extract_strided_slice %341 {offsets = [0, 96], sizes = [16, 32], strides = [1, 1]} : vector<16x128xf32> to vector<16x32xf32>
    %349 = math.tanh %347 : vector<16x32xf32>
    %350 = arith.mulf %348, %349 : vector<16x32xf32>
    %351 = arith.truncf %350 : vector<16x32xf32> to vector<16x32xbf16>
    %352 = vector.extract_strided_slice %351 {offsets = [0, 0], sizes = [8, 32], strides = [1, 1]} : vector<16x32xbf16> to vector<8x32xbf16>
    %c24_124 = arith.constant 24 : index
    %c0_125 = arith.constant 0 : index
    %353 = vector.load %arg12[%c24_124, %c0_125] : memref<64x64xbf16, #tpu.memory_space<vmem>>, vector<8x32xbf16>
    tpu.vector_store %arg12[%c24_124, %c0_125], %352 {strides = array<i32>} : memref<64x64xbf16, #tpu.memory_space<vmem>>, vector<8x32xbf16>,
    %354 = vector.extract_strided_slice %351 {offsets = [8, 0], sizes = [8, 32], strides = [1, 1]} : vector<16x32xbf16> to vector<8x32xbf16>
    %c32_126 = arith.constant 32 : index
    %c32_127 = arith.constant 32 : index
    %355 = vector.load %arg12[%c32_126, %c32_127] : memref<64x64xbf16, #tpu.memory_space<vmem>>, vector<8x32xbf16>
    tpu.vector_store %arg12[%c32_126, %c32_127], %354 {strides = array<i32>} : memref<64x64xbf16, #tpu.memory_space<vmem>>, vector<8x32xbf16>,
    %356 = arith.truncf %350 : vector<16x32xf32> to vector<16x32xbf16>
    %cst_128 = arith.constant dense<0.000000e+00> : vector<16x256xf32>
    %357 = tpu.matmul %356, %239, %cst_128 {dimension_numbers = #tpu.dot_dimension_numbers<[1], [0], [0], [1], [0, 0, 1, 1], [], []>} : vector<16x32xbf16>, vector<32x256xbf16>, vector<16x256xf32> -> vector<16x256xf32>
    %c32_129 = arith.constant 32 : index
    %c0_130 = arith.constant 0 : index
    %358 = vector.load %arg11[%c32_129, %c0_130] : memref<64x256xf32, #tpu.memory_space<vmem>>, vector<8x128xf32>
    %c24_131 = arith.constant 24 : index
    %c128_132 = arith.constant 128 : index
    %359 = vector.load %arg11[%c24_131, %c128_132] : memref<64x256xf32, #tpu.memory_space<vmem>>, vector<8x128xf32>
    %360 = tpu.concatenate %358, %359 in 0 : vector<8x128xf32>, vector<8x128xf32> -> vector<16x128xf32>
    %361 = vector.extract_strided_slice %357 {offsets = [0, 0], sizes = [8, 128], strides = [1, 1]} : vector<16x256xf32> to vector<8x128xf32>
    %362 = vector.extract_strided_slice %357 {offsets = [8, 128], sizes = [8, 128], strides = [1, 1]} : vector<16x256xf32> to vector<8x128xf32>
    %363 = tpu.concatenate %361, %362 in 0 : vector<8x128xf32>, vector<8x128xf32> -> vector<16x128xf32>
    %364 = arith.addf %360, %363 : vector<16x128xf32>
    %365 = arith.mulf %364, %8 : vector<16x128xf32>
    %366 = math.tanh %365 : vector<16x128xf32>
    %367 = arith.mulf %366, %8 : vector<16x128xf32>
    %368 = arith.addf %367, %10 : vector<16x128xf32>
    %369 = vector.extract_strided_slice %368 {offsets = [0, 32], sizes = [16, 32], strides = [1, 1]} : vector<16x128xf32> to vector<16x32xf32>
    %370 = arith.mulf %369, %347 : vector<16x32xf32>
    %371 = vector.extract_strided_slice %368 {offsets = [0, 0], sizes = [16, 32], strides = [1, 1]} : vector<16x128xf32> to vector<16x32xf32>
    %372 = vector.extract_strided_slice %368 {offsets = [0, 64], sizes = [16, 32], strides = [1, 1]} : vector<16x128xf32> to vector<16x32xf32>
    %373 = arith.mulf %371, %372 : vector<16x32xf32>
    %374 = arith.addf %370, %373 : vector<16x32xf32>
    %375 = vector.extract_strided_slice %368 {offsets = [0, 96], sizes = [16, 32], strides = [1, 1]} : vector<16x128xf32> to vector<16x32xf32>
    %376 = math.tanh %374 : vector<16x32xf32>
    %377 = arith.mulf %375, %376 : vector<16x32xf32>
    %378 = arith.truncf %377 : vector<16x32xf32> to vector<16x32xbf16>
    %379 = vector.extract_strided_slice %378 {offsets = [0, 0], sizes = [8, 32], strides = [1, 1]} : vector<16x32xbf16> to vector<8x32xbf16>
    %c32_133 = arith.constant 32 : index
    %c0_134 = arith.constant 0 : index
    %380 = vector.load %arg12[%c32_133, %c0_134] : memref<64x64xbf16, #tpu.memory_space<vmem>>, vector<8x32xbf16>
    tpu.vector_store %arg12[%c32_133, %c0_134], %379 {strides = array<i32>} : memref<64x64xbf16, #tpu.memory_space<vmem>>, vector<8x32xbf16>,
    %381 = vector.extract_strided_slice %378 {offsets = [8, 0], sizes = [8, 32], strides = [1, 1]} : vector<16x32xbf16> to vector<8x32xbf16>
    %c24_135 = arith.constant 24 : index
    %c32_136 = arith.constant 32 : index
    %382 = vector.load %arg12[%c24_135, %c32_136] : memref<64x64xbf16, #tpu.memory_space<vmem>>, vector<8x32xbf16>
    tpu.vector_store %arg12[%c24_135, %c32_136], %381 {strides = array<i32>} : memref<64x64xbf16, #tpu.memory_space<vmem>>, vector<8x32xbf16>,
    %383 = arith.truncf %377 : vector<16x32xf32> to vector<16x32xbf16>
    %cst_137 = arith.constant dense<0.000000e+00> : vector<16x256xf32>
    %384 = tpu.matmul %383, %239, %cst_137 {dimension_numbers = #tpu.dot_dimension_numbers<[1], [0], [0], [1], [0, 0, 1, 1], [], []>} : vector<16x32xbf16>, vector<32x256xbf16>, vector<16x256xf32> -> vector<16x256xf32>
    %c40_138 = arith.constant 40 : index
    %c0_139 = arith.constant 0 : index
    %385 = vector.load %arg11[%c40_138, %c0_139] : memref<64x256xf32, #tpu.memory_space<vmem>>, vector<8x128xf32>
    %c16_140 = arith.constant 16 : index
    %c128_141 = arith.constant 128 : index
    %386 = vector.load %arg11[%c16_140, %c128_141] : memref<64x256xf32, #tpu.memory_space<vmem>>, vector<8x128xf32>
    %387 = tpu.concatenate %385, %386 in 0 : vector<8x128xf32>, vector<8x128xf32> -> vector<16x128xf32>
    %388 = vector.extract_strided_slice %384 {offsets = [0, 0], sizes = [8, 128], strides = [1, 1]} : vector<16x256xf32> to vector<8x128xf32>
    %389 = vector.extract_strided_slice %384 {offsets = [8, 128], sizes = [8, 128], strides = [1, 1]} : vector<16x256xf32> to vector<8x128xf32>
    %390 = tpu.concatenate %388, %389 in 0 : vector<8x128xf32>, vector<8x128xf32> -> vector<16x128xf32>
    %391 = arith.addf %387, %390 : vector<16x128xf32>
    %392 = arith.mulf %391, %8 : vector<16x128xf32>
    %393 = math.tanh %392 : vector<16x128xf32>
    %394 = arith.mulf %393, %8 : vector<16x128xf32>
    %395 = arith.addf %394, %10 : vector<16x128xf32>
    %396 = vector.extract_strided_slice %395 {offsets = [0, 32], sizes = [16, 32], strides = [1, 1]} : vector<16x128xf32> to vector<16x32xf32>
    %397 = arith.mulf %396, %374 : vector<16x32xf32>
    %398 = vector.extract_strided_slice %395 {offsets = [0, 0], sizes = [16, 32], strides = [1, 1]} : vector<16x128xf32> to vector<16x32xf32>
    %399 = vector.extract_strided_slice %395 {offsets = [0, 64], sizes = [16, 32], strides = [1, 1]} : vector<16x128xf32> to vector<16x32xf32>
    %400 = arith.mulf %398, %399 : vector<16x32xf32>
    %401 = arith.addf %397, %400 : vector<16x32xf32>
    %402 = vector.extract_strided_slice %395 {offsets = [0, 96], sizes = [16, 32], strides = [1, 1]} : vector<16x128xf32> to vector<16x32xf32>
    %403 = math.tanh %401 : vector<16x32xf32>
    %404 = arith.mulf %402, %403 : vector<16x32xf32>
    %405 = arith.truncf %404 : vector<16x32xf32> to vector<16x32xbf16>
    %406 = vector.extract_strided_slice %405 {offsets = [0, 0], sizes = [8, 32], strides = [1, 1]} : vector<16x32xbf16> to vector<8x32xbf16>
    %c40_142 = arith.constant 40 : index
    %c0_143 = arith.constant 0 : index
    %407 = vector.load %arg12[%c40_142, %c0_143] : memref<64x64xbf16, #tpu.memory_space<vmem>>, vector<8x32xbf16>
    tpu.vector_store %arg12[%c40_142, %c0_143], %406 {strides = array<i32>} : memref<64x64xbf16, #tpu.memory_space<vmem>>, vector<8x32xbf16>,
    %408 = vector.extract_strided_slice %405 {offsets = [8, 0], sizes = [8, 32], strides = [1, 1]} : vector<16x32xbf16> to vector<8x32xbf16>
    %c16_144 = arith.constant 16 : index
    %c32_145 = arith.constant 32 : index
    %409 = vector.load %arg12[%c16_144, %c32_145] : memref<64x64xbf16, #tpu.memory_space<vmem>>, vector<8x32xbf16>
    tpu.vector_store %arg12[%c16_144, %c32_145], %408 {strides = array<i32>} : memref<64x64xbf16, #tpu.memory_space<vmem>>, vector<8x32xbf16>,
    %410 = arith.truncf %404 : vector<16x32xf32> to vector<16x32xbf16>
    %cst_146 = arith.constant dense<0.000000e+00> : vector<16x256xf32>
    %411 = tpu.matmul %410, %239, %cst_146 {dimension_numbers = #tpu.dot_dimension_numbers<[1], [0], [0], [1], [0, 0, 1, 1], [], []>} : vector<16x32xbf16>, vector<32x256xbf16>, vector<16x256xf32> -> vector<16x256xf32>
    %c48_147 = arith.constant 48 : index
    %c0_148 = arith.constant 0 : index
    %412 = vector.load %arg11[%c48_147, %c0_148] : memref<64x256xf32, #tpu.memory_space<vmem>>, vector<8x128xf32>
    %c8_149 = arith.constant 8 : index
    %c128_150 = arith.constant 128 : index
    %413 = vector.load %arg11[%c8_149, %c128_150] : memref<64x256xf32, #tpu.memory_space<vmem>>, vector<8x128xf32>
    %414 = tpu.concatenate %412, %413 in 0 : vector<8x128xf32>, vector<8x128xf32> -> vector<16x128xf32>
    %415 = vector.extract_strided_slice %411 {offsets = [0, 0], sizes = [8, 128], strides = [1, 1]} : vector<16x256xf32> to vector<8x128xf32>
    %416 = vector.extract_strided_slice %411 {offsets = [8, 128], sizes = [8, 128], strides = [1, 1]} : vector<16x256xf32> to vector<8x128xf32>
    %417 = tpu.concatenate %415, %416 in 0 : vector<8x128xf32>, vector<8x128xf32> -> vector<16x128xf32>
    %418 = arith.addf %414, %417 : vector<16x128xf32>
    %419 = arith.mulf %418, %8 : vector<16x128xf32>
    %420 = math.tanh %419 : vector<16x128xf32>
    %421 = arith.mulf %420, %8 : vector<16x128xf32>
    %422 = arith.addf %421, %10 : vector<16x128xf32>
    %423 = vector.extract_strided_slice %422 {offsets = [0, 32], sizes = [16, 32], strides = [1, 1]} : vector<16x128xf32> to vector<16x32xf32>
    %424 = arith.mulf %423, %401 : vector<16x32xf32>
    %425 = vector.extract_strided_slice %422 {offsets = [0, 0], sizes = [16, 32], strides = [1, 1]} : vector<16x128xf32> to vector<16x32xf32>
    %426 = vector.extract_strided_slice %422 {offsets = [0, 64], sizes = [16, 32], strides = [1, 1]} : vector<16x128xf32> to vector<16x32xf32>
    %427 = arith.mulf %425, %426 : vector<16x32xf32>
    %428 = arith.addf %424, %427 : vector<16x32xf32>
    %429 = vector.extract_strided_slice %422 {offsets = [0, 96], sizes = [16, 32], strides = [1, 1]} : vector<16x128xf32> to vector<16x32xf32>
    %430 = math.tanh %428 : vector<16x32xf32>
    %431 = arith.mulf %429, %430 : vector<16x32xf32>
    %432 = arith.truncf %431 : vector<16x32xf32> to vector<16x32xbf16>
    %433 = vector.extract_strided_slice %432 {offsets = [0, 0], sizes = [8, 32], strides = [1, 1]} : vector<16x32xbf16> to vector<8x32xbf16>
    %c48_151 = arith.constant 48 : index
    %c0_152 = arith.constant 0 : index
    %434 = vector.load %arg12[%c48_151, %c0_152] : memref<64x64xbf16, #tpu.memory_space<vmem>>, vector<8x32xbf16>
    tpu.vector_store %arg12[%c48_151, %c0_152], %433 {strides = array<i32>} : memref<64x64xbf16, #tpu.memory_space<vmem>>, vector<8x32xbf16>,
    %435 = vector.extract_strided_slice %432 {offsets = [8, 0], sizes = [8, 32], strides = [1, 1]} : vector<16x32xbf16> to vector<8x32xbf16>
    %c8_153 = arith.constant 8 : index
    %c32_154 = arith.constant 32 : index
    %436 = vector.load %arg12[%c8_153, %c32_154] : memref<64x64xbf16, #tpu.memory_space<vmem>>, vector<8x32xbf16>
    tpu.vector_store %arg12[%c8_153, %c32_154], %435 {strides = array<i32>} : memref<64x64xbf16, #tpu.memory_space<vmem>>, vector<8x32xbf16>,
    %437 = arith.truncf %431 : vector<16x32xf32> to vector<16x32xbf16>
    %cst_155 = arith.constant dense<0.000000e+00> : vector<16x256xf32>
    %438 = tpu.matmul %437, %239, %cst_155 {dimension_numbers = #tpu.dot_dimension_numbers<[1], [0], [0], [1], [0, 0, 1, 1], [], []>} : vector<16x32xbf16>, vector<32x256xbf16>, vector<16x256xf32> -> vector<16x256xf32>
    %c56_156 = arith.constant 56 : index
    %c0_157 = arith.constant 0 : index
    %439 = vector.load %arg11[%c56_156, %c0_157] : memref<64x256xf32, #tpu.memory_space<vmem>>, vector<8x128xf32>
    %c0_158 = arith.constant 0 : index
    %c128_159 = arith.constant 128 : index
    %440 = vector.load %arg11[%c0_158, %c128_159] : memref<64x256xf32, #tpu.memory_space<vmem>>, vector<8x128xf32>
    %441 = tpu.concatenate %439, %440 in 0 : vector<8x128xf32>, vector<8x128xf32> -> vector<16x128xf32>
    %442 = vector.extract_strided_slice %438 {offsets = [0, 0], sizes = [8, 128], strides = [1, 1]} : vector<16x256xf32> to vector<8x128xf32>
    %443 = vector.extract_strided_slice %438 {offsets = [8, 128], sizes = [8, 128], strides = [1, 1]} : vector<16x256xf32> to vector<8x128xf32>
    %444 = tpu.concatenate %442, %443 in 0 : vector<8x128xf32>, vector<8x128xf32> -> vector<16x128xf32>
    %445 = arith.addf %441, %444 : vector<16x128xf32>
    %446 = arith.mulf %445, %8 : vector<16x128xf32>
    %447 = math.tanh %446 : vector<16x128xf32>
    %448 = arith.mulf %447, %8 : vector<16x128xf32>
    %449 = arith.addf %448, %10 : vector<16x128xf32>
    %450 = vector.extract_strided_slice %449 {offsets = [0, 32], sizes = [16, 32], strides = [1, 1]} : vector<16x128xf32> to vector<16x32xf32>
    %451 = arith.mulf %450, %428 : vector<16x32xf32>
    %452 = vector.extract_strided_slice %449 {offsets = [0, 0], sizes = [16, 32], strides = [1, 1]} : vector<16x128xf32> to vector<16x32xf32>
    %453 = vector.extract_strided_slice %449 {offsets = [0, 64], sizes = [16, 32], strides = [1, 1]} : vector<16x128xf32> to vector<16x32xf32>
    %454 = arith.mulf %452, %453 : vector<16x32xf32>
    %455 = arith.addf %451, %454 : vector<16x32xf32>
    %456 = vector.extract_strided_slice %449 {offsets = [0, 96], sizes = [16, 32], strides = [1, 1]} : vector<16x128xf32> to vector<16x32xf32>
    %457 = math.tanh %455 : vector<16x32xf32>
    %458 = arith.mulf %456, %457 : vector<16x32xf32>
    %459 = arith.truncf %458 : vector<16x32xf32> to vector<16x32xbf16>
    %460 = vector.extract_strided_slice %459 {offsets = [0, 0], sizes = [8, 32], strides = [1, 1]} : vector<16x32xbf16> to vector<8x32xbf16>
    %c56_160 = arith.constant 56 : index
    %c0_161 = arith.constant 0 : index
    %461 = vector.load %arg12[%c56_160, %c0_161] : memref<64x64xbf16, #tpu.memory_space<vmem>>, vector<8x32xbf16>
    tpu.vector_store %arg12[%c56_160, %c0_161], %460 {strides = array<i32>} : memref<64x64xbf16, #tpu.memory_space<vmem>>, vector<8x32xbf16>,
    %462 = vector.extract_strided_slice %459 {offsets = [8, 0], sizes = [8, 32], strides = [1, 1]} : vector<16x32xbf16> to vector<8x32xbf16>
    %c0_162 = arith.constant 0 : index
    %c32_163 = arith.constant 32 : index
    %463 = vector.load %arg12[%c0_162, %c32_163] : memref<64x64xbf16, #tpu.memory_space<vmem>>, vector<8x32xbf16>
    tpu.vector_store %arg12[%c0_162, %c32_163], %462 {strides = array<i32>} : memref<64x64xbf16, #tpu.memory_space<vmem>>, vector<8x32xbf16>,
    %c0_164 = arith.constant 0 : index
    %c0_165 = arith.constant 0 : index
    %464 = vector.load %arg12[%c0_164, %c0_165] : memref<64x64xbf16, #tpu.memory_space<vmem>>, vector<64x64xbf16>
    %c0_166 = arith.constant 0 : index
    %c0_167 = arith.constant 0 : index
    %465 = vector.load %arg8[%c0_166, %c0_167] : memref<64x128xbf16, #tpu.memory_space<vmem>>, vector<64x128xbf16>
    %cst_168 = arith.constant dense<0.000000e+00> : vector<64x128xf32>
    %466 = tpu.matmul %464, %465, %cst_168 {dimension_numbers = #tpu.dot_dimension_numbers<[1], [0], [0], [1], [0, 0, 1, 1], [], []>} : vector<64x64xbf16>, vector<64x128xbf16>, vector<64x128xf32> -> vector<64x128xf32>
    %c0_169 = arith.constant 0 : index
    %c0_170 = arith.constant 0 : index
    %467 = vector.load %arg9[%c0_169, %c0_170] : memref<1x128xf32, #tpu.memory_space<vmem>>, vector<1x128xf32>
    %468 = vector.broadcast %467 : vector<1x128xf32> to vector<64x128xf32>
    %469 = arith.addf %466, %468 : vector<64x128xf32>
    %cst_171 = arith.constant dense<0xFF800000> : vector<64xf32>
    %470 = vector.multi_reduction <maximumf>, %469, %cst_171 [1] : vector<64x128xf32> to vector<64xf32>
    %471 = vector.shape_cast %470 : vector<64xf32> to vector<64x1xf32>
    %472 = vector.broadcast %471 : vector<64x1xf32> to vector<64x128xf32>
    %473 = arith.subf %469, %472 : vector<64x128xf32>
    %474 = math.exp %473 : vector<64x128xf32>
    %cst_172 = arith.constant dense<0.000000e+00> : vector<64xf32>
    %475 = vector.multi_reduction <add>, %474, %cst_172 [1] : vector<64x128xf32> to vector<64xf32>
    %476 = vector.shape_cast %475 : vector<64xf32> to vector<64x1xf32>
    %477 = math.log %476 : vector<64x1xf32>
    %478 = vector.broadcast %477 : vector<64x1xf32> to vector<64x128xf32>
    %479 = arith.subf %473, %478 : vector<64x128xf32>
    %c0_173 = arith.constant 0 : index
    %c0_174 = arith.constant 0 : index
    %c0_175 = arith.constant 0 : index
    %480 = vector.load %arg10[%c0_173, %c0_174, %c0_175] : memref<1x64x128xf32, #tpu.memory_space<vmem>>, vector<1x64x128xf32>
    %481 = vector.shape_cast %480 : vector<1x64x128xf32> to vector<64x128xf32>
    %482 = vector.shape_cast %479 : vector<64x128xf32> to vector<1x64x128xf32>
    tpu.vector_store %arg10[%c0_173, %c0_174, %c0_175], %482 {strides = array<i32>} : memref<1x64x128xf32, #tpu.memory_space<vmem>>, vector<1x64x128xf32>,
    return
  }
  func.func @transform_0(%arg0: i32) -> (i32, i32, i32) {
    %c0_i32 = arith.constant 0 : i32
    %c0_i32_0 = arith.constant 0 : i32
    %c0_i32_1 = arith.constant 0 : i32
    return %arg0, %c0_i32, %c0_i32_0 : i32, i32, i32
  }
  func.func @transform_1(%arg0: i32) -> (i32, i32) {
    %c0_i32 = arith.constant 0 : i32
    %c0_i32_0 = arith.constant 0 : i32
    %c0_i32_1 = arith.constant 0 : i32
    return %c0_i32, %c0_i32_0 : i32, i32
  }
  func.func @transform_2(%arg0: i32) -> (i32, i32) {
    %c0_i32 = arith.constant 0 : i32
    %c0_i32_0 = arith.constant 0 : i32
    %c0_i32_1 = arith.constant 0 : i32
    return %c0_i32, %c0_i32_0 : i32, i32
  }
  func.func @transform_3(%arg0: i32) -> (i32, i32) {
    %c0_i32 = arith.constant 0 : i32
    %c0_i32_0 = arith.constant 0 : i32
    %c0_i32_1 = arith.constant 0 : i32
    return %c0_i32, %c0_i32_0 : i32, i32
  }
  func.func @transform_4(%arg0: i32) -> (i32, i32) {
    %c0_i32 = arith.constant 0 : i32
    %c0_i32_0 = arith.constant 0 : i32
    %c0_i32_1 = arith.constant 0 : i32
    return %c0_i32, %c0_i32_0 : i32, i32
  }
  func.func @transform_5(%arg0: i32) -> (i32, i32) {
    %c0_i32 = arith.constant 0 : i32
    %c0_i32_0 = arith.constant 0 : i32
    %c0_i32_1 = arith.constant 0 : i32
    return %c0_i32, %c0_i32_0 : i32, i32
  }
  func.func @transform_6(%arg0: i32) -> (i32, i32) {
    %c0_i32 = arith.constant 0 : i32
    %c0_i32_0 = arith.constant 0 : i32
    %c0_i32_1 = arith.constant 0 : i32
    return %c0_i32, %c0_i32_0 : i32, i32
  }
  func.func @transform_7(%arg0: i32) -> (i32, i32) {
    %c0_i32 = arith.constant 0 : i32
    %c0_i32_0 = arith.constant 0 : i32
    %c0_i32_1 = arith.constant 0 : i32
    return %c0_i32, %c0_i32_0 : i32, i32
  }
  func.func @transform_8(%arg0: i32) -> (i32, i32) {
    %c0_i32 = arith.constant 0 : i32
    %c0_i32_0 = arith.constant 0 : i32
    %c0_i32_1 = arith.constant 0 : i32
    return %c0_i32, %c0_i32_0 : i32, i32
  }
  func.func @transform_9(%arg0: i32) -> (i32, i32, i32) {
    %c0_i32 = arith.constant 0 : i32
    %c0_i32_0 = arith.constant 0 : i32
    %c0_i32_1 = arith.constant 0 : i32
    return %arg0, %c0_i32, %c0_i32_0 : i32, i32, i32
  }
}

</mosaic_0001>

<bundles_post_ra>
// kernel: lstm_tagger_forward.1
= control target key start
LH: loop header
LB: loop body
LE: loop exit
PB: predicated region body
PF: predicated region fallthrough
CT: control target
= control target key end

     0   :  { %v2518_v1 = vmov 0   ;;  %vm96_vm0 = vcmask 130048   ;;  %v33_v11 = vlaneseq  ;;  %v2519_v50 = vmov 0.5   ;;  %s2521_s28 = smov 32   ;;  %s3271_s1 = inlined_call_operand.vmem [shape: bf16[16,256], index: 1, kind: input, shape index: {}]   ;;  %s3272_s0 = inlined_call_operand.vmem [shape: bf16[1,64,16], index: 0, kind: input, shape index: {}]   ;;  %s3273_s2 = inlined_call_operand.vmem [shape: bf16[32,256], index: 2, kind: input, shape index: {}]   ;;  %s3274_s3 = inlined_call_operand.vmem [shape: f32[1,256], index: 3, kind: input, shape index: {}]   ;;  %s3275_s4 = inlined_call_operand.vmem [shape: bf16[64,256], index: 4, kind: input, shape index: {}]   ;;  %s3276_s5 = inlined_call_operand.vmem [shape: bf16[32,256], index: 5, kind: input, shape index: {}]   ;;  %s3277_s6 = inlined_call_operand.vmem [shape: f32[1,256], index: 6, kind: input, shape index: {}]   ;;  %s3278_s7 = inlined_call_operand.vmem [shape: bf16[64,128], index: 7, kind: input, shape index: {}]   ;;  %s3279_s8 = inlined_call_operand.vmem [shape: f32[1,128], index: 8, kind: input, shape index: {}]   ;;  %s3280_s9 = inlined_call_operand.vmem [shape: f32[1,64,128], index: 9, kind: output, shape index: {}]  }
   0x1   :  { %v2323_v0 = vld [vmem:[%s3271_s1 + $0x4] ss:$8 sps:$4 sm:$0xff]   ;;  %141 = vmatprep.mubr.bf16.mxu0 %v2518_v1  ;;  %356 = vmatprep.mubr.bf16.mxu1 %v2518_v1  ;;  %v2325_v2 = vld [vmem:[%s3271_s1] ss:$8 sps:$4 sm:$0xff]   ;;  %v2599_v6 = vld [vmem:[%s3273_s2 + $0x14] ss:$8 sps:$4 sm:$0xff]  }
   0x2   :  { %109 = vmatprep.subr.bf16.mxu0 %v2323_v0  ;;  %v2326_v3 = vld [vmem:[%s3272_s0] sm:$0xff]   ;;  %v2607_v7 = vld [vmem:[%s3273_s2 + $0x10] ss:$8 sps:$4 sm:$0xff]   ;;  %v2330_v8 = vld [vmem:[%s3272_s0 + $0x8] sm:$0xff]   ;;  %v2636_v12 = vshrl.u32 %v33_v11, 7  ;;  %v34_v41 = vand.u32 127, %v33_v11 }
   0x3   :  { %110 = vmatpush1.bf16.msra.mxu0 %v2325_v2  ;;  %v2586_v4 = vld [vmem:[%s3273_s2 + $0x4] ss:$8 sps:$4 sm:$0xff]   ;;  %v2591_v5 = vld [vmem:[%s3273_s2] ss:$8 sps:$4 sm:$0xff]   ;;  %v2331_v9 = vld [vmem:[%s3272_s0 + $0x10] sm:$0xff]   ;;  %vm314_vm4 = vcmask 257024  }
   0x4   :  { %222 = vmatprep.subr.bf16.mxu0 %v2586_v4  ;;  %324 = vmatprep.subr.bf16.mxu1 %v2586_v4  ;;  %v2335_v10 = vld [vmem:[%s3272_s0 + $0x18] sm:$0xff]   ;;  %v62_v13 = vsub.s32 1, %v2636_v12  ;;  %v46_v14 = vld [vmem:[%s3274_s3] sm:$0x3]  ;;  %v58_v15 = vsub.s32 0, %v2636_v12  ;;  %vm35_vm1 = vcmp.ge.s32.totalorder %v34_v41, 64 }
   0x5   :  { %325 = vmatpush1.bf16.msra.mxu1 %v2591_v5  ;;  %vm36_vm2 = vcmp.lt.s32.totalorder %v34_v41, 96  ;;  %s2520_s3 = smov 64   ;;  %vm218_vm5 = vcmask 261120   ;;  %vm417_vm6 = vcmask 261124   ;;  %vm319_vm7 = vcmask 523524  }
   0x6   :  { %2248 = vmatmul.mubr.msk.bf16.vlgmr.msra.gmra.mrb[0].mxu0 %vm96_vm0, %v2326_v3  ;;  %326 = vmatprep.subr.bf16.mxu1 %v2599_v6  ;;  %v63_v16 = vrot.slane %v46_v14, %v62_v13  ;;  %v59_v18 = vrot.slane %v46_v14, %v58_v15  ;;  %vm37_vm3 = vmand %vm35_vm1, %vm36_vm2  ;;  %vm422_vm8 = vcmask 519424   ;;  %vm1101_vm9 = vcmask 523264  }
   0x7   :  { %223 = vmatpush1.bf16.msra.mxu0 %v2591_v5  ;;  %151 = vmatprep.mubr.bf16.mxu0 %v2518_v1  ;;  %v2675_v51 = vsel %vm37_vm3, 1.0, %v2519_v50 }
   0x8   :  { %224 = vmatprep.subr.bf16.mxu0 %v2599_v6  ;;  %v2680_v61 = vsub.f32 1.0, %v2675_v51 }
   0x9   :  { %327 = vmatpush1.bf16.msra.mxu1 %v2607_v7 }
   0xa   :  { %429 = vmatprep.subr.bf16.mxu1 %v2586_v4 }
   0xb   :  { %225 = vmatpush1.bf16.msra.mxu0 %v2607_v7 }
   0xc   :  { %632 = vmatprep.subr.bf16.mxu0 %v2586_v4 }
   0xe   :  { %2249 = vmatmul.mubr.msk.bf16.gmra.mrb[4].mxu0 %vm96_vm0, %v2330_v8 }
   0xf   :  { %161 = vmatprep.mubr.bf16.mxu0 %v2518_v1 }
  0x16   :  { %2250 = vmatmul.mubr.msk.bf16.gmra.mrb[8].mxu0 %vm96_vm0, %v2331_v9 }
  0x17   :  { %171 = vmatprep.mubr.bf16.mxu0 %v2518_v1 }
  0x1e   :  { %2251 = vmatmul.mubr.msk.bf16.gmra.mrb[12].mxu0 %vm96_vm0, %v2335_v10 }
  0x1f   :  { %254 = vmatprep.mubr.bf16.mxu0 %v2518_v1 }
  0x26   :  { %255 = vmatmul.mubr.bf16.vlgmr.msra.gmra.mrb[16].mxu0 %v2518_v1 }
  0x27   :  { %633 = vmatpush1.bf16.msra.mxu0 %v2591_v5  ;;  %664 = vmatprep.mubr.bf16.mxu0 %v2518_v1 }
  0x28   :  { %634 = vmatprep.subr.bf16.mxu0 %v2599_v6 }
  0x2b   :  { %635 = vmatpush1.bf16.msra.mxu0 %v2607_v7 }
  0x2c   :  { %835 = vmatprep.subr.bf16.mxu0 %v2586_v4 }
  0xd9   :  { %v143_v17 = vpop.f32.mrb[0].mxu0 }
  0xda   :  { %v145_v19 = vpop.f32.mrb[1].mxu0  ;;  %v144_v49 = vadd.f32 %v143_v17, %v59_v18 }
  0xdb   :  { %v2647_v20 = vadd.f32 %v145_v19, %v63_v16  ;;  %v147_v21 = vpop.f32.mrb[2].mxu0 }
  0xdc   :  { %v2649_v22 = vadd.f32 %v147_v21, %v59_v18  ;;  %v149_v23 = vpop.f32.mrb[3].mxu0 }
  0xdd   :  { %v2651_v24 = vadd.f32 %v149_v23, %v63_v16 }
  0xe1   :  { %v153_v25 = vpop.f32.mrb[4].mxu0 }
  0xe2   :  { %v2653_v26 = vadd.f32 %v153_v25, %v59_v18  ;;  %v155_v27 = vpop.f32.mrb[5].mxu0 }
  0xe3   :  { %v2655_v28 = vadd.f32 %v155_v27, %v63_v16  ;;  %v157_v29 = vpop.f32.mrb[6].mxu0 }
  0xe4   :  { %v2657_v30 = vadd.f32 %v157_v29, %v59_v18  ;;  %v159_v31 = vpop.f32.mrb[7].mxu0 }
  0xe5   :  { %v2659_v32 = vadd.f32 %v159_v31, %v63_v16 }
  0xe9   :  { %v163_v33 = vpop.f32.mrb[8].mxu0 }
  0xea   :  { %v2661_v34 = vadd.f32 %v163_v33, %v59_v18  ;;  %v165_v35 = vpop.f32.mrb[9].mxu0 }
  0xeb   :  { %v2663_v36 = vadd.f32 %v165_v35, %v63_v16  ;;  %v167_v37 = vpop.f32.mrb[10].mxu0 }
  0xec   :  { %v2665_v38 = vadd.f32 %v167_v37, %v59_v18  ;;  %v169_v39 = vpop.f32.mrb[11].mxu0 }
  0xed   :  { %v2667_v40 = vadd.f32 %v169_v39, %v63_v16 }
  0xf1   :  { %v173_v42 = vpop.f32.mrb[12].mxu0 }
  0xf2   :  { %v2669_v43 = vadd.f32 %v173_v42, %v59_v18  ;;  %v175_v44 = vpop.f32.mrb[13].mxu0 }
  0xf3   :  { %v2671_v45 = vadd.f32 %v175_v44, %v63_v16  ;;  %v177_v46 = vpop.f32.mrb[14].mxu0 }
  0xf4   :  { %v2673_v47 = vadd.f32 %v177_v46, %v59_v18  ;;  %v179_v48 = vpop.f32.mrb[15].mxu0 }
  0xf5   :  { %v180_v55 = vadd.f32 %v179_v48, %v63_v16 }
  0xf9   :  { %v256_v52 = vpop.f32.mrb[16].mxu0 }
  0xfa   :  { %v265_v53 = vadd.f32 %v256_v52, %v144_v49  ;;  %v258_v54 = vpop.f32.mrb[17].mxu0 }
  0xfb   :  { %v259_v56 = vpop.f32.mrb[18].mxu0 }
  0xfc   :  { %v267_v57 = vmul.f32 %v265_v53, %v2675_v51  ;;  %v260_v58 = vpop.f32.mrb[19].mxu0 }
  0xfd   :  { %v266_v59 = vadd.f32 %v260_v58, %v180_v55 }
  0xfe   :  { %2358 = vtanh.f32 %v267_v57 }
  0xff   :  { %v268_v60 = vmul.f32 %v266_v59, %v2675_v51 }
 0x101   :  { %2360 = vtanh.f32 %v268_v60 }
 0x108   :  { %v2359_v62 = vpop.eup %2358 }
 0x109   :  { %v271_v63 = vmul.f32 %v2359_v62, %v2675_v51 }
 0x10b   :  { %v2361_v0 = vpop.eup %2360  ;;  %v273_v2 = vadd.f32 %v271_v63, %v2680_v61 }
 0x10c   :  { %v272_v3 = vmul.f32 %v2361_v0, %v2675_v51 }
 0x10d   :  { %279 = vrot.lane.b32.xlu0 %v273_v2, %s2520_s3  ;;  %v275_v16 = vmul.f32 0.0, %v273_v2 }
 0x10e   :  { %v274_v8 = vadd.f32 %v272_v3, %v2680_v61 }
 0x110   :  { %v276_v19 = vmul.f32 0.0, %v274_v8 }
 0x111   :  { %281 = vrot.lane.b32.xlu0 %v274_v8, %s2520_s3 }
 0x17f   :  { %v280_v9 = vpop.permute.xlu0 %279 }
 0x180   :  { %v285_v10 = vmul.f32 %v280_v9, %v273_v2 }
 0x182   :  { %289 = vrot.lane.b32.xlu1 %v285_v10, %s2521_s28 }
 0x183   :  { %v282_v11 = vpop.permute.xlu0 %281 }
 0x184   :  { %v286_v14 = vmul.f32 %v282_v11, %v274_v8 }
 0x186   :  { %291 = vrot.lane.b32.xlu1 %v286_v14, %s2521_s28 }
 0x1f4   :  { %v290_v17 = vpop.permute.xlu1 %289 }
 0x1f5   :  { %v295_v18 = vadd.f32 %v290_v17, %v275_v16 }
 0x1f7   :  { %2362 = vtanh.f32 %v295_v18 }
 0x1f8   :  { %v292_v21 = vpop.permute.xlu1 %291 }
 0x1f9   :  { %v296_v23 = vadd.f32 %v292_v21, %v276_v19 }
 0x1fb   :  { %2364 = vtanh.f32 %v296_v23 }
 0x201   :  { %v2363_v25 = vpop.eup %2362 }
 0x202   :  { %301 = vrot.lane.b32.xlu0 %v2363_v25, %s2520_s3 }
 0x205   :  { %v2365_v27 = vpop.eup %2364 }
 0x206   :  { %303 = vrot.lane.b32.xlu1 %v2365_v27, %s2520_s3 }
 0x274   :  { %v302_v29 = vpop.permute.xlu0 %301 }
 0x275   :  { %v307_v33 = vmul.f32 %v302_v29, %v273_v2 }
 0x278   :  { %v304_v31 = vpop.permute.xlu1 %303 }
 0x279   :  { %v308_v35 = vmul.f32 %v304_v31, %v274_v8 }
 0x27b   :  { %v2692_v37 = vpack.c.bf16 %v308_v35, %v307_v33 }
 0x27d   :  { %311 = vrot.lane.b32.xlu0 %v2692_v37, %s2521_s28 }
 0x2ef   :  { %v312_v39 = vpop.permute.xlu0 %311 }
 0x2f0   :  { %315 = vst.msk [vmem:[#allocation3] sm:$0xf] %vm314_vm4, %v312_v39  ;;  %2256 = vmatmul.mubr.msk.bf16.vlgmr.msra.gmra.mrb[0].mxu1 %vm218_vm5, %v312_v39 }
 0x2f1   :  { %430 = vmatpush1.bf16.msra.mxu1 %v2591_v5  ;;  %461 = vmatprep.mubr.bf16.mxu1 %v2518_v1 }
 0x2f2   :  { %431 = vmatprep.subr.bf16.mxu1 %v2599_v6 }
 0x2f5   :  { %432 = vmatpush1.bf16.msra.mxu1 %v2607_v7 }
 0x2f6   :  { %529 = vmatprep.subr.bf16.mxu1 %v2586_v4 }
 0x3c3   :  { %v358_v41 = vpop.f32.mrb[0].mxu1 }
 0x3c4   :  { %v367_v42 = vadd.f32 %v358_v41, %v2649_v22  ;;  %v360_v44 = vpop.f32.mrb[1].mxu1 }
 0x3c5   :  { %v361_v46 = vpop.f32.mrb[2].mxu1 }
 0x3c6   :  { %v369_v48 = vmul.f32 %v367_v42, %v2675_v51  ;;  %v362_v49 = vpop.f32.mrb[3].mxu1 }
 0x3c7   :  { %v368_v50 = vadd.f32 %v362_v49, %v2671_v45 }
 0x3c8   :  { %2366 = vtanh.f32 %v369_v48 }
 0x3c9   :  { %v370_v52 = vmul.f32 %v368_v50, %v2675_v51 }
 0x3cb   :  { %2368 = vtanh.f32 %v370_v52 }
 0x3d2   :  { %v2367_v53 = vpop.eup %2366 }
 0x3d3   :  { %v373_v54 = vmul.f32 %v2367_v53, %v2675_v51 }
 0x3d5   :  { %v2369_v55 = vpop.eup %2368  ;;  %v375_v56 = vadd.f32 %v373_v54, %v2680_v61 }
 0x3d6   :  { %v374_v57 = vmul.f32 %v2369_v55, %v2675_v51 }
 0x3d7   :  { %381 = vrot.lane.b32.xlu1 %v375_v56, %s2520_s3  ;;  %v377_v62 = vmul.f32 %v375_v56, %v295_v18 }
 0x3d8   :  { %v376_v22 = vadd.f32 %v374_v57, %v2680_v61 }
 0x3da   :  { %383 = vrot.lane.b32.xlu0 %v376_v22, %s2520_s3  ;;  %v378_v2 = vmul.f32 %v376_v22, %v296_v23 }
 0x449   :  { %v382_v58 = vpop.permute.xlu1 %381 }
 0x44a   :  { %v387_v45 = vmul.f32 %v382_v58, %v375_v56 }
 0x44c   :  { %391 = vrot.lane.b32.xlu1 %v387_v45, %s2521_s28  ;;  %v384_v59 = vpop.permute.xlu0 %383 }
 0x44d   :  { %v388_v60 = vmul.f32 %v384_v59, %v376_v22 }
 0x44f   :  { %393 = vrot.lane.b32.xlu0 %v388_v60, %s2521_s28 }
 0x4be   :  { %v392_v63 = vpop.permute.xlu1 %391 }
 0x4bf   :  { %v397_v0 = vadd.f32 %v392_v63, %v377_v62 }
 0x4c1   :  { %2370 = vtanh.f32 %v397_v0  ;;  %v394_v3 = vpop.permute.xlu0 %393 }
 0x4c2   :  { %v398_v8 = vadd.f32 %v394_v3, %v378_v2 }
 0x4c4   :  { %2372 = vtanh.f32 %v398_v8 }
 0x4cb   :  { %v2371_v9 = vpop.eup %2370 }
 0x4cc   :  { %403 = vrot.lane.b32.xlu1 %v2371_v9, %s2520_s3 }
 0x4ce   :  { %v2373_v10 = vpop.eup %2372 }
 0x4cf   :  { %405 = vrot.lane.b32.xlu0 %v2373_v10, %s2520_s3 }
 0x53e   :  { %v404_v11 = vpop.permute.xlu1 %403 }
 0x53f   :  { %v409_v16 = vmul.f32 %v404_v11, %v375_v56 }
 0x541   :  { %v406_v14 = vpop.permute.xlu0 %405 }
 0x542   :  { %v410_v17 = vmul.f32 %v406_v14, %v376_v22 }
 0x544   :  { %v2717_v19 = vpack.c.bf16 %v410_v17, %v409_v16 }
 0x546   :  { %424 = vrot.lane.b32.xlu1 %v2717_v19, %s2521_s28 }
 0x5b8   :  { %v425_v18 = vpop.permute.xlu1 %424 }
 0x5b9   :  { %2257 = vmatmul.mubr.msk.bf16.vlgmr.msra.gmra.mrb[4].mxu1 %vm218_vm5, %v425_v18 }
 0x5ba   :  { %530 = vmatpush1.bf16.msra.mxu1 %v2591_v5  ;;  %561 = vmatprep.mubr.bf16.mxu1 %v2518_v1 }
 0x5bb   :  { %531 = vmatprep.subr.bf16.mxu1 %v2599_v6 }
 0x5be   :  { %532 = vmatpush1.bf16.msra.mxu1 %v2607_v7 }
 0x5bf   :  { %732 = vmatprep.subr.bf16.mxu1 %v2586_v4 }
 0x68c   :  { %v463_v21 = vpop.f32.mrb[4].mxu1 }
 0x68d   :  { %v472_v23 = vadd.f32 %v463_v21, %v2653_v26  ;;  %v465_v25 = vpop.f32.mrb[5].mxu1 }
 0x68e   :  { %v466_v27 = vpop.f32.mrb[6].mxu1 }
 0x68f   :  { %v474_v29 = vmul.f32 %v472_v23, %v2675_v51  ;;  %v467_v31 = vpop.f32.mrb[7].mxu1 }
 0x690   :  { %v473_v33 = vadd.f32 %v467_v31, %v2667_v40 }
 0x691   :  { %2374 = vtanh.f32 %v474_v29 }
 0x692   :  { %v475_v35 = vmul.f32 %v473_v33, %v2675_v51 }
 0x694   :  { %2376 = vtanh.f32 %v475_v35 }
 0x69b   :  { %v2375_v39 = vpop.eup %2374 }
 0x69c   :  { %v478_v41 = vmul.f32 %v2375_v39, %v2675_v51 }
 0x69e   :  { %v2377_v42 = vpop.eup %2376  ;;  %v480_v44 = vadd.f32 %v478_v41, %v2680_v61 }
 0x69f   :  { %v479_v46 = vmul.f32 %v2377_v42, %v2675_v51 }
 0x6a0   :  { %486 = vrot.lane.b32.xlu0 %v480_v44, %s2520_s3  ;;  %v482_v52 = vmul.f32 %v480_v44, %v397_v0 }
 0x6a1   :  { %v481_v26 = vadd.f32 %v479_v46, %v2680_v61 }
 0x6a3   :  { %488 = vrot.lane.b32.xlu1 %v481_v26, %s2520_s3  ;;  %v483_v55 = vmul.f32 %v481_v26, %v398_v8 }
 0x712   :  { %v487_v48 = vpop.permute.xlu0 %486 }
 0x713   :  { %v492_v40 = vmul.f32 %v487_v48, %v480_v44 }
 0x715   :  { %496 = vrot.lane.b32.xlu0 %v492_v40, %s2521_s28  ;;  %v489_v49 = vpop.permute.xlu1 %488 }
 0x716   :  { %v493_v50 = vmul.f32 %v489_v49, %v481_v26 }
 0x718   :  { %498 = vrot.lane.b32.xlu1 %v493_v50, %s2521_s28 }
 0x787   :  { %v497_v53 = vpop.permute.xlu0 %496 }
 0x788   :  { %v502_v54 = vadd.f32 %v497_v53, %v482_v52 }
 0x78a   :  { %2378 = vtanh.f32 %v502_v54  ;;  %v499_v56 = vpop.permute.xlu1 %498 }
 0x78b   :  { %v503_v57 = vadd.f32 %v499_v56, %v483_v55 }
 0x78d   :  { %2380 = vtanh.f32 %v503_v57 }
 0x794   :  { %v2379_v22 = vpop.eup %2378 }
 0x795   :  { %508 = vrot.lane.b32.xlu0 %v2379_v22, %s2520_s3 }
 0x797   :  { %v2381_v58 = vpop.eup %2380 }
 0x798   :  { %510 = vrot.lane.b32.xlu1 %v2381_v58, %s2520_s3 }
 0x807   :  { %v509_v45 = vpop.permute.xlu0 %508 }
 0x808   :  { %v514_v60 = vmul.f32 %v509_v45, %v480_v44 }
 0x80a   :  { %v511_v59 = vpop.permute.xlu1 %510 }
 0x80b   :  { %v515_v62 = vmul.f32 %v511_v59, %v481_v26 }
 0x80d   :  { %v2741_v63 = vpack.c.bf16 %v515_v62, %v514_v60 }
 0x80f   :  { %518 = vrot.lane.b32.xlu0 %v2741_v63, %s2521_s28 }
 0x881   :  { %v519_v0 = vpop.permute.xlu0 %518 }
 0x882   :  { %521 = vst.msk [vmem:[#allocation3 + $0x8] sm:$0xf] %vm314_vm4, %v519_v0  ;;  %2258 = vmatmul.mubr.msk.bf16.vlgmr.msra.gmra.mrb[8].mxu1 %vm218_vm5, %v519_v0 }
 0x883   :  { %733 = vmatpush1.bf16.msra.mxu1 %v2591_v5  ;;  %764 = vmatprep.mubr.bf16.mxu1 %v2518_v1 }
 0x884   :  { %734 = vmatprep.subr.bf16.mxu1 %v2599_v6 }
 0x887   :  { %735 = vmatpush1.bf16.msra.mxu1 %v2607_v7 }
 0x888   :  { %935 = vmatprep.subr.bf16.mxu1 %v2586_v4 }
 0x955   :  { %v563_v2 = vpop.f32.mrb[8].mxu1 }
 0x956   :  { %v572_v3 = vadd.f32 %v563_v2, %v2657_v30  ;;  %v565_v8 = vpop.f32.mrb[9].mxu1 }
 0x957   :  { %v566_v9 = vpop.f32.mrb[10].mxu1 }
 0x958   :  { %v574_v10 = vmul.f32 %v572_v3, %v2675_v51  ;;  %v567_v11 = vpop.f32.mrb[11].mxu1 }
 0x959   :  { %v573_v14 = vadd.f32 %v567_v11, %v2663_v36 }
 0x95a   :  { %2382 = vtanh.f32 %v574_v10 }
 0x95b   :  { %v575_v16 = vmul.f32 %v573_v14, %v2675_v51 }
 0x95d   :  { %2384 = vtanh.f32 %v575_v16 }
 0x964   :  { %v2383_v17 = vpop.eup %2382 }
 0x965   :  { %v578_v18 = vmul.f32 %v2383_v17, %v2675_v51 }
 0x967   :  { %v2385_v21 = vpop.eup %2384  ;;  %v580_v4 = vadd.f32 %v578_v18, %v2680_v61 }
 0x968   :  { %v579_v23 = vmul.f32 %v2385_v21, %v2675_v51 }
 0x969   :  { %586 = vrot.lane.b32.xlu1 %v580_v4, %s2520_s3  ;;  %v582_v31 = vmul.f32 %v580_v4, %v502_v54 }
 0x96a   :  { %v581_v30 = vadd.f32 %v579_v23, %v2680_v61 }
 0x96c   :  { %588 = vrot.lane.b32.xlu0 %v581_v30, %s2520_s3  ;;  %v583_v39 = vmul.f32 %v581_v30, %v503_v57 }
 0x9db   :  { %v587_v25 = vpop.permute.xlu1 %586 }
 0x9dc   :  { %v592_v36 = vmul.f32 %v587_v25, %v580_v4 }
 0x9de   :  { %596 = vrot.lane.b32.xlu1 %v592_v36, %s2521_s28  ;;  %v589_v27 = vpop.permute.xlu0 %588 }
 0x9df   :  { %v593_v29 = vmul.f32 %v589_v27, %v581_v30 }
 0x9e1   :  { %598 = vrot.lane.b32.xlu0 %v593_v29, %s2521_s28 }
 0xa50   :  { %v597_v33 = vpop.permute.xlu1 %596 }
 0xa51   :  { %v602_v35 = vadd.f32 %v597_v33, %v582_v31 }
 0xa53   :  { %2386 = vtanh.f32 %v602_v35  ;;  %v599_v41 = vpop.permute.xlu0 %598 }
 0xa54   :  { %v603_v42 = vadd.f32 %v599_v41, %v583_v39 }
 0xa56   :  { %2388 = vtanh.f32 %v603_v42 }
 0xa5d   :  { %v2387_v44 = vpop.eup %2386 }
 0xa5e   :  { %608 = vrot.lane.b32.xlu1 %v2387_v44, %s2520_s3 }
 0xa60   :  { %v2389_v46 = vpop.eup %2388 }
 0xa61   :  { %610 = vrot.lane.b32.xlu0 %v2389_v46, %s2520_s3 }
 0xad0   :  { %v609_v26 = vpop.permute.xlu1 %608 }
 0xad1   :  { %v614_v40 = vmul.f32 %v609_v26, %v580_v4 }
 0xad3   :  { %v611_v48 = vpop.permute.xlu0 %610 }
 0xad4   :  { %v615_v49 = vmul.f32 %v611_v48, %v581_v30 }
 0xad6   :  { %v2766_v50 = vpack.c.bf16 %v615_v49, %v614_v40 }
 0xad8   :  { %627 = vrot.lane.b32.xlu1 %v2766_v50, %s2521_s28 }
 0xb4a   :  { %v628_v52 = vpop.permute.xlu1 %627 }
 0xb4b   :  { %2259 = vmatmul.mubr.msk.bf16.vlgmr.msra.gmra.mrb[20].mxu0 %vm218_vm5, %v628_v52 }
 0xb4c   :  { %836 = vmatpush1.bf16.msra.mxu0 %v2591_v5  ;;  %867 = vmatprep.mubr.bf16.mxu0 %v2518_v1 }
 0xb4d   :  { %837 = vmatprep.subr.bf16.mxu0 %v2599_v6 }
 0xb50   :  { %838 = vmatpush1.bf16.msra.mxu0 %v2607_v7 }
 0xc1e   :  { %v666_v53 = vpop.f32.mrb[20].mxu0 }
 0xc1f   :  { %v675_v54 = vadd.f32 %v666_v53, %v2661_v34  ;;  %v668_v55 = vpop.f32.mrb[21].mxu0 }
 0xc20   :  { %v669_v56 = vpop.f32.mrb[22].mxu0 }
 0xc21   :  { %v677_v57 = vmul.f32 %v675_v54, %v2675_v51  ;;  %v670_v22 = vpop.f32.mrb[23].mxu0 }
 0xc22   :  { %v676_v58 = vadd.f32 %v670_v22, %v2659_v32 }
 0xc23   :  { %2390 = vtanh.f32 %v677_v57 }
 0xc24   :  { %v678_v45 = vmul.f32 %v676_v58, %v2675_v51 }
 0xc26   :  { %2392 = vtanh.f32 %v678_v45 }
 0xc2d   :  { %v2391_v59 = vpop.eup %2390 }
 0xc2e   :  { %v681_v60 = vmul.f32 %v2391_v59, %v2675_v51 }
 0xc30   :  { %v2393_v62 = vpop.eup %2392  ;;  %v683_v0 = vadd.f32 %v681_v60, %v2680_v61 }
 0xc31   :  { %v682_v2 = vmul.f32 %v2393_v62, %v2675_v51 }
 0xc32   :  { %689 = vrot.lane.b32.xlu0 %v683_v0, %s2520_s3  ;;  %v685_v10 = vmul.f32 %v683_v0, %v602_v35 }
 0xc33   :  { %v684_v34 = vadd.f32 %v682_v2, %v2680_v61 }
 0xc35   :  { %691 = vrot.lane.b32.xlu1 %v684_v34, %s2520_s3  ;;  %v686_v16 = vmul.f32 %v684_v34, %v603_v42 }
 0xca4   :  { %v690_v3 = vpop.permute.xlu0 %689 }
 0xca5   :  { %v695_v32 = vmul.f32 %v690_v3, %v683_v0 }
 0xca7   :  { %699 = vrot.lane.b32.xlu0 %v695_v32, %s2521_s28  ;;  %v692_v8 = vpop.permute.xlu1 %691 }
 0xca8   :  { %v696_v9 = vmul.f32 %v692_v8, %v684_v34 }
 0xcaa   :  { %701 = vrot.lane.b32.xlu1 %v696_v9, %s2521_s28 }
 0xd19   :  { %v700_v11 = vpop.permute.xlu0 %699 }
 0xd1a   :  { %v705_v14 = vadd.f32 %v700_v11, %v685_v10 }
 0xd1c   :  { %2394 = vtanh.f32 %v705_v14  ;;  %v702_v17 = vpop.permute.xlu1 %701 }
 0xd1d   :  { %v706_v18 = vadd.f32 %v702_v17, %v686_v16 }
 0xd1f   :  { %2396 = vtanh.f32 %v706_v18 }
 0xd26   :  { %v2395_v21 = vpop.eup %2394 }
 0xd27   :  { %711 = vrot.lane.b32.xlu0 %v2395_v21, %s2520_s3 }
 0xd29   :  { %v2397_v4 = vpop.eup %2396 }
 0xd2a   :  { %713 = vrot.lane.b32.xlu1 %v2397_v4, %s2520_s3 }
 0xd99   :  { %v712_v23 = vpop.permute.xlu0 %711 }
 0xd9a   :  { %v717_v25 = vmul.f32 %v712_v23, %v683_v0 }
 0xd9c   :  { %v714_v30 = vpop.permute.xlu1 %713 }
 0xd9d   :  { %v718_v36 = vmul.f32 %v714_v30, %v684_v34 }
 0xd9f   :  { %v2789_v27 = vpack.c.bf16 %v718_v36, %v717_v25 }
 0xda1   :  { %721 = vrot.lane.b32.xlu0 %v2789_v27, %s2521_s28 }
 0xe13   :  { %v2793_v29 = vpop.permute.xlu0 %721 }
 0xe14   :  { %2260 = vmatmul.mubr.msk.bf16.vlgmr.msra.gmra.mrb[12].mxu1 %vm218_vm5, %v2793_v29 }
 0xe15   :  { %936 = vmatpush1.bf16.msra.mxu1 %v2591_v5  ;;  %967 = vmatprep.mubr.bf16.mxu1 %v2518_v1 }
 0xe16   :  { %937 = vmatprep.subr.bf16.mxu1 %v2599_v6 }
 0xe19   :  { %938 = vmatpush1.bf16.msra.mxu1 %v2607_v7 }
 0xee7   :  { %v766_v31 = vpop.f32.mrb[12].mxu1 }
 0xee8   :  { %v775_v33 = vadd.f32 %v766_v31, %v2665_v38  ;;  %v768_v35 = vpop.f32.mrb[13].mxu1 }
 0xee9   :  { %v769_v39 = vpop.f32.mrb[14].mxu1 }
 0xeea   :  { %v777_v41 = vmul.f32 %v775_v33, %v2675_v51  ;;  %v770_v42 = vpop.f32.mrb[15].mxu1 }
 0xeeb   :  { %v776_v44 = vadd.f32 %v770_v42, %v2655_v28 }
 0xeec   :  { %2398 = vtanh.f32 %v777_v41 }
 0xeed   :  { %v778_v46 = vmul.f32 %v776_v44, %v2675_v51 }
 0xeef   :  { %2400 = vtanh.f32 %v778_v46 }
 0xef6   :  { %v2399_v5 = vpop.eup %2398 }
 0xef7   :  { %v781_v26 = vmul.f32 %v2399_v5, %v2675_v51 }
 0xef9   :  { %v2401_v6 = vpop.eup %2400  ;;  %v783_v7 = vadd.f32 %v781_v26, %v2680_v61 }
 0xefa   :  { %v782_v48 = vmul.f32 %v2401_v6, %v2675_v51 }
 0xefb   :  { %789 = vrot.lane.b32.xlu1 %v783_v7, %s2520_s3  ;;  %v785_v53 = vmul.f32 %v783_v7, %v705_v14 }
 0xefc   :  { %v784_v38 = vadd.f32 %v782_v48, %v2680_v61 }
 0xefe   :  { %791 = vrot.lane.b32.xlu0 %v784_v38, %s2520_s3  ;;  %v786_v56 = vmul.f32 %v784_v38, %v706_v18 }
 0xf6d   :  { %v790_v40 = vpop.permute.xlu1 %789 }
 0xf6e   :  { %v795_v28 = vmul.f32 %v790_v40, %v783_v7 }
 0xf70   :  { %799 = vrot.lane.b32.xlu1 %v795_v28, %s2521_s28  ;;  %v792_v49 = vpop.permute.xlu0 %791 }
 0xf71   :  { %v796_v52 = vmul.f32 %v792_v49, %v784_v38 }
 0xf73   :  { %801 = vrot.lane.b32.xlu0 %v796_v52, %s2521_s28 }
 0xfe2   :  { %v800_v54 = vpop.permute.xlu1 %799 }
 0xfe3   :  { %v805_v55 = vadd.f32 %v800_v54, %v785_v53 }
 0xfe5   :  { %2402 = vtanh.f32 %v805_v55  ;;  %v802_v57 = vpop.permute.xlu0 %801 }
 0xfe6   :  { %v806_v22 = vadd.f32 %v802_v57, %v786_v56 }
 0xfe8   :  { %2404 = vtanh.f32 %v806_v22 }
 0xfef   :  { %v2403_v58 = vpop.eup %2402 }
 0xff0   :  { %811 = vrot.lane.b32.xlu1 %v2403_v58, %s2520_s3 }
 0xff2   :  { %v2405_v45 = vpop.eup %2404 }
 0xff3   :  { %813 = vrot.lane.b32.xlu0 %v2405_v45, %s2520_s3 }
0x1062   :  { %v812_v59 = vpop.permute.xlu1 %811 }
0x1063   :  { %v817_v62 = vmul.f32 %v812_v59, %v783_v7 }
0x1065   :  { %v814_v60 = vpop.permute.xlu0 %813 }
0x1066   :  { %v818_v0 = vmul.f32 %v814_v60, %v784_v38 }
0x1068   :  { %v2815_v2 = vpack.c.bf16 %v818_v0, %v817_v62 }
0x106a   :  { %830 = vrot.lane.b32.xlu1 %v2815_v2, %s2521_s28 }
0x10dc   :  { %v831_v34 = vpop.permute.xlu1 %830 }
0x10dd   :  { %2261 = vmatmul.mubr.msk.bf16.vlgmr.msra.gmra.mrb[24].mxu0 %vm218_vm5, %v831_v34 }
0x10de   :  { %1146 = vmatprep.mubr.bf16.mxu0 %v2518_v1 }
0x11b0   :  { %v869_v3 = vpop.f32.mrb[24].mxu0 }
0x11b1   :  { %v878_v32 = vadd.f32 %v869_v3, %v2669_v43  ;;  %v871_v8 = vpop.f32.mrb[25].mxu0 }
0x11b2   :  { %v872_v9 = vpop.f32.mrb[26].mxu0 }
0x11b3   :  { %v880_v10 = vmul.f32 %v878_v32, %v2675_v51  ;;  %v873_v11 = vpop.f32.mrb[27].mxu0 }
0x11b4   :  { %v879_v14 = vadd.f32 %v873_v11, %v2651_v24 }
0x11b5   :  { %2406 = vtanh.f32 %v880_v10 }
0x11b6   :  { %v881_v16 = vmul.f32 %v879_v14, %v2675_v51 }
0x11b8   :  { %2408 = vtanh.f32 %v881_v16  ;;  %v413_v16 = vrot.slane %v2717_v19, 4 }
0x11bf   :  { %v2407_v17 = vpop.eup %2406 }
0x11c0   :  { %v884_v18 = vmul.f32 %v2407_v17, %v2675_v51  ;;  %v618_v17 = vrot.slane %v2766_v50, 4  ;;  %v2339_v50 = vld [vmem:[%s3275_s4 + $0x10] ss:$8 sps:$4 sm:$0xff]  }
0x11c2   :  { %v2409_v21 = vpop.eup %2408  ;;  %v886_v4 = vadd.f32 %v884_v18, %v2680_v61  ;;  %v821_v18 = vrot.slane %v2815_v2, 4  ;;  %v2344_v2 = vld [vmem:[%s3275_s4 + $0x24] ss:$8 sps:$4 sm:$0xff]  }
0x11c3   :  { %v885_v23 = vmul.f32 %v2409_v21, %v2675_v51  ;;  %v2336_v21 = vld [vmem:[%s3275_s4] ss:$8 sps:$4 sm:$0xff]  }
0x11c4   :  { %892 = vrot.lane.b32.xlu0 %v886_v4, %s2520_s3  ;;  %v888_v31 = vmul.f32 %v886_v4, %v805_v55 }
0x11c5   :  { %v887_v43 = vadd.f32 %v885_v23, %v2680_v61  ;;  %v2341_v23 = vld [vmem:[%s3275_s4 + $0x14] ss:$8 sps:$4 sm:$0xff]  }
0x11c7   :  { %894 = vrot.lane.b32.xlu1 %v887_v43, %s2520_s3  ;;  %v889_v39 = vmul.f32 %v887_v43, %v806_v22 }
0x1236   :  { %v893_v30 = vpop.permute.xlu0 %892 }
0x1237   :  { %v898_v24 = vmul.f32 %v893_v30, %v886_v4  ;;  %v2888_v30 = vld [vmem:[%s3276_s5 + $0x4] ss:$8 sps:$4 sm:$0xff]  }
0x1238   :  { %1223 = vmatprep.subr.bf16.mxu1 %v2888_v30 }
0x1239   :  { %902 = vrot.lane.b32.xlu0 %v898_v24, %s2521_s28  ;;  %v895_v25 = vpop.permute.xlu1 %894  ;;  %v2893_v24 = vld [vmem:[%s3276_s5] ss:$8 sps:$4 sm:$0xff]  }
0x123a   :  { %v899_v36 = vmul.f32 %v895_v25, %v887_v43 }
0x123c   :  { %904 = vrot.lane.b32.xlu1 %v899_v36, %s2521_s28  ;;  %v2348_v36 = vld [vmem:[%s3275_s4 + $0x30] ss:$8 sps:$4 sm:$0xff]  }
0x12ab   :  { %v903_v33 = vpop.permute.xlu0 %902 }
0x12ac   :  { %v908_v35 = vadd.f32 %v903_v33, %v888_v31  ;;  %v2906_v31 = vld [vmem:[%s3276_s5 + $0x14] ss:$8 sps:$4 sm:$0xff]   ;;  %v2911_v33 = vld [vmem:[%s3276_s5 + $0x10] ss:$8 sps:$4 sm:$0xff]  }
0x12ae   :  { %2410 = vtanh.f32 %v908_v35  ;;  %v905_v41 = vpop.permute.xlu1 %904 }
0x12af   :  { %v909_v42 = vadd.f32 %v905_v41, %v889_v39 }
0x12b1   :  { %2412 = vtanh.f32 %v909_v42 }
0x12b8   :  { %v2411_v44 = vpop.eup %2410 }
0x12b9   :  { %914 = vrot.lane.b32.xlu0 %v2411_v44, %s2520_s3 }
0x12bb   :  { %v2413_v46 = vpop.eup %2412 }
0x12bc   :  { %916 = vrot.lane.b32.xlu1 %v2413_v46, %s2520_s3 }
0x132b   :  { %v915_v5 = vpop.permute.xlu0 %914 }
0x132c   :  { %v920_v6 = vmul.f32 %v915_v5, %v886_v4  ;;  %v2338_v4 = vld [vmem:[%s3275_s4 + $0x4] ss:$8 sps:$4 sm:$0xff]  }
0x132d   :  { %1114 = vmatprep.subr.bf16.mxu0 %v2338_v4 }
0x132e   :  { %v917_v26 = vpop.permute.xlu1 %916  ;;  %1115 = vmatpush1.bf16.msra.mxu0 %v2336_v21 }
0x132f   :  { %v921_v7 = vmul.f32 %v917_v26, %v887_v43  ;;  %1116 = vmatprep.subr.bf16.mxu0 %v2341_v23  ;;  %v2342_v43 = vld [vmem:[%s3275_s4 + $0x20] ss:$8 sps:$4 sm:$0xff]  }
0x1331   :  { %v922_v48 = vpack.c.bf16 %v921_v7, %v920_v6 }
0x1332   :  { %1117 = vmatpush1.bf16.msra.mxu0 %v2339_v50 }
0x1333   :  { %924 = vrot.lane.b32.xlu0 %v922_v48, %s2521_s28  ;;  %1118 = vmatprep.subr.bf16.mxu0 %v2344_v2 }
0x1336   :  { %1119 = vmatpush1.bf16.msra.mxu0 %v2342_v43 }
0x13a5   :  { %v2836_v38 = vpop.permute.xlu0 %924 }
0x13a6   :  { %2262 = vmatmul.mubr.msk.bf16.vlgmr.msra.gmra.mrb[16].mxu1 %vm218_vm5, %v2836_v38 }
0x13a7   :  { %1255 = vmatprep.mubr.bf16.mxu1 %v2518_v1  ;;  %1224 = vmatpush1.bf16.msra.mxu1 %v2893_v24 }
0x13a8   :  { %1225 = vmatprep.subr.bf16.mxu1 %v2906_v31 }
0x13ab   :  { %1226 = vmatpush1.bf16.msra.mxu1 %v2911_v33 }
0x13ac   :  { %1323 = vmatprep.subr.bf16.mxu1 %v2888_v30 }
0x13ae   :  { %1256 = vmatmul.mubr.bf16.vlgmr.msra.gmra.mrb[20].mxu1 %v2518_v1 }
0x13af   :  { %1324 = vmatpush1.bf16.msra.mxu1 %v2893_v24  ;;  %1355 = vmatprep.mubr.bf16.mxu1 %v2518_v1 }
0x13b0   :  { %1325 = vmatprep.subr.bf16.mxu1 %v2906_v31 }
0x13b3   :  { %1326 = vmatpush1.bf16.msra.mxu1 %v2911_v33 }
0x13b4   :  { %1426 = vmatprep.subr.bf16.mxu1 %v2888_v30 }
0x1479   :  { %v969_v40 = vpop.f32.mrb[16].mxu1 }
0x147a   :  { %v978_v28 = vadd.f32 %v969_v40, %v2673_v47  ;;  %v971_v49 = vpop.f32.mrb[17].mxu1 }
0x147b   :  { %v972_v52 = vpop.f32.mrb[18].mxu1 }
0x147c   :  { %v980_v53 = vmul.f32 %v978_v28, %v2675_v51  ;;  %v973_v54 = vpop.f32.mrb[19].mxu1 }
0x147d   :  { %v979_v55 = vadd.f32 %v973_v54, %v2647_v20 }
0x147e   :  { %2414 = vtanh.f32 %v980_v53 }
0x147f   :  { %v981_v56 = vmul.f32 %v979_v55, %v2675_v51 }
0x1481   :  { %2416 = vtanh.f32 %v981_v56  ;;  %v1257_v55 = vpop.f32.mrb[20].mxu1 }
0x1482   :  { %v1259_v56 = vpop.f32.mrb[21].mxu1 }
0x1488   :  { %v2415_v57 = vpop.eup %2414 }
0x1489   :  { %v984_v22 = vmul.f32 %v2415_v57, %v2675_v51  ;;  %v1260_v57 = vpop.f32.mrb[22].mxu1 }
0x148b   :  { %v2417_v58 = vpop.eup %2416  ;;  %v986_v45 = vadd.f32 %v984_v22, %v2680_v61  ;;  %v1261_v22 = vpop.f32.mrb[23].mxu1 }
0x148c   :  { %v985_v59 = vmul.f32 %v2417_v58, %v2675_v51 }
0x148d   :  { %992 = vrot.lane.b32.xlu1 %v986_v45, %s2520_s3  ;;  %v988_v34 = vmul.f32 %v986_v45, %v908_v35 }
0x148e   :  { %v987_v47 = vadd.f32 %v985_v59, %v2680_v61 }
0x1490   :  { %994 = vrot.lane.b32.xlu0 %v987_v47, %s2520_s3  ;;  %v989_v8 = vmul.f32 %v987_v47, %v909_v42 }
0x14ff   :  { %v993_v60 = vpop.permute.xlu1 %992 }
0x1500   :  { %v998_v20 = vmul.f32 %v993_v60, %v986_v45 }
0x1502   :  { %1002 = vrot.lane.b32.xlu1 %v998_v20, %s2521_s28  ;;  %v995_v62 = vpop.permute.xlu0 %994 }
0x1503   :  { %v999_v0 = vmul.f32 %v995_v62, %v987_v47 }
0x1505   :  { %1004 = vrot.lane.b32.xlu0 %v999_v0, %s2521_s28 }
0x1574   :  { %v1003_v3 = vpop.permute.xlu1 %1002 }
0x1575   :  { %v1008_v32 = vadd.f32 %v1003_v3, %v988_v34 }
0x1577   :  { %2418 = vtanh.f32 %v1008_v32  ;;  %v1005_v9 = vpop.permute.xlu0 %1004 }
0x1578   :  { %v1009_v10 = vadd.f32 %v1005_v9, %v989_v8 }
0x157a   :  { %2420 = vtanh.f32 %v1009_v10 }
0x1581   :  { %v2419_v11 = vpop.eup %2418 }
0x1582   :  { %1014 = vrot.lane.b32.xlu1 %v2419_v11, %s2520_s3 }
0x1584   :  { %v2421_v14 = vpop.eup %2420 }
0x1585   :  { %1016 = vrot.lane.b32.xlu0 %v2421_v14, %s2520_s3 }
0x1586   :  { %414 = vrot.lane.b32.xlu1 %v413_v16, %s2521_s28 }
0x1589   :  { %928 = vrot.lane.b32.xlu0 %v922_v48, %s2520_s3 }
0x158d   :  { %619 = vrot.lane.b32.xlu0 %v618_v17, %s2521_s28 }
0x1591   :  { %826 = vrot.lane.b32.xlu0 %v821_v18, %s2520_s3 }
0x1595   :  { %623 = vrot.lane.b32.xlu0 %v618_v17, %s2520_s3 }
0x1599   :  { %316 = vrot.lane.b32.xlu0 %v2692_v37, %s2520_s3  ;;  %v2350_v37 = vld [vmem:[%s3275_s4 + $0x34] ss:$8 sps:$4 sm:$0xff]  }
0x159a   :  { %1120 = vmatprep.subr.bf16.mxu0 %v2350_v37 }
0x159b   :  { %1121 = vmatpush1.bf16.msra.mxu0 %v2348_v36 }
0x159c   :  { %1729 = vmatprep.subr.bf16.mxu0 %v2888_v30 }
0x15f4   :  { %v1015_v25 = vpop.permute.xlu1 %1014 }
0x15f5   :  { %v1020_v39 = vmul.f32 %v1015_v25, %v986_v45 }
0x15f7   :  { %v1017_v35 = vpop.permute.xlu0 %1016 }
0x15f8   :  { %v1021_v41 = vmul.f32 %v1017_v35, %v987_v47  ;;  %v415_v42 = vpop.permute.xlu1 %414 }
0x15f9   :  { %418 = vst.msk [vmem:[#allocation3] sm:$0xf0] %vm417_vm6, %v415_v42 }
0x15fa   :  { %v1022_v44 = vpack.c.bf16 %v1021_v41, %v1020_v39 }
0x15fb   :  { %v929_v46 = vpop.permute.xlu0 %928 }
0x15fc   :  { %v1024_v5 = vrot.slane %v1022_v44, 4  ;;  %931 = vst.msk [vmem:[#allocation3] sm:$0xf0] %vm319_vm7, %v929_v46 }
0x15fe   :  { %1025 = vrot.lane.b32.xlu0 %v1024_v5, %s2521_s28  ;;  %1029 = vrot.lane.b32.xlu1 %v1024_v5, %s2520_s3 }
0x15ff   :  { %v620_v26 = vpop.permute.xlu0 %619 }
0x1600   :  { %622 = vst.msk [vmem:[#allocation3 + $0x8] sm:$0xf0] %vm417_vm6, %v620_v26 }
0x1602   :  { %725 = vrot.lane.b32.xlu1 %v2789_v27, %s2520_s3 }
0x1603   :  { %v827_v6 = vpop.permute.xlu0 %826 }
0x1604   :  { %829 = vst.msk [vmem:[#allocation3 + $0x8] sm:$0xf] %vm422_vm8, %v827_v6 }
0x1606   :  { %522 = vrot.lane.b32.xlu1 %v2741_v63, %s2520_s3 }
0x1607   :  { %v624_v7 = vpop.permute.xlu0 %623 }
0x1608   :  { %626 = vst.msk [vmem:[#allocation3 + $0x10] sm:$0xf] %vm422_vm8, %v624_v7 }
0x1609   :  { %724 = vst.msk [vmem:[#allocation3 + $0x10] sm:$0xf] %vm314_vm4, %v2793_v29 }
0x160a   :  { %822 = vrot.lane.b32.xlu1 %v821_v18, %s2521_s28 }
0x160b   :  { %v317_v48 = vpop.permute.xlu0 %316 }
0x160c   :  { %320 = vst.msk [vmem:[#allocation3 + $0x18] sm:$0xf0] %vm319_vm7, %v317_v48 }
0x160e   :  { %419 = vrot.lane.b32.xlu1 %v413_v16, %s2520_s3 }
0x1670   :  { %v1026_v27 = vpop.permute.xlu0 %1025  ;;  %v1030_v40 = vpop.permute.xlu1 %1029 }
0x1671   :  { %1028 = vst.msk [vmem:[#allocation3 + $0x18] sm:$0xf0] %vm417_vm6, %v1026_v27 }
0x1672   :  { %1032 = vst.msk [vmem:[#allocation3] sm:$0xf] %vm422_vm8, %v1030_v40 }
0x1674   :  { %v726_v63 = vpop.permute.xlu1 %725 }
0x1675   :  { %728 = vst.msk [vmem:[#allocation3 + $0x8] sm:$0xf0] %vm319_vm7, %v726_v63 }
0x1678   :  { %v523_v29 = vpop.permute.xlu1 %522 }
0x1679   :  { %v1046_v28 = vld [vmem:[#allocation3] sm:$0xff]  ;;  %525 = vst.msk [vmem:[#allocation3 + $0x10] sm:$0xf0] %vm319_vm7, %v523_v29 }
0x167a   :  { %2271 = vmatmul.mubr.msk.bf16.vlgmr.msra.gmra.mrb[28].mxu0 %vm1101_vm9, %v1046_v28 }
0x167b   :  { %1156 = vmatprep.mubr.bf16.mxu0 %v2518_v1  ;;  %1730 = vmatpush1.bf16.msra.mxu0 %v2893_v24 }
0x167c   :  { %1731 = vmatprep.subr.bf16.mxu0 %v2906_v31  ;;  %v823_v19 = vpop.permute.xlu1 %822  ;;  %v1047_v52 = vld [vmem:[#allocation3 + $0x8] sm:$0xff] }
0x167d   :  { %825 = vst.msk [vmem:[#allocation3 + $0x10] sm:$0xf0] %vm417_vm6, %v823_v19 }
0x167f   :  { %1732 = vmatpush1.bf16.msra.mxu0 %v2911_v33 }
0x1680   :  { %1932 = vmatprep.subr.bf16.mxu0 %v2888_v30  ;;  %v420_v49 = vpop.permute.xlu1 %419 }
0x1681   :  { %423 = vst.msk [vmem:[#allocation3 + $0x18] sm:$0xf] %vm422_vm8, %v420_v49 }
0x1682   :  { %2272 = vmatmul.mubr.msk.bf16.gmra.mrb[32].mxu0 %vm1101_vm9, %v1047_v52  ;;  %927 = vst.msk [vmem:[#allocation3 + $0x18] sm:$0xf] %vm314_vm4, %v2836_v38  ;;  %v1045_v38 = vld [vmem:[%s3277_s6] sm:$0x3] }
0x1683   :  { %1166 = vmatprep.mubr.bf16.mxu0 %v2518_v1  ;;  %v1054_v58 = vrot.slane %v1045_v38, %v58_v15  ;;  %v1058_v45 = vrot.slane %v1045_v38, %v62_v13 }
0x1684   :  { %v1048_v53 = vld [vmem:[#allocation3 + $0x10] sm:$0xff] }
0x1689   :  { %v1049_v54 = vld [vmem:[#allocation3 + $0x18] sm:$0xff] }
0x168a   :  { %2273 = vmatmul.mubr.msk.bf16.gmra.mrb[36].mxu0 %vm1101_vm9, %v1048_v53 }
0x168b   :  { %1176 = vmatprep.mubr.bf16.mxu0 %v2518_v1 }
0x1692   :  { %2274 = vmatmul.mubr.msk.bf16.gmra.mrb[40].mxu0 %vm1101_vm9, %v1049_v54 }
0x1693   :  { %1761 = vmatprep.mubr.bf16.mxu0 %v2518_v1 }
0x174d   :  { %v1148_v59 = vpop.f32.mrb[28].mxu0 }
0x174e   :  { %v1149_v47 = vadd.f32 %v1148_v59, %v1054_v58  ;;  %v1150_v60 = vpop.f32.mrb[29].mxu0 }
0x174f   :  { %v2968_v20 = vadd.f32 %v1150_v60, %v1058_v45  ;;  %v1152_v62 = vpop.f32.mrb[30].mxu0 }
0x1750   :  { %v2970_v0 = vadd.f32 %v1152_v62, %v1054_v58  ;;  %v1266_v34 = vadd.f32 %v1257_v55, %v1149_v47  ;;  %v1154_v3 = vpop.f32.mrb[31].mxu0 }
0x1751   :  { %v2972_v32 = vadd.f32 %v1154_v3, %v1058_v45 }
0x1752   :  { %v1268_v8 = vmul.f32 %v1266_v34, %v2675_v51 }
0x1754   :  { %2422 = vtanh.f32 %v1268_v8 }
0x1755   :  { %v1158_v9 = vpop.f32.mrb[32].mxu0 }
0x1756   :  { %v2975_v15 = vadd.f32 %v1158_v9, %v1054_v58  ;;  %v1160_v12 = vpop.f32.mrb[33].mxu0 }
0x1757   :  { %v2977_v13 = vadd.f32 %v1160_v12, %v1058_v45  ;;  %v1162_v10 = vpop.f32.mrb[34].mxu0 }
0x1758   :  { %v2979_v11 = vadd.f32 %v1162_v10, %v1054_v58  ;;  %v1164_v14 = vpop.f32.mrb[35].mxu0 }
0x1759   :  { %v2981_v16 = vadd.f32 %v1164_v14, %v1058_v45 }
0x175d   :  { %v1168_v17 = vpop.f32.mrb[36].mxu0 }
0x175e   :  { %v2423_v18 = vpop.eup %2422  ;;  %v2983_v21 = vadd.f32 %v1168_v17, %v1054_v58  ;;  %v1170_v4 = vpop.f32.mrb[37].mxu0 }
0x175f   :  { %v2985_v23 = vadd.f32 %v1170_v4, %v1058_v45  ;;  %v1172_v50 = vpop.f32.mrb[38].mxu0  ;;  %v1272_v2 = vmul.f32 %v2423_v18, %v2675_v51 }
0x1760   :  { %v2988_v43 = vadd.f32 %v1172_v50, %v1054_v58  ;;  %v1174_v37 = vpop.f32.mrb[39].mxu0 }
0x1761   :  { %v2990_v25 = vadd.f32 %v1174_v37, %v1058_v45  ;;  %v1274_v36 = vadd.f32 %v1272_v2, %v2680_v61 }
0x1763   :  { %1280 = vrot.lane.b32.xlu1 %v1274_v36, %s2520_s3  ;;  %v1276_v49 = vmul.f32 0.0, %v1274_v36 }
0x1765   :  { %v1178_v35 = vpop.f32.mrb[40].mxu0 }
0x1766   :  { %v2994_v39 = vadd.f32 %v1178_v35, %v1054_v58  ;;  %v1180_v41 = vpop.f32.mrb[41].mxu0 }
0x1767   :  { %v1181_v42 = vadd.f32 %v1180_v41, %v1058_v45  ;;  %v1182_v44 = vpop.f32.mrb[42].mxu0 }
0x1768   :  { %v2996_v46 = vadd.f32 %v1182_v44, %v1054_v58  ;;  %v1184_v5 = vpop.f32.mrb[43].mxu0 }
0x1769   :  { %v1185_v26 = vadd.f32 %v1184_v5, %v1058_v45 }
0x176b   :  { %v1267_v6 = vadd.f32 %v1261_v22, %v1185_v26 }
0x176d   :  { %v1269_v7 = vmul.f32 %v1267_v6, %v2675_v51 }
0x176f   :  { %2424 = vtanh.f32 %v1269_v7 }
0x1779   :  { %v2425_v48 = vpop.eup %2424 }
0x177a   :  { %v1273_v27 = vmul.f32 %v2425_v48, %v2675_v51 }
0x177c   :  { %v1275_v40 = vadd.f32 %v1273_v27, %v2680_v61 }
0x177e   :  { %1282 = vrot.lane.b32.xlu0 %v1275_v40, %s2520_s3  ;;  %v1277_v55 = vmul.f32 0.0, %v1275_v40 }
0x17d5   :  { %v1281_v63 = vpop.permute.xlu1 %1280 }
0x17d6   :  { %v1286_v29 = vmul.f32 %v1281_v63, %v1274_v36 }
0x17d8   :  { %1290 = vrot.lane.b32.xlu1 %v1286_v29, %s2521_s28 }
0x17f0   :  { %v1283_v28 = vpop.permute.xlu0 %1282 }
0x17f1   :  { %v1287_v19 = vmul.f32 %v1283_v28, %v1275_v40 }
0x17f3   :  { %1292 = vrot.lane.b32.xlu0 %v1287_v19, %s2521_s28 }
0x184a   :  { %v1291_v52 = vpop.permute.xlu1 %1290 }
0x184b   :  { %v1296_v53 = vadd.f32 %v1291_v52, %v1276_v49 }
0x184d   :  { %2426 = vtanh.f32 %v1296_v53 }
0x1857   :  { %v2427_v54 = vpop.eup %2426 }
0x1858   :  { %1302 = vrot.lane.b32.xlu1 %v2427_v54, %s2520_s3 }
0x1865   :  { %v1293_v56 = vpop.permute.xlu0 %1292 }
0x1866   :  { %v1297_v57 = vadd.f32 %v1293_v56, %v1277_v55 }
0x1868   :  { %2428 = vtanh.f32 %v1297_v57 }
0x1872   :  { %v2429_v22 = vpop.eup %2428 }
0x1873   :  { %1304 = vrot.lane.b32.xlu0 %v2429_v22, %s2520_s3 }
0x18ca   :  { %v1303_v38 = vpop.permute.xlu1 %1302 }
0x18cb   :  { %v1308_v45 = vmul.f32 %v1303_v38, %v1274_v36 }
0x18e5   :  { %v1305_v58 = vpop.permute.xlu0 %1304 }
0x18e6   :  { %v1309_v59 = vmul.f32 %v1305_v58, %v1275_v40 }
0x18e8   :  { %v3006_v47 = vpack.c.bf16 %v1309_v59, %v1308_v45 }
0x18ea   :  { %1312 = vrot.lane.b32.xlu1 %v3006_v47, %s2521_s28 }
0x195c   :  { %v1313_v60 = vpop.permute.xlu1 %1312 }
0x195d   :  { %1315 = vst.msk [vmem:[#allocation3] sm:$0xf] %vm314_vm4, %v1313_v60  ;;  %2279 = vmatmul.mubr.msk.bf16.vlgmr.msra.gmra.mrb[24].mxu1 %vm218_vm5, %v1313_v60 }
0x195e   :  { %1427 = vmatpush1.bf16.msra.mxu1 %v2893_v24  ;;  %1458 = vmatprep.mubr.bf16.mxu1 %v2518_v1 }
0x195f   :  { %1428 = vmatprep.subr.bf16.mxu1 %v2906_v31 }
0x1962   :  { %1429 = vmatpush1.bf16.msra.mxu1 %v2911_v33 }
0x1963   :  { %1526 = vmatprep.subr.bf16.mxu1 %v2888_v30 }
0x1a30   :  { %v1357_v62 = vpop.f32.mrb[24].mxu1 }
0x1a31   :  { %v1366_v34 = vadd.f32 %v1357_v62, %v2970_v0  ;;  %v1359_v3 = vpop.f32.mrb[25].mxu1 }
0x1a32   :  { %v1360_v8 = vpop.f32.mrb[26].mxu1 }
0x1a33   :  { %v1368_v9 = vmul.f32 %v1366_v34, %v2675_v51  ;;  %v1361_v12 = vpop.f32.mrb[27].mxu1 }
0x1a34   :  { %v1367_v10 = vadd.f32 %v1361_v12, %v1181_v42 }
0x1a35   :  { %2430 = vtanh.f32 %v1368_v9 }
0x1a36   :  { %v1369_v14 = vmul.f32 %v1367_v10, %v2675_v51 }
0x1a38   :  { %2432 = vtanh.f32 %v1369_v14 }
0x1a3f   :  { %v2431_v17 = vpop.eup %2430 }
0x1a40   :  { %v1372_v18 = vmul.f32 %v2431_v17, %v2675_v51 }
0x1a42   :  { %v2433_v4 = vpop.eup %2432  ;;  %v1374_v50 = vadd.f32 %v1372_v18, %v2680_v61 }
0x1a43   :  { %v1373_v2 = vmul.f32 %v2433_v4, %v2675_v51 }
0x1a44   :  { %1380 = vrot.lane.b32.xlu0 %v1374_v50, %s2520_s3  ;;  %v1376_v42 = vmul.f32 %v1374_v50, %v1296_v53 }
0x1a45   :  { %v1375_v0 = vadd.f32 %v1373_v2, %v2680_v61 }
0x1a47   :  { %1382 = vrot.lane.b32.xlu1 %v1375_v0, %s2520_s3  ;;  %v1377_v26 = vmul.f32 %v1375_v0, %v1297_v57 }
0x1ab6   :  { %v1381_v37 = vpop.permute.xlu0 %1380 }
0x1ab7   :  { %v1386_v36 = vmul.f32 %v1381_v37, %v1374_v50 }
0x1ab9   :  { %1390 = vrot.lane.b32.xlu0 %v1386_v36, %s2521_s28  ;;  %v1383_v35 = vpop.permute.xlu1 %1382 }
0x1aba   :  { %v1387_v41 = vmul.f32 %v1383_v35, %v1375_v0 }
0x1abc   :  { %1392 = vrot.lane.b32.xlu1 %v1387_v41, %s2521_s28 }
0x1b2b   :  { %v1391_v44 = vpop.permute.xlu0 %1390 }
0x1b2c   :  { %v1396_v5 = vadd.f32 %v1391_v44, %v1376_v42 }
0x1b2e   :  { %2434 = vtanh.f32 %v1396_v5  ;;  %v1393_v6 = vpop.permute.xlu1 %1392 }
0x1b2f   :  { %v1397_v7 = vadd.f32 %v1393_v6, %v1377_v26 }
0x1b31   :  { %2436 = vtanh.f32 %v1397_v7 }
0x1b38   :  { %v2435_v48 = vpop.eup %2434 }
0x1b39   :  { %1402 = vrot.lane.b32.xlu0 %v2435_v48, %s2520_s3 }
0x1b3b   :  { %v2437_v27 = vpop.eup %2436 }
0x1b3c   :  { %1404 = vrot.lane.b32.xlu1 %v2437_v27, %s2520_s3 }
0x1bab   :  { %v1403_v40 = vpop.permute.xlu0 %1402 }
0x1bac   :  { %v1408_v29 = vmul.f32 %v1403_v40, %v1374_v50 }
0x1bae   :  { %v1405_v63 = vpop.permute.xlu1 %1404 }
0x1baf   :  { %v1409_v28 = vmul.f32 %v1405_v63, %v1375_v0 }
0x1bb1   :  { %v3030_v19 = vpack.c.bf16 %v1409_v28, %v1408_v29 }
0x1bb3   :  { %1421 = vrot.lane.b32.xlu0 %v3030_v19, %s2521_s28 }
0x1c25   :  { %v1422_v49 = vpop.permute.xlu0 %1421 }
0x1c26   :  { %2280 = vmatmul.mubr.msk.bf16.vlgmr.msra.gmra.mrb[28].mxu1 %vm218_vm5, %v1422_v49 }
0x1c27   :  { %1527 = vmatpush1.bf16.msra.mxu1 %v2893_v24  ;;  %1558 = vmatprep.mubr.bf16.mxu1 %v2518_v1 }
0x1c28   :  { %1528 = vmatprep.subr.bf16.mxu1 %v2906_v31 }
0x1c2b   :  { %1529 = vmatpush1.bf16.msra.mxu1 %v2911_v33 }
0x1c2c   :  { %1629 = vmatprep.subr.bf16.mxu1 %v2888_v30 }
0x1cf9   :  { %v1460_v52 = vpop.f32.mrb[28].mxu1 }
0x1cfa   :  { %v1469_v53 = vadd.f32 %v1460_v52, %v2975_v15  ;;  %v1462_v54 = vpop.f32.mrb[29].mxu1 }
0x1cfb   :  { %v1463_v55 = vpop.f32.mrb[30].mxu1 }
0x1cfc   :  { %v1471_v56 = vmul.f32 %v1469_v53, %v2675_v51  ;;  %v1464_v57 = vpop.f32.mrb[31].mxu1 }
0x1cfd   :  { %v1470_v22 = vadd.f32 %v1464_v57, %v2990_v25 }
0x1cfe   :  { %2438 = vtanh.f32 %v1471_v56 }
0x1cff   :  { %v1472_v38 = vmul.f32 %v1470_v22, %v2675_v51 }
0x1d01   :  { %2440 = vtanh.f32 %v1472_v38 }
0x1d08   :  { %v2439_v58 = vpop.eup %2438 }
0x1d09   :  { %v1475_v45 = vmul.f32 %v2439_v58, %v2675_v51 }
0x1d0b   :  { %v2441_v59 = vpop.eup %2440  ;;  %v1477_v60 = vadd.f32 %v1475_v45, %v2680_v61 }
0x1d0c   :  { %v1476_v62 = vmul.f32 %v2441_v59, %v2675_v51 }
0x1d0d   :  { %1483 = vrot.lane.b32.xlu1 %v1477_v60, %s2520_s3  ;;  %v1479_v9 = vmul.f32 %v1477_v60, %v1396_v5 }
0x1d0e   :  { %v1478_v15 = vadd.f32 %v1476_v62, %v2680_v61 }
0x1d10   :  { %1485 = vrot.lane.b32.xlu0 %v1478_v15, %s2520_s3  ;;  %v1480_v14 = vmul.f32 %v1478_v15, %v1397_v7 }
0x1d7f   :  { %v1484_v34 = vpop.permute.xlu1 %1483 }
0x1d80   :  { %v1489_v25 = vmul.f32 %v1484_v34, %v1477_v60 }
0x1d82   :  { %1493 = vrot.lane.b32.xlu1 %v1489_v25, %s2521_s28  ;;  %v1486_v3 = vpop.permute.xlu0 %1485 }
0x1d83   :  { %v1490_v8 = vmul.f32 %v1486_v3, %v1478_v15 }
0x1d85   :  { %1495 = vrot.lane.b32.xlu0 %v1490_v8, %s2521_s28 }
0x1df4   :  { %v1494_v12 = vpop.permute.xlu1 %1493 }
0x1df5   :  { %v1499_v10 = vadd.f32 %v1494_v12, %v1479_v9 }
0x1df7   :  { %2442 = vtanh.f32 %v1499_v10  ;;  %v1496_v17 = vpop.permute.xlu0 %1495 }
0x1df8   :  { %v1500_v18 = vadd.f32 %v1496_v17, %v1480_v14 }
0x1dfa   :  { %2444 = vtanh.f32 %v1500_v18 }
0x1e01   :  { %v2443_v4 = vpop.eup %2442 }
0x1e02   :  { %1505 = vrot.lane.b32.xlu1 %v2443_v4, %s2520_s3 }
0x1e04   :  { %v2445_v50 = vpop.eup %2444 }
0x1e05   :  { %1507 = vrot.lane.b32.xlu0 %v2445_v50, %s2520_s3 }
0x1e74   :  { %v1506_v2 = vpop.permute.xlu1 %1505 }
0x1e75   :  { %v1511_v37 = vmul.f32 %v1506_v2, %v1477_v60 }
0x1e77   :  { %v1508_v0 = vpop.permute.xlu0 %1507 }
0x1e78   :  { %v1512_v36 = vmul.f32 %v1508_v0, %v1478_v15 }
0x1e7a   :  { %v3054_v35 = vpack.c.bf16 %v1512_v36, %v1511_v37 }
0x1e7c   :  { %1515 = vrot.lane.b32.xlu1 %v3054_v35, %s2521_s28 }
0x1eee   :  { %v1516_v41 = vpop.permute.xlu1 %1515 }
0x1eef   :  { %1518 = vst.msk [vmem:[#allocation3 + $0x8] sm:$0xf] %vm314_vm4, %v1516_v41  ;;  %2281 = vmatmul.mubr.msk.bf16.vlgmr.msra.gmra.mrb[32].mxu1 %vm218_vm5, %v1516_v41 }
0x1ef0   :  { %1630 = vmatpush1.bf16.msra.mxu1 %v2893_v24  ;;  %1661 = vmatprep.mubr.bf16.mxu1 %v2518_v1 }
0x1ef1   :  { %1631 = vmatprep.subr.bf16.mxu1 %v2906_v31 }
0x1ef4   :  { %1632 = vmatpush1.bf16.msra.mxu1 %v2911_v33 }
0x1ef5   :  { %1832 = vmatprep.subr.bf16.mxu1 %v2888_v30 }
0x1fc2   :  { %v1560_v42 = vpop.f32.mrb[32].mxu1 }
0x1fc3   :  { %v1569_v44 = vadd.f32 %v1560_v42, %v2979_v11  ;;  %v1562_v5 = vpop.f32.mrb[33].mxu1 }
0x1fc4   :  { %v1563_v26 = vpop.f32.mrb[34].mxu1 }
0x1fc5   :  { %v1571_v6 = vmul.f32 %v1569_v44, %v2675_v51  ;;  %v1564_v7 = vpop.f32.mrb[35].mxu1 }
0x1fc6   :  { %v1570_v48 = vadd.f32 %v1564_v7, %v2985_v23 }
0x1fc7   :  { %2446 = vtanh.f32 %v1571_v6 }
0x1fc8   :  { %v1572_v27 = vmul.f32 %v1570_v48, %v2675_v51 }
0x1fca   :  { %2448 = vtanh.f32 %v1572_v27 }
0x1fd1   :  { %v2447_v40 = vpop.eup %2446 }
0x1fd2   :  { %v1575_v63 = vmul.f32 %v2447_v40, %v2675_v51 }
0x1fd4   :  { %v2449_v29 = vpop.eup %2448  ;;  %v1577_v30 = vadd.f32 %v1575_v63, %v2680_v61 }
0x1fd5   :  { %v1576_v28 = vmul.f32 %v2449_v29, %v2675_v51 }
0x1fd6   :  { %1583 = vrot.lane.b32.xlu0 %v1577_v30, %s2520_s3  ;;  %v1579_v54 = vmul.f32 %v1577_v30, %v1499_v10 }
0x1fd7   :  { %v1578_v11 = vadd.f32 %v1576_v28, %v2680_v61 }
0x1fd9   :  { %1585 = vrot.lane.b32.xlu1 %v1578_v11, %s2520_s3  ;;  %v1580_v57 = vmul.f32 %v1578_v11, %v1500_v18 }
0x2048   :  { %v1584_v49 = vpop.permute.xlu0 %1583 }
0x2049   :  { %v1589_v23 = vmul.f32 %v1584_v49, %v1577_v30 }
0x204b   :  { %1593 = vrot.lane.b32.xlu0 %v1589_v23, %s2521_s28  ;;  %v1586_v52 = vpop.permute.xlu1 %1585 }
0x204c   :  { %v1590_v53 = vmul.f32 %v1586_v52, %v1578_v11 }
0x204e   :  { %1595 = vrot.lane.b32.xlu1 %v1590_v53, %s2521_s28 }
0x20bd   :  { %v1594_v55 = vpop.permute.xlu0 %1593 }
0x20be   :  { %v1599_v56 = vadd.f32 %v1594_v55, %v1579_v54 }
0x20c0   :  { %2450 = vtanh.f32 %v1599_v56  ;;  %v1596_v22 = vpop.permute.xlu1 %1595 }
0x20c1   :  { %v1600_v38 = vadd.f32 %v1596_v22, %v1580_v57 }
0x20c3   :  { %2452 = vtanh.f32 %v1600_v38 }
0x20ca   :  { %v2451_v58 = vpop.eup %2450 }
0x20cb   :  { %1605 = vrot.lane.b32.xlu0 %v2451_v58, %s2520_s3 }
0x20cd   :  { %v2453_v45 = vpop.eup %2452 }
0x20ce   :  { %1607 = vrot.lane.b32.xlu1 %v2453_v45, %s2520_s3 }
0x213d   :  { %v1606_v59 = vpop.permute.xlu0 %1605 }
0x213e   :  { %v1611_v62 = vmul.f32 %v1606_v59, %v1577_v30 }
0x2140   :  { %v1608_v60 = vpop.permute.xlu1 %1607 }
0x2141   :  { %v1612_v15 = vmul.f32 %v1608_v60, %v1578_v11 }
0x2143   :  { %v3079_v34 = vpack.c.bf16 %v1612_v15, %v1611_v62 }
0x2145   :  { %1624 = vrot.lane.b32.xlu0 %v3079_v34, %s2521_s28 }
0x21b7   :  { %v1625_v25 = vpop.permute.xlu0 %1624 }
0x21b8   :  { %2282 = vmatmul.mubr.msk.bf16.vlgmr.msra.gmra.mrb[36].mxu1 %vm218_vm5, %v1625_v25 }
0x21b9   :  { %1833 = vmatpush1.bf16.msra.mxu1 %v2893_v24  ;;  %1864 = vmatprep.mubr.bf16.mxu1 %v2518_v1 }
0x21ba   :  { %1834 = vmatprep.subr.bf16.mxu1 %v2906_v31 }
0x21bd   :  { %1835 = vmatpush1.bf16.msra.mxu1 %v2911_v33 }
0x228b   :  { %v1663_v3 = vpop.f32.mrb[36].mxu1 }
0x228c   :  { %v1672_v8 = vadd.f32 %v1663_v3, %v2983_v21  ;;  %v1665_v9 = vpop.f32.mrb[37].mxu1 }
0x228d   :  { %v1666_v12 = vpop.f32.mrb[38].mxu1 }
0x228e   :  { %v1674_v10 = vmul.f32 %v1672_v8, %v2675_v51  ;;  %v1667_v14 = vpop.f32.mrb[39].mxu1 }
0x228f   :  { %v1673_v17 = vadd.f32 %v1667_v14, %v2981_v16 }
0x2290   :  { %2454 = vtanh.f32 %v1674_v10 }
0x2291   :  { %v1675_v18 = vmul.f32 %v1673_v17, %v2675_v51 }
0x2293   :  { %2456 = vtanh.f32 %v1675_v18 }
0x229a   :  { %v2455_v4 = vpop.eup %2454 }
0x229b   :  { %v1678_v50 = vmul.f32 %v2455_v4, %v2675_v51 }
0x229d   :  { %v2457_v2 = vpop.eup %2456  ;;  %v1680_v0 = vadd.f32 %v1678_v50, %v2680_v61 }
0x229e   :  { %v1679_v37 = vmul.f32 %v2457_v2, %v2675_v51 }
0x229f   :  { %1686 = vrot.lane.b32.xlu1 %v1680_v0, %s2520_s3  ;;  %v1682_v44 = vmul.f32 %v1680_v0, %v1599_v56 }
0x22a0   :  { %v1681_v21 = vadd.f32 %v1679_v37, %v2680_v61 }
0x22a2   :  { %1688 = vrot.lane.b32.xlu0 %v1681_v21, %s2520_s3  ;;  %v1683_v6 = vmul.f32 %v1681_v21, %v1600_v38 }
0x2311   :  { %v1687_v36 = vpop.permute.xlu1 %1686 }
0x2312   :  { %v1692_v16 = vmul.f32 %v1687_v36, %v1680_v0 }
0x2314   :  { %1696 = vrot.lane.b32.xlu1 %v1692_v16, %s2521_s28  ;;  %v1689_v41 = vpop.permute.xlu0 %1688 }
0x2315   :  { %v1693_v42 = vmul.f32 %v1689_v41, %v1681_v21 }
0x2317   :  { %1698 = vrot.lane.b32.xlu0 %v1693_v42, %s2521_s28 }
0x2386   :  { %v1697_v5 = vpop.permute.xlu1 %1696 }
0x2387   :  { %v1702_v26 = vadd.f32 %v1697_v5, %v1682_v44 }
0x2389   :  { %2458 = vtanh.f32 %v1702_v26  ;;  %v1699_v7 = vpop.permute.xlu0 %1698 }
0x238a   :  { %v1703_v48 = vadd.f32 %v1699_v7, %v1683_v6 }
0x238c   :  { %2460 = vtanh.f32 %v1703_v48 }
0x2393   :  { %v2459_v27 = vpop.eup %2458 }
0x2394   :  { %1708 = vrot.lane.b32.xlu1 %v2459_v27, %s2520_s3 }
0x2396   :  { %v2461_v40 = vpop.eup %2460 }
0x2397   :  { %1710 = vrot.lane.b32.xlu0 %v2461_v40, %s2520_s3 }
0x2406   :  { %v1709_v63 = vpop.permute.xlu1 %1708 }
0x2407   :  { %v1714_v30 = vmul.f32 %v1709_v63, %v1680_v0 }
0x2409   :  { %v1711_v29 = vpop.permute.xlu0 %1710 }
0x240a   :  { %v1715_v28 = vmul.f32 %v1711_v29, %v1681_v21 }
0x240c   :  { %v3102_v11 = vpack.c.bf16 %v1715_v28, %v1714_v30 }
0x240e   :  { %1718 = vrot.lane.b32.xlu1 %v3102_v11, %s2521_s28 }
0x2480   :  { %v3106_v49 = vpop.permute.xlu1 %1718 }
0x2481   :  { %2283 = vmatmul.mubr.msk.bf16.vlgmr.msra.gmra.mrb[44].mxu0 %vm218_vm5, %v3106_v49 }
0x2482   :  { %1933 = vmatpush1.bf16.msra.mxu0 %v2893_v24  ;;  %1964 = vmatprep.mubr.bf16.mxu0 %v2518_v1 }
0x2483   :  { %1934 = vmatprep.subr.bf16.mxu0 %v2906_v31 }
0x2486   :  { %1935 = vmatpush1.bf16.msra.mxu0 %v2911_v33 }
0x2554   :  { %v1763_v23 = vpop.f32.mrb[44].mxu0 }
0x2555   :  { %v1772_v52 = vadd.f32 %v1763_v23, %v2988_v43  ;;  %v1765_v53 = vpop.f32.mrb[45].mxu0 }
0x2556   :  { %v1766_v54 = vpop.f32.mrb[46].mxu0 }
0x2557   :  { %v1774_v55 = vmul.f32 %v1772_v52, %v2675_v51  ;;  %v1767_v56 = vpop.f32.mrb[47].mxu0 }
0x2558   :  { %v1773_v57 = vadd.f32 %v1767_v56, %v2977_v13 }
0x2559   :  { %2462 = vtanh.f32 %v1774_v55 }
0x255a   :  { %v1775_v22 = vmul.f32 %v1773_v57, %v2675_v51 }
0x255c   :  { %2464 = vtanh.f32 %v1775_v22 }
0x2563   :  { %v2463_v24 = vpop.eup %2462 }
0x2564   :  { %v1778_v1 = vmul.f32 %v2463_v24, %v2675_v51 }
0x2566   :  { %v2465_v31 = vpop.eup %2464  ;;  %v1780_v33 = vadd.f32 %v1778_v1, %v2680_v61 }
0x2567   :  { %v1779_v38 = vmul.f32 %v2465_v31, %v2675_v51 }
0x2568   :  { %1786 = vrot.lane.b32.xlu0 %v1780_v33, %s2520_s3  ;;  %v1782_v60 = vmul.f32 %v1780_v33, %v1702_v26 }
0x2569   :  { %v1781_v43 = vadd.f32 %v1779_v38, %v2680_v61 }
0x256b   :  { %1788 = vrot.lane.b32.xlu1 %v1781_v43, %s2520_s3  ;;  %v1783_v25 = vmul.f32 %v1781_v43, %v1703_v48 }
0x25da   :  { %v1787_v58 = vpop.permute.xlu0 %1786 }
0x25db   :  { %v1792_v13 = vmul.f32 %v1787_v58, %v1780_v33 }
0x25dd   :  { %1796 = vrot.lane.b32.xlu0 %v1792_v13, %s2521_s28  ;;  %v1789_v45 = vpop.permute.xlu1 %1788 }
0x25de   :  { %v1793_v59 = vmul.f32 %v1789_v45, %v1781_v43 }
0x25e0   :  { %1798 = vrot.lane.b32.xlu1 %v1793_v59, %s2521_s28 }
0x264f   :  { %v1797_v62 = vpop.permute.xlu0 %1796 }
0x2650   :  { %v1802_v15 = vadd.f32 %v1797_v62, %v1782_v60 }
0x2652   :  { %2466 = vtanh.f32 %v1802_v15  ;;  %v1799_v3 = vpop.permute.xlu1 %1798 }
0x2653   :  { %v1803_v8 = vadd.f32 %v1799_v3, %v1783_v25 }
0x2655   :  { %2468 = vtanh.f32 %v1803_v8 }
0x265c   :  { %v2467_v9 = vpop.eup %2466 }
0x265d   :  { %1808 = vrot.lane.b32.xlu0 %v2467_v9, %s2520_s3 }
0x265f   :  { %v2469_v12 = vpop.eup %2468 }
0x2660   :  { %1810 = vrot.lane.b32.xlu1 %v2469_v12, %s2520_s3 }
0x26cf   :  { %v1809_v10 = vpop.permute.xlu0 %1808 }
0x26d0   :  { %v1814_v17 = vmul.f32 %v1809_v10, %v1780_v33 }
0x26d2   :  { %v1811_v14 = vpop.permute.xlu1 %1810 }
0x26d3   :  { %v1815_v18 = vmul.f32 %v1811_v14, %v1781_v43 }
0x26d5   :  { %v3128_v4 = vpack.c.bf16 %v1815_v18, %v1814_v17 }
0x26d7   :  { %1827 = vrot.lane.b32.xlu0 %v3128_v4, %s2521_s28 }
0x2749   :  { %v1828_v50 = vpop.permute.xlu0 %1827 }
0x274a   :  { %2284 = vmatmul.mubr.msk.bf16.vlgmr.msra.gmra.mrb[40].mxu1 %vm218_vm5, %v1828_v50 }
0x281d   :  { %v1866_v2 = vpop.f32.mrb[40].mxu1 }
0x281e   :  { %v1875_v0 = vadd.f32 %v1866_v2, %v2994_v39  ;;  %v1868_v37 = vpop.f32.mrb[41].mxu1 }
0x281f   :  { %v1869_v21 = vpop.f32.mrb[42].mxu1  ;;  %v1615_v37 = vrot.slane %v3079_v34, 4  ;;  %v2356_v34 = vld [vmem:[%s3278_s7 + $0x10] sm:$0xff]  }
0x2820   :  { %v1877_v36 = vmul.f32 %v1875_v0, %v2675_v51  ;;  %v1870_v16 = vpop.f32.mrb[43].mxu1  ;;  %v1412_v0 = vrot.slane %v3030_v19, 4  ;;  %v1818_v21 = vrot.slane %v3128_v4, 4  ;;  %v2354_v19 = vld [vmem:[%s3278_s7] sm:$0xff]   ;;  %v2357_v4 = vld [vmem:[%s3278_s7 + $0x18] sm:$0xff]  }
0x2821   :  { %v1876_v41 = vadd.f32 %v1870_v16, %v2972_v32  ;;  %2303 = vmatprep.subr.bf16.mxu1 %v2354_v19 }
0x2822   :  { %2470 = vtanh.f32 %v1877_v36  ;;  %v2355_v36 = vld [vmem:[%s3278_s7 + $0x8] sm:$0xff]   ;;  %2304 = vmatpush3.bf16.msra.mxu1 %v2354_v19 }
0x2823   :  { %v1878_v42 = vmul.f32 %v1876_v41, %v2675_v51  ;;  %2305 = vmatprep.subr.bf16.mxu1 %v2355_v36 }
0x2825   :  { %2472 = vtanh.f32 %v1878_v42 }
0x2826   :  { %2306 = vmatpush3.bf16.msra.mxu1 %v2355_v36 }
0x2827   :  { %2307 = vmatprep.subr.bf16.mxu1 %v2356_v34 }
0x282a   :  { %2308 = vmatpush3.bf16.msra.mxu1 %v2356_v34 }
0x282b   :  { %2309 = vmatprep.subr.bf16.mxu1 %v2357_v4 }
0x282c   :  { %v2471_v44 = vpop.eup %2470 }
0x282d   :  { %v1881_v5 = vmul.f32 %v2471_v44, %v2675_v51 }
0x282e   :  { %2310 = vmatpush3.bf16.msra.mxu1 %v2357_v4 }
0x282f   :  { %v2473_v26 = vpop.eup %2472  ;;  %v1883_v6 = vadd.f32 %v1881_v5, %v2680_v61 }
0x2830   :  { %v1882_v7 = vmul.f32 %v2473_v26, %v2675_v51 }
0x2831   :  { %1889 = vrot.lane.b32.xlu1 %v1883_v6, %s2520_s3  ;;  %v1885_v63 = vmul.f32 %v1883_v6, %v1802_v15 }
0x2832   :  { %v1884_v39 = vadd.f32 %v1882_v7, %v2680_v61 }
0x2834   :  { %1891 = vrot.lane.b32.xlu0 %v1884_v39, %s2520_s3  ;;  %v1886_v28 = vmul.f32 %v1884_v39, %v1803_v8 }
0x28a3   :  { %v1890_v48 = vpop.permute.xlu1 %1889 }
0x28a4   :  { %v1895_v32 = vmul.f32 %v1890_v48, %v1883_v6 }
0x28a6   :  { %1899 = vrot.lane.b32.xlu1 %v1895_v32, %s2521_s28  ;;  %v1892_v27 = vpop.permute.xlu0 %1891 }
0x28a7   :  { %v1896_v40 = vmul.f32 %v1892_v27, %v1884_v39 }
0x28a9   :  { %1901 = vrot.lane.b32.xlu0 %v1896_v40, %s2521_s28 }
0x2918   :  { %v1900_v29 = vpop.permute.xlu1 %1899 }
0x2919   :  { %v1905_v30 = vadd.f32 %v1900_v29, %v1885_v63 }
0x291b   :  { %2474 = vtanh.f32 %v1905_v30  ;;  %v1902_v23 = vpop.permute.xlu0 %1901 }
0x291c   :  { %v1906_v52 = vadd.f32 %v1902_v23, %v1886_v28 }
0x291e   :  { %2476 = vtanh.f32 %v1906_v52 }
0x2925   :  { %v2475_v53 = vpop.eup %2474 }
0x2926   :  { %1911 = vrot.lane.b32.xlu1 %v2475_v53, %s2520_s3 }
0x2928   :  { %v2477_v54 = vpop.eup %2476 }
0x2929   :  { %1913 = vrot.lane.b32.xlu0 %v2477_v54, %s2520_s3 }
0x2998   :  { %v1912_v55 = vpop.permute.xlu1 %1911 }
0x2999   :  { %v1917_v57 = vmul.f32 %v1912_v55, %v1883_v6 }
0x299b   :  { %v1914_v56 = vpop.permute.xlu0 %1913 }
0x299c   :  { %v1918_v22 = vmul.f32 %v1914_v56, %v1884_v39 }
0x299e   :  { %v1919_v24 = vpack.c.bf16 %v1918_v22, %v1917_v57 }
0x29a0   :  { %1921 = vrot.lane.b32.xlu1 %v1919_v24, %s2521_s28 }
0x2a12   :  { %v3148_v1 = vpop.permute.xlu1 %1921 }
0x2a13   :  { %2285 = vmatmul.mubr.msk.bf16.vlgmr.msra.gmra.mrb[48].mxu0 %vm218_vm5, %v3148_v1 }
0x2ae6   :  { %v1966_v31 = vpop.f32.mrb[48].mxu0 }
0x2ae7   :  { %v1975_v33 = vadd.f32 %v1966_v31, %v2996_v46  ;;  %v1968_v38 = vpop.f32.mrb[49].mxu0 }
0x2ae8   :  { %v1969_v43 = vpop.f32.mrb[50].mxu0 }
0x2ae9   :  { %v1977_v58 = vmul.f32 %v1975_v33, %v2675_v51  ;;  %v1970_v13 = vpop.f32.mrb[51].mxu0 }
0x2aea   :  { %v1976_v45 = vadd.f32 %v1970_v13, %v2968_v20 }
0x2aeb   :  { %2478 = vtanh.f32 %v1977_v58 }
0x2aec   :  { %v1978_v59 = vmul.f32 %v1976_v45, %v2675_v51 }
0x2aee   :  { %2480 = vtanh.f32 %v1978_v59 }
0x2af5   :  { %v2479_v60 = vpop.eup %2478 }
0x2af6   :  { %v1981_v62 = vmul.f32 %v2479_v60, %v2675_v51 }
0x2af8   :  { %v2481_v15 = vpop.eup %2480  ;;  %v1983_v25 = vadd.f32 %v1981_v62, %v2680_v61 }
0x2af9   :  { %v1982_v3 = vmul.f32 %v2481_v15, %v2675_v51 }
0x2afa   :  { %1989 = vrot.lane.b32.xlu0 %v1983_v25, %s2520_s3  ;;  %v1985_v10 = vmul.f32 %v1983_v25, %v1905_v30 }
0x2afb   :  { %v1984_v46 = vadd.f32 %v1982_v3, %v2680_v61 }
0x2afd   :  { %1991 = vrot.lane.b32.xlu1 %v1984_v46, %s2520_s3  ;;  %v1986_v18 = vmul.f32 %v1984_v46, %v1906_v52 }
0x2b6c   :  { %v1990_v8 = vpop.permute.xlu0 %1989 }
0x2b6d   :  { %v1995_v20 = vmul.f32 %v1990_v8, %v1983_v25 }
0x2b6f   :  { %1999 = vrot.lane.b32.xlu0 %v1995_v20, %s2521_s28  ;;  %v1992_v9 = vpop.permute.xlu1 %1991 }
0x2b70   :  { %v1996_v12 = vmul.f32 %v1992_v9, %v1984_v46 }
0x2b72   :  { %2001 = vrot.lane.b32.xlu1 %v1996_v12, %s2521_s28 }
0x2be1   :  { %v2000_v14 = vpop.permute.xlu0 %1999 }
0x2be2   :  { %v2005_v17 = vadd.f32 %v2000_v14, %v1985_v10 }
0x2be4   :  { %2482 = vtanh.f32 %v2005_v17  ;;  %v2002_v51 = vpop.permute.xlu1 %2001 }
0x2be5   :  { %v2006_v50 = vadd.f32 %v2002_v51, %v1986_v18 }
0x2be7   :  { %2484 = vtanh.f32 %v2006_v50 }
0x2bee   :  { %v2483_v2 = vpop.eup %2482 }
0x2bef   :  { %2011 = vrot.lane.b32.xlu0 %v2483_v2, %s2520_s3 }
0x2bf1   :  { %v2485_v61 = vpop.eup %2484 }
0x2bf2   :  { %2013 = vrot.lane.b32.xlu1 %v2485_v61, %s2520_s3 }
0x2bf3   :  { %1413 = vrot.lane.b32.xlu0 %v1412_v0, %s2521_s28 }
0x2bf6   :  { %1616 = vrot.lane.b32.xlu1 %v1615_v37, %s2521_s28 }
0x2bf7   :  { %1925 = vrot.lane.b32.xlu0 %v1919_v24, %s2520_s3 }
0x2bfa   :  { %1823 = vrot.lane.b32.xlu1 %v1818_v21, %s2520_s3 }
0x2bfb   :  { %1722 = vrot.lane.b32.xlu0 %v3102_v11, %s2520_s3 }
0x2bff   :  { %1519 = vrot.lane.b32.xlu0 %v3054_v35, %s2520_s3 }
0x2c03   :  { %1316 = vrot.lane.b32.xlu0 %v3006_v47, %s2520_s3 }
0x2c07   :  { %1819 = vrot.lane.b32.xlu0 %v1818_v21, %s2521_s28 }
0x2c61   :  { %v2012_v11 = vpop.permute.xlu0 %2011 }
0x2c62   :  { %v2017_v16 = vmul.f32 %v2012_v11, %v1983_v25 }
0x2c64   :  { %v2014_v35 = vpop.permute.xlu1 %2013 }
0x2c65   :  { %v2018_v41 = vmul.f32 %v2014_v35, %v1984_v46  ;;  %v1414_v42 = vpop.permute.xlu0 %1413 }
0x2c66   :  { %1416 = vst.msk [vmem:[#allocation3] sm:$0xf0] %vm417_vm6, %v1414_v42 }
0x2c67   :  { %v2019_v47 = vpack.c.bf16 %v2018_v41, %v2017_v16 }
0x2c68   :  { %v1617_v44 = vpop.permute.xlu1 %1616 }
0x2c69   :  { %v2021_v5 = vrot.slane %v2019_v47, 4  ;;  %1619 = vst.msk [vmem:[#allocation3 + $0x8] sm:$0xf0] %vm417_vm6, %v1617_v44  ;;  %v1926_v26 = vpop.permute.xlu0 %1925 }
0x2c6a   :  { %1928 = vst.msk [vmem:[#allocation3] sm:$0xf0] %vm319_vm7, %v1926_v26 }
0x2c6b   :  { %2026 = vrot.lane.b32.xlu1 %v2021_v5, %s2520_s3 }
0x2c6c   :  { %v1824_v6 = vpop.permute.xlu1 %1823 }
0x2c6d   :  { %1826 = vst.msk [vmem:[#allocation3 + $0x8] sm:$0xf] %vm422_vm8, %v1824_v6  ;;  %v1723_v7 = vpop.permute.xlu0 %1722 }
0x2c6e   :  { %1725 = vst.msk [vmem:[#allocation3 + $0x8] sm:$0xf0] %vm319_vm7, %v1723_v7 }
0x2c6f   :  { %1620 = vrot.lane.b32.xlu1 %v1615_v37, %s2520_s3 }
0x2c71   :  { %v1520_v39 = vpop.permute.xlu0 %1519 }
0x2c72   :  { %1522 = vst.msk [vmem:[#allocation3 + $0x10] sm:$0xf0] %vm319_vm7, %v1520_v39 }
0x2c73   :  { %1417 = vrot.lane.b32.xlu1 %v1412_v0, %s2520_s3 }
0x2c75   :  { %v1317_v48 = vpop.permute.xlu0 %1316  ;;  %v2031_v30 = vld [vmem:[#allocation3 + $0x8] sm:$0xff] }
0x2c76   :  { %1319 = vst.msk [vmem:[#allocation3 + $0x18] sm:$0xf0] %vm319_vm7, %v1317_v48 }
0x2c77   :  { %2022 = vrot.lane.b32.xlu1 %v2021_v5, %s2521_s28 }
0x2c79   :  { %v1820_v32 = vpop.permute.xlu0 %1819 }
0x2c7a   :  { %1822 = vst.msk [vmem:[#allocation3 + $0x10] sm:$0xf0] %vm417_vm6, %v1820_v32 }
0x2cdd   :  { %v2027_v27 = vpop.permute.xlu1 %2026 }
0x2cde   :  { %2029 = vst.msk [vmem:[#allocation3] sm:$0xf] %vm422_vm8, %v2027_v27 }
0x2ce1   :  { %v1621_v40 = vpop.permute.xlu1 %1620 }
0x2ce2   :  { %1623 = vst.msk [vmem:[#allocation3 + $0x10] sm:$0xf] %vm422_vm8, %v1621_v40 }
0x2ce3   :  { %1721 = vst.msk [vmem:[#allocation3 + $0x10] sm:$0xf] %vm314_vm4, %v3106_v49  ;;  %v2286_v49 = vld [vmem:[%s3279_s8] ss:$0 sm:$0xff] }
0x2ce5   :  { %v1418_v63 = vpop.permute.xlu1 %1417  ;;  %v2030_v29 = vld [vmem:[#allocation3] sm:$0xff] }
0x2ce6   :  { %1420 = vst.msk [vmem:[#allocation3 + $0x18] sm:$0xf] %vm422_vm8, %v1418_v63  ;;  %2311 = vmatprep.mubr.msk.bf16.mxu1 %vm1101_vm9, %v2030_v29 }
0x2ce7   :  { %1924 = vst.msk [vmem:[#allocation3 + $0x18] sm:$0xf] %vm314_vm4, %v3148_v1  ;;  %2312 = vmatmul.mubr.msk.bf16.vlgmr.msra.gmra.mrb[44].mxu1 %vm1101_vm9, %v2031_v30 }
0x2ce9   :  { %v2023_v28 = vpop.permute.xlu1 %2022 }
0x2cea   :  { %2025 = vst.msk [vmem:[#allocation3 + $0x18] sm:$0xf0] %vm417_vm6, %v2023_v28  ;;  %v2032_v23 = vld [vmem:[#allocation3 + $0x10] sm:$0xff] }
0x2ceb   :  { %2315 = vmatprep.mubr.msk.bf16.mxu1 %vm1101_vm9, %v2032_v23 }
0x2cf1   :  { %v2033_v52 = vld [vmem:[#allocation3 + $0x18] sm:$0xff] }
0x2cf2   :  { %2316 = vmatmul.mubr.msk.bf16.gmra.mrb[48].mxu1 %vm1101_vm9, %v2033_v52 }
0x2dba   :  { %v2313_v53 = vpop.f32.mrb[44].mxu1 }
0x2dbb   :  { %v2128_v54 = vadd.f32 %v2313_v53, %v2286_v49  ;;  %v2119_v55 = vpop.f32.mrb[45].mxu1 }
0x2dbc   :  { %v2314_v56 = vpop.f32.mrb[46].mxu1  ;;  %v2120_v24 = vadd.f32 %v2286_v49, %v2119_v55 }
0x2dbd   :  { %2154 = vmax.xlane.f32.xlu0 %v2128_v54  ;;  %v2122_v57 = vpop.f32.mrb[47].mxu1  ;;  %v2131_v1 = vadd.f32 %v2314_v56, %v2286_v49 }
0x2dbe   :  { %v2123_v22 = vadd.f32 %v2286_v49, %v2122_v57 }
0x2dc0   :  { %2152 = vmax.xlane.f32.xlu1 %v2123_v22 }
0x2dc1   :  { %2150 = vmax.xlane.f32.xlu0 %v2120_v24 }
0x2dc5   :  { %v2317_v31 = vpop.f32.mrb[48].mxu1  ;;  %2156 = vmax.xlane.f32.xlu0 %v2131_v1 }
0x2dc6   :  { %v2135_v33 = vpop.f32.mrb[49].mxu1  ;;  %v2144_v45 = vadd.f32 %v2317_v31, %v2286_v49 }
0x2dc7   :  { %v2136_v38 = vadd.f32 %v2286_v49, %v2135_v33  ;;  %v2318_v43 = vpop.f32.mrb[50].mxu1 }
0x2dc8   :  { %v2138_v58 = vpop.f32.mrb[51].mxu1  ;;  %v2147_v59 = vadd.f32 %v2318_v43, %v2286_v49 }
0x2dc9   :  { %v2139_v13 = vadd.f32 %v2286_v49, %v2138_v58  ;;  %2158 = vmax.xlane.f32.xlu1 %v2136_v38 }
0x2dcb   :  { %2160 = vmax.xlane.f32.xlu0 %v2139_v13 }
0x2dcd   :  { %2162 = vmax.xlane.f32.xlu1 %v2144_v45 }
0x2dcf   :  { %2164 = vmax.xlane.f32.xlu0 %v2147_v59 }
0x2e4a   :  { %v2155_v60 = vpop.xlane.xlu0 %2154 }
0x2e4b   :  { %v2168_v62 = vsub.f32 %v2128_v54, %v2155_v60 }
0x2e4d   :  { %v2178_v15 = vmul.f32 1.442695, %v2168_v62  ;;  %v2153_v3 = vpop.xlane.xlu1 %2152 }
0x2e4e   :  { %v2151_v25 = vpop.xlane.xlu0 %2150  ;;  %v3222_v20 = vsub.f32 %v2123_v22, %v2153_v3 }
0x2e4f   :  { %2486 = vpow2.f32 %v2178_v15  ;;  %v3219_v46 = vsub.f32 %v2120_v24, %v2151_v25 }
0x2e50   :  { %v2176_v14 = vmul.f32 1.442695, %v3222_v20 }
0x2e51   :  { %v2174_v8 = vmul.f32 1.442695, %v3219_v46 }
0x2e52   :  { %v2157_v9 = vpop.xlane.xlu0 %2156 }
0x2e53   :  { %2488 = vpow2.f32 %v2174_v8  ;;  %v3224_v12 = vsub.f32 %v2131_v1, %v2157_v9 }
0x2e55   :  { %v2180_v10 = vmul.f32 1.442695, %v3224_v12 }
0x2e56   :  { %v2159_v17 = vpop.xlane.xlu1 %2158 }
0x2e57   :  { %2490 = vpow2.f32 %v2180_v10  ;;  %v3228_v18 = vsub.f32 %v2136_v38, %v2159_v17 }
0x2e58   :  { %v2161_v51 = vpop.xlane.xlu0 %2160  ;;  %2492 = vpow2.f32 %v2176_v14 }
0x2e59   :  { %v2487_v50 = vpop.eup %2486  ;;  %v2182_v2 = vmul.f32 1.442695, %v3228_v18  ;;  %v3231_v61 = vsub.f32 %v2139_v13, %v2161_v51 }
0x2e5a   :  { %2194 = vadd.xlane.f32.xlu1 %v2487_v50  ;;  %v2163_v0 = vpop.xlane.xlu1 %2162 }
0x2e5b   :  { %2494 = vpow2.f32 %v2182_v2  ;;  %v2184_v37 = vmul.f32 1.442695, %v3231_v61  ;;  %v3234_v21 = vsub.f32 %v2144_v45, %v2163_v0 }
0x2e5c   :  { %v2165_v19 = vpop.xlane.xlu0 %2164 }
0x2e5d   :  { %v2489_v36 = vpop.eup %2488  ;;  %v2186_v34 = vmul.f32 1.442695, %v3234_v21  ;;  %v3237_v11 = vsub.f32 %v2147_v59, %v2165_v19  ;;  %2496 = vpow2.f32 %v2184_v37 }
0x2e5e   :  { %2190 = vadd.xlane.f32.xlu1 %v2489_v36 }
0x2e5f   :  { %2498 = vpow2.f32 %v2186_v34  ;;  %v2188_v4 = vmul.f32 1.442695, %v3237_v11 }
0x2e61   :  { %v2491_v35 = vpop.eup %2490  ;;  %2500 = vpow2.f32 %v2188_v4 }
0x2e62   :  { %2196 = vadd.xlane.f32.xlu0 %v2491_v35  ;;  %v2493_v16 = vpop.eup %2492 }
0x2e65   :  { %v2495_v41 = vpop.eup %2494 }
0x2e66   :  { %2198 = vadd.xlane.f32.xlu1 %v2495_v41  ;;  %2192 = vadd.xlane.f32.xlu0 %v2493_v16 }
0x2e67   :  { %v2497_v42 = vpop.eup %2496 }
0x2e69   :  { %v2499_v47 = vpop.eup %2498 }
0x2e6a   :  { %2202 = vadd.xlane.f32.xlu1 %v2499_v47  ;;  %2200 = vadd.xlane.f32.xlu0 %v2497_v42 }
0x2e6b   :  { %v2501_v44 = vpop.eup %2500 }
0x2e6e   :  { %2204 = vadd.xlane.f32.xlu0 %v2501_v44 }
0x2ee7   :  { %v2195_v5 = vpop.xlane.xlu1 %2194 }
0x2ee8   :  { %2502 = vlog2.f32 %v2195_v5 }
0x2eeb   :  { %v2191_v26 = vpop.xlane.xlu1 %2190 }
0x2eec   :  { %2504 = vlog2.f32 %v2191_v26 }
0x2eef   :  { %v2197_v6 = vpop.xlane.xlu0 %2196 }
0x2ef0   :  { %2506 = vlog2.f32 %v2197_v6 }
0x2ef2   :  { %v2503_v7 = vpop.eup %2502 }
0x2ef3   :  { %v2211_v39 = vmul.f32 0.6931472, %v2503_v7  ;;  %v2199_v48 = vpop.xlane.xlu1 %2198  ;;  %v2193_v32 = vpop.xlane.xlu0 %2192 }
0x2ef4   :  { %2508 = vlog2.f32 %v2199_v48 }
0x2ef5   :  { %v2224_v27 = vsub.f32 %v2168_v62, %v2211_v39  ;;  %2510 = vlog2.f32 %v2193_v32 }
0x2ef6   :  { %v2505_v40 = vpop.eup %2504 }
0x2ef7   :  { %2232 = vst [vmem:[%s3280_s9 + $0x10] sm:$0xff] %v2224_v27  ;;  %v2207_v63 = vmul.f32 0.6931472, %v2505_v40  ;;  %v2203_v29 = vpop.xlane.xlu1 %2202  ;;  %v2201_v30 = vpop.xlane.xlu0 %2200 }
0x2ef8   :  { %2512 = vlog2.f32 %v2203_v29 }
0x2ef9   :  { %v2222_v28 = vsub.f32 %v3219_v46, %v2207_v63  ;;  %2514 = vlog2.f32 %v2201_v30 }
0x2efa   :  { %v2507_v23 = vpop.eup %2506 }
0x2efb   :  { %2230 = vst [vmem:[%s3280_s9] sm:$0xff] %v2222_v28  ;;  %v2213_v52 = vmul.f32 0.6931472, %v2507_v23  ;;  %v2205_v49 = vpop.xlane.xlu0 %2204 }
0x2efc   :  { %2516 = vlog2.f32 %v2205_v49 }
0x2efd   :  { %v2225_v53 = vsub.f32 %v3224_v12, %v2213_v52 }
0x2efe   :  { %v2509_v54 = vpop.eup %2508 }
0x2eff   :  { %v2511_v55 = vpop.eup %2510  ;;  %2233 = vst [vmem:[%s3280_s9 + $0x18] sm:$0xff] %v2225_v53  ;;  %v2215_v56 = vmul.f32 0.6931472, %v2509_v54 }
0x2f00   :  { %v2209_v57 = vmul.f32 0.6931472, %v2511_v55 }
0x2f01   :  { %v2226_v22 = vsub.f32 %v3228_v18, %v2215_v56 }
0x2f02   :  { %v2513_v24 = vpop.eup %2512  ;;  %v2223_v1 = vsub.f32 %v3222_v20, %v2209_v57 }
0x2f03   :  { %v2515_v31 = vpop.eup %2514  ;;  %2234 = vst [vmem:[%s3280_s9 + $0x20] sm:$0xff] %v2226_v22  ;;  %v2219_v33 = vmul.f32 0.6931472, %v2513_v24 }
0x2f04   :  { %2231 = vst [vmem:[%s3280_s9 + $0x8] sm:$0xff] %v2223_v1  ;;  %v2217_v38 = vmul.f32 0.6931472, %v2515_v31 }
0x2f05   :  { %v2228_v43 = vsub.f32 %v3234_v21, %v2219_v33 }
0x2f06   :  { %v2517_v58 = vpop.eup %2516  ;;  %v2227_v13 = vsub.f32 %v3231_v61, %v2217_v38 }
0x2f07   :  { %2236 = vst [vmem:[%s3280_s9 + $0x30] sm:$0xff] %v2228_v43  ;;  %v2221_v45 = vmul.f32 0.6931472, %v2517_v58 }
0x2f08   :  { %2235 = vst [vmem:[%s3280_s9 + $0x28] sm:$0xff] %v2227_v13 }
0x2f09   :  { %v2229_v59 = vsub.f32 %v3237_v11, %v2221_v45 }
0x2f0b   :  { %2237 = vst [vmem:[%s3280_s9 + $0x38] sm:$0xff] %v2229_v59 }

</bundles_post_ra>
